<compile_context>
chip_gen: v7x
topology: tpu7x:2x2x1
jax: 0.10.0
libtpu: 0.0.40
codegen_flags: <defaults>
</compile_context>

<pallas_src>
import math
import functools

import jax
import jax.numpy as jnp
from jax.experimental import pallas as pl
from jax.experimental.pallas import tpu as pltpu

LN_EPS = 1e-5          # PyTorch nn.LayerNorm default
N_PROMPT = 10          # SoftPrompt(10, 0.5, cfg)
_GELU_C = 0.7978845608028654   # sqrt(2/pi), GELU tanh approximation
_NEG_BIG = -1e30       # finite "-inf" for masking (NaN-safe)


# ---------------------------------------------------------------------------
# In-kernel helpers (all operate on loaded VMEM values)
# ---------------------------------------------------------------------------

def _layernorm(x, g, b):
    mu = jnp.mean(x, axis=-1, keepdims=True)
    var = jnp.mean((x - mu) ** 2, axis=-1, keepdims=True)
    return (x - mu) * jax.lax.rsqrt(var + LN_EPS) * g + b


def _bf16_matmul(a, w, bias=None):
    # bf16 MXU operands, f32 accumulation.
    out = jnp.dot(a.astype(jnp.bfloat16), w.astype(jnp.bfloat16),
                  preferred_element_type=jnp.float32)
    if bias is not None:
        out = out + bias
    return out


def _mha_proj(q, k, v, w_proj_ref, *, n_head, scale, causal):
    """Multi-head attention + output projection (no bias), fused.

    q: (Tq, C) f32, k/v: (Tk, C) f32, w_proj_ref: (C, C) ref.
    Returns concat_h(softmax(q_h k_h^T * scale) v_h) @ W_proj as a sum of
    per-head partial projections (avoids any lane concatenation).
    """
    Tq, C = q.shape
    Tk = k.shape[0]
    Dh = C // n_head

    if causal:
        rows = jax.lax.broadcasted_iota(jnp.int32, (Tq, Tk), 0)
        cols = jax.lax.broadcasted_iota(jnp.int32, (Tq, Tk), 1)
        keep = cols <= rows

    acc = jnp.zeros((Tq, C), jnp.float32)
    for h in range(n_head):
        sl = slice(h * Dh, (h + 1) * Dh)
        qh = q[:, sl].astype(jnp.bfloat16)
        kh = k[:, sl].astype(jnp.bfloat16)
        vh = v[:, sl].astype(jnp.bfloat16)

        att = jax.lax.dot_general(qh, kh, (((1,), (1,)), ((), ())),
                                  preferred_element_type=jnp.float32) * scale
        if causal:
            att = jnp.where(keep, att, _NEG_BIG)
        att = att - jnp.max(att, axis=-1, keepdims=True)
        p = jnp.exp(att)
        p = p * pl.reciprocal(jnp.sum(p, axis=-1, keepdims=True), approx=True)

        oh = jnp.dot(p.astype(jnp.bfloat16), vh,
                     preferred_element_type=jnp.float32)          # (Tq, Dh)
        wph = w_proj_ref[sl, :]                                   # (Dh, C)
        acc = acc + jnp.dot(oh.astype(jnp.bfloat16),
                            wph.astype(jnp.bfloat16),
                            preferred_element_type=jnp.float32)
    return acc


# ---------------------------------------------------------------------------
# Fused Pallas kernels (one grid step = one batch element)
# ---------------------------------------------------------------------------

def _self_attn_block_kernel(px_ref, g1_ref, b1_ref, wqkv_ref, bqkv_ref,
                            wpr_ref, bpr_ref, o_ref, *, n_head, scale):
    # out = p_x + c_proj( causal_attn( ln_1(p_x) ) )
    x = px_ref[...]                                   # (Tp, C)
    h = _layernorm(x, g1_ref[...], b1_ref[...])
    qkv = _bf16_matmul(h, wqkv_ref[...], bqkv_ref[...])   # (Tp, 3C)
    C = x.shape[-1]
    q, k, v = qkv[:, :C], qkv[:, C:2 * C], qkv[:, 2 * C:]
    y = _mha_proj(q, k, v, wpr_ref, n_head=n_head, scale=scale, causal=True)
    o_ref[...] = x + y + bpr_ref[...]


def _cross_attn_block_kernel(px_ref, enc_ref, g1_ref, b1_ref, g3_ref, b3_ref,
                             wimg_ref, bimg_ref, wcap_ref, bcap_ref,
                             wpr_ref, bpr_ref, o_ref, *, n_head, scale):
    # out = p_x + c_proj( cross_attn( ln_1(p_x), ln_3(x_enc) ) )
    x = px_ref[...]                                   # (Tp, C)
    e = enc_ref[...]                                  # (Ne, C)
    hq = _layernorm(x, g1_ref[...], b1_ref[...])
    he = _layernorm(e, g3_ref[...], b3_ref[...])
    kv = _bf16_matmul(he, wimg_ref[...], bimg_ref[...])    # (Ne, 2C)
    q = _bf16_matmul(hq, wcap_ref[...], bcap_ref[...])     # (Tp, C)
    C = x.shape[-1]
    k, v = kv[:, :C], kv[:, C:]
    y = _mha_proj(q, k, v, wpr_ref, n_head=n_head, scale=scale, causal=False)
    o_ref[...] = x + y + bpr_ref[...]


def _mlp_block_kernel(px_ref, g2_ref, b2_ref, wfc_ref, bfc_ref,
                      wpr_ref, bpr_ref, o_ref):
    # out = p_x + c_proj( gelu_tanh( c_fc( ln_2(p_x) ) ) )
    x = px_ref[...]
    h = _layernorm(x, g2_ref[...], b2_ref[...])
    hfc = _bf16_matmul(h, wfc_ref[...], bfc_ref[...])
    hact = 0.5 * hfc * (1.0 + jnp.tanh(_GELU_C * (hfc + 0.044715 * hfc * hfc * hfc)))
    o_ref[...] = x + _bf16_matmul(hact, wpr_ref[...], bpr_ref[...])


def _head_kernel(x_ref, gf_ref, bf_ref, wte_ref, o_ref):
    # logits = ln_f(x) @ wte^T  (tied lm_head; contract last dims, no .T copy)
    h = _layernorm(x_ref[...], gf_ref[...], bf_ref[...])
    o_ref[...] = jax.lax.dot_general(
        h.astype(jnp.bfloat16), wte_ref[...].astype(jnp.bfloat16),
        (((1,), (1,)), ((), ())), preferred_element_type=jnp.float32)


# ---------------------------------------------------------------------------
# pallas_call wrappers
# ---------------------------------------------------------------------------

_PARALLEL = pltpu.CompilerParams(dimension_semantics=("parallel",))


def _rep2d(shape):
    # small weight/bias block, resident across the batch grid axis
    return pl.BlockSpec(shape, lambda b: (0, 0))


def self_attn_block(p_x, p, n_head):
    B, Tp, C = p_x.shape
    scale = 1.0 / math.sqrt(C // n_head)
    kern = functools.partial(_self_attn_block_kernel, n_head=n_head, scale=scale)
    return pl.pallas_call(
        kern,
        grid=(B,),
        in_specs=[pl.BlockSpec((None, Tp, C), lambda b: (b, 0, 0)),
                  _rep2d((1, C)), _rep2d((1, C)),
                  _rep2d((C, 3 * C)), _rep2d((1, 3 * C)),
                  _rep2d((C, C)), _rep2d((1, C))],
        out_specs=pl.BlockSpec((None, Tp, C), lambda b: (b, 0, 0)),
        out_shape=jax.ShapeDtypeStruct((B, Tp, C), jnp.float32),
        compiler_params=_PARALLEL,
    )(p_x,
      p["ln_1_g"].reshape(1, C), p["ln_1_b"].reshape(1, C),
      p["attn_c_attn_w"], p["attn_c_attn_b"].reshape(1, 3 * C),
      p["attn_c_proj_w"], p["attn_c_proj_b"].reshape(1, C))


def cross_attn_block(p_x, x_enc, p, n_head):
    B, Tp, C = p_x.shape
    Ne = x_enc.shape[1]
    scale = 1.0 / math.sqrt(C // n_head)
    kern = functools.partial(_cross_attn_block_kernel, n_head=n_head, scale=scale)
    return pl.pallas_call(
        kern,
        grid=(B,),
        in_specs=[pl.BlockSpec((None, Tp, C), lambda b: (b, 0, 0)),
                  pl.BlockSpec((None, Ne, C), lambda b: (b, 0, 0)),
                  _rep2d((1, C)), _rep2d((1, C)),
                  _rep2d((1, C)), _rep2d((1, C)),
                  _rep2d((C, 2 * C)), _rep2d((1, 2 * C)),
                  _rep2d((C, C)), _rep2d((1, C)),
                  _rep2d((C, C)), _rep2d((1, C))],
        out_specs=pl.BlockSpec((None, Tp, C), lambda b: (b, 0, 0)),
        out_shape=jax.ShapeDtypeStruct((B, Tp, C), jnp.float32),
        compiler_params=_PARALLEL,
    )(p_x, x_enc,
      p["ln_1_g"].reshape(1, C), p["ln_1_b"].reshape(1, C),
      p["ln_3_g"].reshape(1, C), p["ln_3_b"].reshape(1, C),
      p["xattn_img_w"], p["xattn_img_b"].reshape(1, 2 * C),
      p["xattn_cap_w"], p["xattn_cap_b"].reshape(1, C),
      p["xattn_proj_w"], p["xattn_proj_b"].reshape(1, C))


def mlp_block(p_x, p):
    B, Tp, C = p_x.shape
    H = p["mlp_fc_w"].shape[1]
    return pl.pallas_call(
        _mlp_block_kernel,
        grid=(B,),
        in_specs=[pl.BlockSpec((None, Tp, C), lambda b: (b, 0, 0)),
                  _rep2d((1, C)), _rep2d((1, C)),
                  _rep2d((C, H)), _rep2d((1, H)),
                  _rep2d((H, C)), _rep2d((1, C))],
        out_specs=pl.BlockSpec((None, Tp, C), lambda b: (b, 0, 0)),
        out_shape=jax.ShapeDtypeStruct((B, Tp, C), jnp.float32),
        compiler_params=_PARALLEL,
    )(p_x,
      p["ln_2_g"].reshape(1, C), p["ln_2_b"].reshape(1, C),
      p["mlp_fc_w"], p["mlp_fc_b"].reshape(1, H),
      p["mlp_proj_w"], p["mlp_proj_b"].reshape(1, C))


def lm_head_block(x, params):
    B, T, C = x.shape
    V = params["wte"].shape[0]
    return pl.pallas_call(
        _head_kernel,
        grid=(B,),
        in_specs=[pl.BlockSpec((None, T, C), lambda b: (b, 0, 0)),
                  _rep2d((1, C)), _rep2d((1, C)),
                  _rep2d((V, C))],
        out_specs=pl.BlockSpec((None, T, V), lambda b: (b, 0, 0)),
        out_shape=jax.ShapeDtypeStruct((B, T, V), jnp.float32),
        compiler_params=_PARALLEL,
    )(x, params["ln_f_g"].reshape(1, C), params["ln_f_b"].reshape(1, C),
      params["wte"])


# ---------------------------------------------------------------------------
# Model (embedding gather / soft-prompt concat stay as cheap JAX glue)
# ---------------------------------------------------------------------------

def decoder_forward(params, tokens, x_enc, cfg):
    T = min(tokens.shape[1], cfg["block_size"])
    tokens = tokens[:, :T]
    pos = jnp.arange(T)
    x = params["wte"][tokens] + params["wpe"][pos][None, :, :]

    B = x.shape[0]
    C = cfg["n_embd"]
    n_head = cfg["n_head"]

    for p in params["blocks"]:
        # SoftPrompt: prepend 10 learned prompt tokens.
        prompt = jnp.broadcast_to(p["soft_prompt"][None], (B, N_PROMPT, C))
        p_x = jnp.concatenate([prompt, x], axis=1)
        # fused sub-blocks (each includes pre-LN, matmuls, attention/MLP,
        # output projection and the residual add)
        p_x = self_attn_block(p_x, p, n_head)
        p_x = cross_attn_block(p_x, x_enc, p, n_head)
        p_x = mlp_block(p_x, p)
        # drop the prompt tokens again
        x = p_x[:, N_PROMPT:, :]

    # fused final LayerNorm + tied lm_head (no wte.T materialization)
    return lm_head_block(x, params)


# ---------------------------------------------------------------------------
# Deterministic parameter init (synthetic; no checkpoint loading)
# ---------------------------------------------------------------------------

def init_block_params(key, C):
    ks = jax.random.split(key, 8)
    w = lambda k, s: 0.02 * jax.random.normal(k, s, jnp.float32)
    return dict(
        ln_1_g=jnp.ones((C,), jnp.float32), ln_1_b=jnp.zeros((C,), jnp.float32),
        ln_2_g=jnp.ones((C,), jnp.float32), ln_2_b=jnp.zeros((C,), jnp.float32),
        ln_3_g=jnp.ones((C,), jnp.float32), ln_3_b=jnp.zeros((C,), jnp.float32),
        attn_c_attn_w=w(ks[0], (C, 3 * C)), attn_c_attn_b=jnp.zeros((3 * C,), jnp.float32),
        attn_c_proj_w=w(ks[1], (C, C)), attn_c_proj_b=jnp.zeros((C,), jnp.float32),
        xattn_img_w=w(ks[2], (C, 2 * C)), xattn_img_b=jnp.zeros((2 * C,), jnp.float32),
        xattn_cap_w=w(ks[3], (C, C)), xattn_cap_b=jnp.zeros((C,), jnp.float32),
        xattn_proj_w=w(ks[4], (C, C)), xattn_proj_b=jnp.zeros((C,), jnp.float32),
        soft_prompt=jax.random.uniform(ks[5], (N_PROMPT, C), jnp.float32, -0.5, 0.5),
        mlp_fc_w=w(ks[6], (C, 4 * C)), mlp_fc_b=jnp.zeros((4 * C,), jnp.float32),
        mlp_proj_w=w(ks[7], (4 * C, C)), mlp_proj_b=jnp.zeros((C,), jnp.float32),
    )


def init_params(key, cfg):
    C = cfg["n_embd"]
    k_wte, k_wpe, k_blocks = jax.random.split(key, 3)
    block_keys = jax.random.split(k_blocks, cfg["n_layer"])
    return dict(
        wte=0.02 * jax.random.normal(k_wte, (cfg["vocab_size"], C), jnp.float32),
        wpe=0.02 * jax.random.normal(k_wpe, (cfg["block_size"], C), jnp.float32),
        blocks=[init_block_params(bk, C) for bk in block_keys],
        ln_f_g=jnp.ones((C,), jnp.float32),
        ln_f_b=jnp.zeros((C,), jnp.float32),
    )


# ---------------------------------------------------------------------------

if __name__ == "__main__":
    cfg = dict(vocab_size=50, n_embd=32, n_head=4, n_layer=2, block_size=32)

    key = jax.random.PRNGKey(0)
    k_tok, k_enc, k_param = jax.random.split(key, 3)

    B, T, N_enc = 2, 8, 16
    tokens = jax.random.randint(k_tok, (B, T), 0, cfg["vocab_size"])
    x_enc = jax.random.normal(k_enc, (B, N_enc, cfg["n_embd"]), jnp.float32)

    params = init_params(k_param, cfg)

    fwd = jax.jit(functools.partial(decoder_forward, cfg=cfg))
    logits = fwd(params, tokens, x_enc)
    jax.block_until_ready(logits)
    assert logits.shape == (B, T, cfg["vocab_size"]), logits.shape
    assert bool(jnp.all(jnp.isfinite(logits)))
    print("KERNEL_OK")
</pallas_src>

<mosaic_0001>
module attributes {stable_mosaic.version = 11 : i64} {
  func.func @_mlp_block_kernel(%arg0: i32, %arg1: memref<1x18x32xf32, #tpu.memory_space<vmem>>, %arg2: memref<1x32xf32, #tpu.memory_space<vmem>>, %arg3: memref<1x32xf32, #tpu.memory_space<vmem>>, %arg4: memref<32x128xf32, #tpu.memory_space<vmem>>, %arg5: memref<1x128xf32, #tpu.memory_space<vmem>>, %arg6: memref<128x32xf32, #tpu.memory_space<vmem>>, %arg7: memref<1x32xf32, #tpu.memory_space<vmem>>, %arg8: memref<1x18x32xf32, #tpu.memory_space<vmem>>) attributes {dimension_semantics = [#tpu.dimension_semantics<parallel>], iteration_bounds = array<i64: 2>, scalar_prefetch = 0 : i64, scratch_operands = 0 : i64, tpu.core_type = #tpu.core_type<tc>, window_params = [{transform_indices = @transform_0, window_bounds = array<i64: 1, 18, 32>}, {pipeline_mode = #tpu.pipeline_mode<synchronous>, transform_indices = @transform_1, window_bounds = array<i64: 1, 32>}, {pipeline_mode = #tpu.pipeline_mode<synchronous>, transform_indices = @transform_2, window_bounds = array<i64: 1, 32>}, {pipeline_mode = #tpu.pipeline_mode<synchronous>, transform_indices = @transform_3, window_bounds = array<i64: 32, 128>}, {pipeline_mode = #tpu.pipeline_mode<synchronous>, transform_indices = @transform_4, window_bounds = array<i64: 1, 128>}, {pipeline_mode = #tpu.pipeline_mode<synchronous>, transform_indices = @transform_5, window_bounds = array<i64: 128, 32>}, {pipeline_mode = #tpu.pipeline_mode<synchronous>, transform_indices = @transform_6, window_bounds = array<i64: 1, 32>}, {transform_indices = @transform_7, window_bounds = array<i64: 1, 18, 32>}]} {
    %c0 = arith.constant 0 : index
    %c0_0 = arith.constant 0 : index
    %c0_1 = arith.constant 0 : index
    %0 = vector.load %arg1[%c0, %c0_0, %c0_1] : memref<1x18x32xf32, #tpu.memory_space<vmem>>, vector<1x18x32xf32>
    %1 = vector.shape_cast %0 : vector<1x18x32xf32> to vector<18x32xf32>
    %c0_2 = arith.constant 0 : index
    %c0_3 = arith.constant 0 : index
    %2 = vector.load %arg2[%c0_2, %c0_3] : memref<1x32xf32, #tpu.memory_space<vmem>>, vector<1x32xf32>
    %c0_4 = arith.constant 0 : index
    %c0_5 = arith.constant 0 : index
    %3 = vector.load %arg3[%c0_4, %c0_5] : memref<1x32xf32, #tpu.memory_space<vmem>>, vector<1x32xf32>
    %cst = arith.constant dense<0.000000e+00> : vector<18xf32>
    %4 = vector.multi_reduction <add>, %1, %cst [1] : vector<18x32xf32> to vector<18xf32>
    %5 = vector.shape_cast %4 : vector<18xf32> to vector<18x1xf32>
    %cst_6 = arith.constant 3.200000e+01 : f32
    %6 = vector.broadcast %cst_6 : f32 to vector<18x1xf32>
    %7 = arith.divf %5, %6 : vector<18x1xf32>
    %8 = vector.broadcast %7 : vector<18x1xf32> to vector<18x32xf32>
    %9 = arith.subf %1, %8 : vector<18x32xf32>
    %10 = arith.mulf %9, %9 : vector<18x32xf32>
    %cst_7 = arith.constant dense<0.000000e+00> : vector<18xf32>
    %11 = vector.multi_reduction <add>, %10, %cst_7 [1] : vector<18x32xf32> to vector<18xf32>
    %12 = vector.shape_cast %11 : vector<18xf32> to vector<18x1xf32>
    %cst_8 = arith.constant 3.200000e+01 : f32
    %13 = vector.broadcast %cst_8 : f32 to vector<18x1xf32>
    %14 = arith.divf %12, %13 : vector<18x1xf32>
    %15 = vector.broadcast %7 : vector<18x1xf32> to vector<18x32xf32>
    %16 = arith.subf %1, %15 : vector<18x32xf32>
    %cst_9 = arith.constant 9.99999974E-6 : f32
    %17 = vector.broadcast %cst_9 : f32 to vector<18x1xf32>
    %18 = arith.addf %14, %17 : vector<18x1xf32>
    %19 = math.rsqrt %18 : vector<18x1xf32>
    %20 = vector.broadcast %19 : vector<18x1xf32> to vector<18x32xf32>
    %21 = arith.mulf %16, %20 : vector<18x32xf32>
    %22 = vector.broadcast %2 : vector<1x32xf32> to vector<18x32xf32>
    %23 = arith.mulf %21, %22 : vector<18x32xf32>
    %24 = vector.broadcast %3 : vector<1x32xf32> to vector<18x32xf32>
    %25 = arith.addf %23, %24 : vector<18x32xf32>
    %c0_10 = arith.constant 0 : index
    %c0_11 = arith.constant 0 : index
    %26 = vector.load %arg4[%c0_10, %c0_11] : memref<32x128xf32, #tpu.memory_space<vmem>>, vector<32x128xf32>
    %c0_12 = arith.constant 0 : index
    %c0_13 = arith.constant 0 : index
    %27 = vector.load %arg5[%c0_12, %c0_13] : memref<1x128xf32, #tpu.memory_space<vmem>>, vector<1x128xf32>
    %28 = arith.truncf %25 : vector<18x32xf32> to vector<18x32xbf16>
    %29 = arith.truncf %26 : vector<32x128xf32> to vector<32x128xbf16>
    %cst_14 = arith.constant dense<0.000000e+00> : vector<18x128xf32>
    %30 = tpu.matmul %28, %29, %cst_14 {dimension_numbers = #tpu.dot_dimension_numbers<[1], [0], [0], [1], [0, 0, 1, 1], [], []>} : vector<18x32xbf16>, vector<32x128xbf16>, vector<18x128xf32> -> vector<18x128xf32>
    %31 = vector.broadcast %27 : vector<1x128xf32> to vector<18x128xf32>
    %32 = arith.addf %30, %31 : vector<18x128xf32>
    %cst_15 = arith.constant 5.000000e-01 : f32
    %33 = vector.broadcast %cst_15 : f32 to vector<18x128xf32>
    %34 = arith.mulf %33, %32 : vector<18x128xf32>
    %cst_16 = arith.constant 4.471500e-02 : f32
    %35 = vector.broadcast %cst_16 : f32 to vector<18x128xf32>
    %36 = arith.mulf %35, %32 : vector<18x128xf32>
    %37 = arith.mulf %36, %32 : vector<18x128xf32>
    %38 = arith.mulf %37, %32 : vector<18x128xf32>
    %39 = arith.addf %32, %38 : vector<18x128xf32>
    %cst_17 = arith.constant 0.797884583 : f32
    %40 = vector.broadcast %cst_17 : f32 to vector<18x128xf32>
    %41 = arith.mulf %40, %39 : vector<18x128xf32>
    %42 = math.tanh %41 : vector<18x128xf32>
    %cst_18 = arith.constant 1.000000e+00 : f32
    %43 = vector.broadcast %cst_18 : f32 to vector<18x128xf32>
    %44 = arith.addf %43, %42 : vector<18x128xf32>
    %45 = arith.mulf %34, %44 : vector<18x128xf32>
    %c0_19 = arith.constant 0 : index
    %c0_20 = arith.constant 0 : index
    %46 = vector.load %arg6[%c0_19, %c0_20] : memref<128x32xf32, #tpu.memory_space<vmem>>, vector<128x32xf32>
    %c0_21 = arith.constant 0 : index
    %c0_22 = arith.constant 0 : index
    %47 = vector.load %arg7[%c0_21, %c0_22] : memref<1x32xf32, #tpu.memory_space<vmem>>, vector<1x32xf32>
    %48 = arith.truncf %45 : vector<18x128xf32> to vector<18x128xbf16>
    %49 = arith.truncf %46 : vector<128x32xf32> to vector<128x32xbf16>
    %cst_23 = arith.constant dense<0.000000e+00> : vector<18x32xf32>
    %50 = tpu.matmul %48, %49, %cst_23 {dimension_numbers = #tpu.dot_dimension_numbers<[1], [0], [0], [1], [0, 0, 1, 1], [], []>} : vector<18x128xbf16>, vector<128x32xbf16>, vector<18x32xf32> -> vector<18x32xf32>
    %51 = vector.broadcast %47 : vector<1x32xf32> to vector<18x32xf32>
    %52 = arith.addf %50, %51 : vector<18x32xf32>
    %53 = arith.addf %1, %52 : vector<18x32xf32>
    %c0_24 = arith.constant 0 : index
    %c0_25 = arith.constant 0 : index
    %c0_26 = arith.constant 0 : index
    %54 = vector.load %arg8[%c0_24, %c0_25, %c0_26] : memref<1x18x32xf32, #tpu.memory_space<vmem>>, vector<1x18x32xf32>
    %55 = vector.shape_cast %54 : vector<1x18x32xf32> to vector<18x32xf32>
    %56 = vector.shape_cast %53 : vector<18x32xf32> to vector<1x18x32xf32>
    tpu.vector_store %arg8[%c0_24, %c0_25, %c0_26], %56 {strides = array<i32>} : memref<1x18x32xf32, #tpu.memory_space<vmem>>, vector<1x18x32xf32>,
    return
  }
  func.func @transform_0(%arg0: i32) -> (i32, i32, i32) {
    %c0_i32 = arith.constant 0 : i32
    %c0_i32_0 = arith.constant 0 : i32
    %c0_i32_1 = arith.constant 0 : i32
    return %arg0, %c0_i32, %c0_i32_0 : i32, i32, i32
  }
  func.func @transform_1(%arg0: i32) -> (i32, i32) {
    %c0_i32 = arith.constant 0 : i32
    %c0_i32_0 = arith.constant 0 : i32
    %c0_i32_1 = arith.constant 0 : i32
    return %c0_i32, %c0_i32_0 : i32, i32
  }
  func.func @transform_2(%arg0: i32) -> (i32, i32) {
    %c0_i32 = arith.constant 0 : i32
    %c0_i32_0 = arith.constant 0 : i32
    %c0_i32_1 = arith.constant 0 : i32
    return %c0_i32, %c0_i32_0 : i32, i32
  }
  func.func @transform_3(%arg0: i32) -> (i32, i32) {
    %c0_i32 = arith.constant 0 : i32
    %c0_i32_0 = arith.constant 0 : i32
    %c0_i32_1 = arith.constant 0 : i32
    return %c0_i32, %c0_i32_0 : i32, i32
  }
  func.func @transform_4(%arg0: i32) -> (i32, i32) {
    %c0_i32 = arith.constant 0 : i32
    %c0_i32_0 = arith.constant 0 : i32
    %c0_i32_1 = arith.constant 0 : i32
    return %c0_i32, %c0_i32_0 : i32, i32
  }
  func.func @transform_5(%arg0: i32) -> (i32, i32) {
    %c0_i32 = arith.constant 0 : i32
    %c0_i32_0 = arith.constant 0 : i32
    %c0_i32_1 = arith.constant 0 : i32
    return %c0_i32, %c0_i32_0 : i32, i32
  }
  func.func @transform_6(%arg0: i32) -> (i32, i32) {
    %c0_i32 = arith.constant 0 : i32
    %c0_i32_0 = arith.constant 0 : i32
    %c0_i32_1 = arith.constant 0 : i32
    return %c0_i32, %c0_i32_0 : i32, i32
  }
  func.func @transform_7(%arg0: i32) -> (i32, i32, i32) {
    %c0_i32 = arith.constant 0 : i32
    %c0_i32_0 = arith.constant 0 : i32
    %c0_i32_1 = arith.constant 0 : i32
    return %arg0, %c0_i32, %c0_i32_0 : i32, i32, i32
  }
}

module attributes {stable_mosaic.version = 11 : i64} {
  func.func @_self_attn_block_kernel(%arg0: i32, %arg1: memref<1x18x32xf32, #tpu.memory_space<vmem>>, %arg2: memref<1x32xf32, #tpu.memory_space<vmem>>, %arg3: memref<1x32xf32, #tpu.memory_space<vmem>>, %arg4: memref<32x96xf32, #tpu.memory_space<vmem>>, %arg5: memref<1x96xf32, #tpu.memory_space<vmem>>, %arg6: memref<32x32xf32, #tpu.memory_space<vmem>>, %arg7: memref<1x32xf32, #tpu.memory_space<vmem>>, %arg8: memref<1x18x32xf32, #tpu.memory_space<vmem>>) attributes {dimension_semantics = [#tpu.dimension_semantics<parallel>], iteration_bounds = array<i64: 2>, scalar_prefetch = 0 : i64, scratch_operands = 0 : i64, tpu.core_type = #tpu.core_type<tc>, window_params = [{transform_indices = @transform_0, window_bounds = array<i64: 1, 18, 32>}, {pipeline_mode = #tpu.pipeline_mode<synchronous>, transform_indices = @transform_1, window_bounds = array<i64: 1, 32>}, {pipeline_mode = #tpu.pipeline_mode<synchronous>, transform_indices = @transform_2, window_bounds = array<i64: 1, 32>}, {pipeline_mode = #tpu.pipeline_mode<synchronous>, transform_indices = @transform_3, window_bounds = array<i64: 32, 96>}, {pipeline_mode = #tpu.pipeline_mode<synchronous>, transform_indices = @transform_4, window_bounds = array<i64: 1, 96>}, {pipeline_mode = #tpu.pipeline_mode<synchronous>, transform_indices = @transform_5, window_bounds = array<i64: 32, 32>}, {pipeline_mode = #tpu.pipeline_mode<synchronous>, transform_indices = @transform_6, window_bounds = array<i64: 1, 32>}, {transform_indices = @transform_7, window_bounds = array<i64: 1, 18, 32>}]} {
    %c0 = arith.constant 0 : index
    %c0_0 = arith.constant 0 : index
    %c0_1 = arith.constant 0 : index
    %0 = vector.load %arg1[%c0, %c0_0, %c0_1] : memref<1x18x32xf32, #tpu.memory_space<vmem>>, vector<1x18x32xf32>
    %1 = vector.shape_cast %0 : vector<1x18x32xf32> to vector<18x32xf32>
    %c0_2 = arith.constant 0 : index
    %c0_3 = arith.constant 0 : index
    %2 = vector.load %arg2[%c0_2, %c0_3] : memref<1x32xf32, #tpu.memory_space<vmem>>, vector<1x32xf32>
    %c0_4 = arith.constant 0 : index
    %c0_5 = arith.constant 0 : index
    %3 = vector.load %arg3[%c0_4, %c0_5] : memref<1x32xf32, #tpu.memory_space<vmem>>, vector<1x32xf32>
    %cst = arith.constant dense<0.000000e+00> : vector<18xf32>
    %4 = vector.multi_reduction <add>, %1, %cst [1] : vector<18x32xf32> to vector<18xf32>
    %5 = vector.shape_cast %4 : vector<18xf32> to vector<18x1xf32>
    %cst_6 = arith.constant 3.200000e+01 : f32
    %6 = vector.broadcast %cst_6 : f32 to vector<18x1xf32>
    %7 = arith.divf %5, %6 : vector<18x1xf32>
    %8 = vector.broadcast %7 : vector<18x1xf32> to vector<18x32xf32>
    %9 = arith.subf %1, %8 : vector<18x32xf32>
    %10 = arith.mulf %9, %9 : vector<18x32xf32>
    %cst_7 = arith.constant dense<0.000000e+00> : vector<18xf32>
    %11 = vector.multi_reduction <add>, %10, %cst_7 [1] : vector<18x32xf32> to vector<18xf32>
    %12 = vector.shape_cast %11 : vector<18xf32> to vector<18x1xf32>
    %cst_8 = arith.constant 3.200000e+01 : f32
    %13 = vector.broadcast %cst_8 : f32 to vector<18x1xf32>
    %14 = arith.divf %12, %13 : vector<18x1xf32>
    %15 = vector.broadcast %7 : vector<18x1xf32> to vector<18x32xf32>
    %16 = arith.subf %1, %15 : vector<18x32xf32>
    %cst_9 = arith.constant 9.99999974E-6 : f32
    %17 = vector.broadcast %cst_9 : f32 to vector<18x1xf32>
    %18 = arith.addf %14, %17 : vector<18x1xf32>
    %19 = math.rsqrt %18 : vector<18x1xf32>
    %20 = vector.broadcast %19 : vector<18x1xf32> to vector<18x32xf32>
    %21 = arith.mulf %16, %20 : vector<18x32xf32>
    %22 = vector.broadcast %2 : vector<1x32xf32> to vector<18x32xf32>
    %23 = arith.mulf %21, %22 : vector<18x32xf32>
    %24 = vector.broadcast %3 : vector<1x32xf32> to vector<18x32xf32>
    %25 = arith.addf %23, %24 : vector<18x32xf32>
    %c0_10 = arith.constant 0 : index
    %c0_11 = arith.constant 0 : index
    %26 = vector.load %arg4[%c0_10, %c0_11] : memref<32x96xf32, #tpu.memory_space<vmem>>, vector<32x96xf32>
    %c0_12 = arith.constant 0 : index
    %c0_13 = arith.constant 0 : index
    %27 = vector.load %arg5[%c0_12, %c0_13] : memref<1x96xf32, #tpu.memory_space<vmem>>, vector<1x96xf32>
    %28 = arith.truncf %25 : vector<18x32xf32> to vector<18x32xbf16>
    %29 = arith.truncf %26 : vector<32x96xf32> to vector<32x96xbf16>
    %cst_14 = arith.constant dense<0.000000e+00> : vector<18x96xf32>
    %30 = tpu.matmul %28, %29, %cst_14 {dimension_numbers = #tpu.dot_dimension_numbers<[1], [0], [0], [1], [0, 0, 1, 1], [], []>} : vector<18x32xbf16>, vector<32x96xbf16>, vector<18x96xf32> -> vector<18x96xf32>
    %31 = vector.broadcast %27 : vector<1x96xf32> to vector<18x96xf32>
    %32 = arith.addf %30, %31 : vector<18x96xf32>
    %33 = vector.extract_strided_slice %32 {offsets = [0, 0], sizes = [18, 32], strides = [1, 1]} : vector<18x96xf32> to vector<18x32xf32>
    %34 = vector.extract_strided_slice %32 {offsets = [0, 32], sizes = [18, 32], strides = [1, 1]} : vector<18x96xf32> to vector<18x32xf32>
    %35 = vector.extract_strided_slice %32 {offsets = [0, 64], sizes = [18, 32], strides = [1, 1]} : vector<18x96xf32> to vector<18x32xf32>
    %36 = tpu.iota {dimensions = array<i32: 0>} : vector<18x18xi32>
    %37 = tpu.iota {dimensions = array<i32: 1>} : vector<18x18xi32>
    %38 = arith.cmpi sle, %37, %36 : vector<18x18xi32>
    %cst_15 = arith.constant 0.000000e+00 : f32
    %39 = vector.broadcast %cst_15 : f32 to vector<18x32xf32>
    %40 = vector.extract_strided_slice %33 {offsets = [0, 0], sizes = [18, 8], strides = [1, 1]} : vector<18x32xf32> to vector<18x8xf32>
    %41 = arith.truncf %40 : vector<18x8xf32> to vector<18x8xbf16>
    %42 = vector.extract_strided_slice %34 {offsets = [0, 0], sizes = [18, 8], strides = [1, 1]} : vector<18x32xf32> to vector<18x8xf32>
    %43 = arith.truncf %42 : vector<18x8xf32> to vector<18x8xbf16>
    %44 = vector.extract_strided_slice %35 {offsets = [0, 0], sizes = [18, 8], strides = [1, 1]} : vector<18x32xf32> to vector<18x8xf32>
    %45 = arith.truncf %44 : vector<18x8xf32> to vector<18x8xbf16>
    %cst_16 = arith.constant dense<0.000000e+00> : vector<18x18xf32>
    %46 = tpu.matmul %41, %43, %cst_16 {dimension_numbers = #tpu.dot_dimension_numbers<[1], [1], [0], [0], [0, 0, 1, 0], [], []>} : vector<18x8xbf16>, vector<18x8xbf16>, vector<18x18xf32> -> vector<18x18xf32>
    %cst_17 = arith.constant 0.353553385 : f32
    %47 = vector.broadcast %cst_17 : f32 to vector<18x18xf32>
    %48 = arith.mulf %46, %47 : vector<18x18xf32>
    %cst_18 = arith.constant -1.000000e+30 : f32
    %49 = vector.broadcast %cst_18 : f32 to vector<18x18xf32>
    %50 = arith.select %38, %48, %49 : vector<18x18xi1>, vector<18x18xf32>
    %cst_19 = arith.constant dense<0xFF800000> : vector<18xf32>
    %51 = vector.multi_reduction <maximumf>, %50, %cst_19 [1] : vector<18x18xf32> to vector<18xf32>
    %52 = vector.shape_cast %51 : vector<18xf32> to vector<18x1xf32>
    %53 = vector.broadcast %52 : vector<18x1xf32> to vector<18x18xf32>
    %54 = arith.subf %50, %53 : vector<18x18xf32>
    %55 = math.exp %54 : vector<18x18xf32>
    %cst_20 = arith.constant dense<0.000000e+00> : vector<18xf32>
    %56 = vector.multi_reduction <add>, %55, %cst_20 [1] : vector<18x18xf32> to vector<18xf32>
    %57 = vector.shape_cast %56 : vector<18xf32> to vector<18x1xf32>
    %58 = tpu.reciprocal %57 {approx = true} : vector<18x1xf32> -> vector<18x1xf32>
    %59 = vector.broadcast %58 : vector<18x1xf32> to vector<18x18xf32>
    %60 = arith.mulf %55, %59 : vector<18x18xf32>
    %61 = arith.truncf %60 : vector<18x18xf32> to vector<18x18xbf16>
    %cst_21 = arith.constant dense<0.000000e+00> : vector<18x8xf32>
    %62 = tpu.matmul %61, %45, %cst_21 {dimension_numbers = #tpu.dot_dimension_numbers<[1], [0], [0], [1], [0, 0, 1, 1], [], []>} : vector<18x18xbf16>, vector<18x8xbf16>, vector<18x8xf32> -> vector<18x8xf32>
    %c0_22 = arith.constant 0 : index
    %c0_23 = arith.constant 0 : index
    %63 = vector.load %arg6[%c0_22, %c0_23] : memref<32x32xf32, #tpu.memory_space<vmem>>, vector<8x32xf32>
    %64 = arith.truncf %62 : vector<18x8xf32> to vector<18x8xbf16>
    %65 = arith.truncf %63 : vector<8x32xf32> to vector<8x32xbf16>
    %cst_24 = arith.constant dense<0.000000e+00> : vector<18x32xf32>
    %66 = tpu.matmul %64, %65, %cst_24 {dimension_numbers = #tpu.dot_dimension_numbers<[1], [0], [0], [1], [0, 0, 1, 1], [], []>} : vector<18x8xbf16>, vector<8x32xbf16>, vector<18x32xf32> -> vector<18x32xf32>
    %67 = arith.addf %39, %66 : vector<18x32xf32>
    %68 = vector.extract_strided_slice %33 {offsets = [0, 8], sizes = [18, 8], strides = [1, 1]} : vector<18x32xf32> to vector<18x8xf32>
    %69 = arith.truncf %68 : vector<18x8xf32> to vector<18x8xbf16>
    %70 = vector.extract_strided_slice %34 {offsets = [0, 8], sizes = [18, 8], strides = [1, 1]} : vector<18x32xf32> to vector<18x8xf32>
    %71 = arith.truncf %70 : vector<18x8xf32> to vector<18x8xbf16>
    %72 = vector.extract_strided_slice %35 {offsets = [0, 8], sizes = [18, 8], strides = [1, 1]} : vector<18x32xf32> to vector<18x8xf32>
    %73 = arith.truncf %72 : vector<18x8xf32> to vector<18x8xbf16>
    %cst_25 = arith.constant dense<0.000000e+00> : vector<18x18xf32>
    %74 = tpu.matmul %69, %71, %cst_25 {dimension_numbers = #tpu.dot_dimension_numbers<[1], [1], [0], [0], [0, 0, 1, 0], [], []>} : vector<18x8xbf16>, vector<18x8xbf16>, vector<18x18xf32> -> vector<18x18xf32>
    %cst_26 = arith.constant 0.353553385 : f32
    %75 = vector.broadcast %cst_26 : f32 to vector<18x18xf32>
    %76 = arith.mulf %74, %75 : vector<18x18xf32>
    %cst_27 = arith.constant -1.000000e+30 : f32
    %77 = vector.broadcast %cst_27 : f32 to vector<18x18xf32>
    %78 = arith.select %38, %76, %77 : vector<18x18xi1>, vector<18x18xf32>
    %cst_28 = arith.constant dense<0xFF800000> : vector<18xf32>
    %79 = vector.multi_reduction <maximumf>, %78, %cst_28 [1] : vector<18x18xf32> to vector<18xf32>
    %80 = vector.shape_cast %79 : vector<18xf32> to vector<18x1xf32>
    %81 = vector.broadcast %80 : vector<18x1xf32> to vector<18x18xf32>
    %82 = arith.subf %78, %81 : vector<18x18xf32>
    %83 = math.exp %82 : vector<18x18xf32>
    %cst_29 = arith.constant dense<0.000000e+00> : vector<18xf32>
    %84 = vector.multi_reduction <add>, %83, %cst_29 [1] : vector<18x18xf32> to vector<18xf32>
    %85 = vector.shape_cast %84 : vector<18xf32> to vector<18x1xf32>
    %86 = tpu.reciprocal %85 {approx = true} : vector<18x1xf32> -> vector<18x1xf32>
    %87 = vector.broadcast %86 : vector<18x1xf32> to vector<18x18xf32>
    %88 = arith.mulf %83, %87 : vector<18x18xf32>
    %89 = arith.truncf %88 : vector<18x18xf32> to vector<18x18xbf16>
    %cst_30 = arith.constant dense<0.000000e+00> : vector<18x8xf32>
    %90 = tpu.matmul %89, %73, %cst_30 {dimension_numbers = #tpu.dot_dimension_numbers<[1], [0], [0], [1], [0, 0, 1, 1], [], []>} : vector<18x18xbf16>, vector<18x8xbf16>, vector<18x8xf32> -> vector<18x8xf32>
    %c8 = arith.constant 8 : index
    %c0_31 = arith.constant 0 : index
    %91 = vector.load %arg6[%c8, %c0_31] : memref<32x32xf32, #tpu.memory_space<vmem>>, vector<8x32xf32>
    %92 = arith.truncf %90 : vector<18x8xf32> to vector<18x8xbf16>
    %93 = arith.truncf %91 : vector<8x32xf32> to vector<8x32xbf16>
    %cst_32 = arith.constant dense<0.000000e+00> : vector<18x32xf32>
    %94 = tpu.matmul %92, %93, %cst_32 {dimension_numbers = #tpu.dot_dimension_numbers<[1], [0], [0], [1], [0, 0, 1, 1], [], []>} : vector<18x8xbf16>, vector<8x32xbf16>, vector<18x32xf32> -> vector<18x32xf32>
    %95 = arith.addf %67, %94 : vector<18x32xf32>
    %96 = vector.extract_strided_slice %33 {offsets = [0, 16], sizes = [18, 8], strides = [1, 1]} : vector<18x32xf32> to vector<18x8xf32>
    %97 = arith.truncf %96 : vector<18x8xf32> to vector<18x8xbf16>
    %98 = vector.extract_strided_slice %34 {offsets = [0, 16], sizes = [18, 8], strides = [1, 1]} : vector<18x32xf32> to vector<18x8xf32>
    %99 = arith.truncf %98 : vector<18x8xf32> to vector<18x8xbf16>
    %100 = vector.extract_strided_slice %35 {offsets = [0, 16], sizes = [18, 8], strides = [1, 1]} : vector<18x32xf32> to vector<18x8xf32>
    %101 = arith.truncf %100 : vector<18x8xf32> to vector<18x8xbf16>
    %cst_33 = arith.constant dense<0.000000e+00> : vector<18x18xf32>
    %102 = tpu.matmul %97, %99, %cst_33 {dimension_numbers = #tpu.dot_dimension_numbers<[1], [1], [0], [0], [0, 0, 1, 0], [], []>} : vector<18x8xbf16>, vector<18x8xbf16>, vector<18x18xf32> -> vector<18x18xf32>
    %cst_34 = arith.constant 0.353553385 : f32
    %103 = vector.broadcast %cst_34 : f32 to vector<18x18xf32>
    %104 = arith.mulf %102, %103 : vector<18x18xf32>
    %cst_35 = arith.constant -1.000000e+30 : f32
    %105 = vector.broadcast %cst_35 : f32 to vector<18x18xf32>
    %106 = arith.select %38, %104, %105 : vector<18x18xi1>, vector<18x18xf32>
    %cst_36 = arith.constant dense<0xFF800000> : vector<18xf32>
    %107 = vector.multi_reduction <maximumf>, %106, %cst_36 [1] : vector<18x18xf32> to vector<18xf32>
    %108 = vector.shape_cast %107 : vector<18xf32> to vector<18x1xf32>
    %109 = vector.broadcast %108 : vector<18x1xf32> to vector<18x18xf32>
    %110 = arith.subf %106, %109 : vector<18x18xf32>
    %111 = math.exp %110 : vector<18x18xf32>
    %cst_37 = arith.constant dense<0.000000e+00> : vector<18xf32>
    %112 = vector.multi_reduction <add>, %111, %cst_37 [1] : vector<18x18xf32> to vector<18xf32>
    %113 = vector.shape_cast %112 : vector<18xf32> to vector<18x1xf32>
    %114 = tpu.reciprocal %113 {approx = true} : vector<18x1xf32> -> vector<18x1xf32>
    %115 = vector.broadcast %114 : vector<18x1xf32> to vector<18x18xf32>
    %116 = arith.mulf %111, %115 : vector<18x18xf32>
    %117 = arith.truncf %116 : vector<18x18xf32> to vector<18x18xbf16>
    %cst_38 = arith.constant dense<0.000000e+00> : vector<18x8xf32>
    %118 = tpu.matmul %117, %101, %cst_38 {dimension_numbers = #tpu.dot_dimension_numbers<[1], [0], [0], [1], [0, 0, 1, 1], [], []>} : vector<18x18xbf16>, vector<18x8xbf16>, vector<18x8xf32> -> vector<18x8xf32>
    %c16 = arith.constant 16 : index
    %c0_39 = arith.constant 0 : index
    %119 = vector.load %arg6[%c16, %c0_39] : memref<32x32xf32, #tpu.memory_space<vmem>>, vector<8x32xf32>
    %120 = arith.truncf %118 : vector<18x8xf32> to vector<18x8xbf16>
    %121 = arith.truncf %119 : vector<8x32xf32> to vector<8x32xbf16>
    %cst_40 = arith.constant dense<0.000000e+00> : vector<18x32xf32>
    %122 = tpu.matmul %120, %121, %cst_40 {dimension_numbers = #tpu.dot_dimension_numbers<[1], [0], [0], [1], [0, 0, 1, 1], [], []>} : vector<18x8xbf16>, vector<8x32xbf16>, vector<18x32xf32> -> vector<18x32xf32>
    %123 = arith.addf %95, %122 : vector<18x32xf32>
    %124 = vector.extract_strided_slice %33 {offsets = [0, 24], sizes = [18, 8], strides = [1, 1]} : vector<18x32xf32> to vector<18x8xf32>
    %125 = arith.truncf %124 : vector<18x8xf32> to vector<18x8xbf16>
    %126 = vector.extract_strided_slice %34 {offsets = [0, 24], sizes = [18, 8], strides = [1, 1]} : vector<18x32xf32> to vector<18x8xf32>
    %127 = arith.truncf %126 : vector<18x8xf32> to vector<18x8xbf16>
    %128 = vector.extract_strided_slice %35 {offsets = [0, 24], sizes = [18, 8], strides = [1, 1]} : vector<18x32xf32> to vector<18x8xf32>
    %129 = arith.truncf %128 : vector<18x8xf32> to vector<18x8xbf16>
    %cst_41 = arith.constant dense<0.000000e+00> : vector<18x18xf32>
    %130 = tpu.matmul %125, %127, %cst_41 {dimension_numbers = #tpu.dot_dimension_numbers<[1], [1], [0], [0], [0, 0, 1, 0], [], []>} : vector<18x8xbf16>, vector<18x8xbf16>, vector<18x18xf32> -> vector<18x18xf32>
    %cst_42 = arith.constant 0.353553385 : f32
    %131 = vector.broadcast %cst_42 : f32 to vector<18x18xf32>
    %132 = arith.mulf %130, %131 : vector<18x18xf32>
    %cst_43 = arith.constant -1.000000e+30 : f32
    %133 = vector.broadcast %cst_43 : f32 to vector<18x18xf32>
    %134 = arith.select %38, %132, %133 : vector<18x18xi1>, vector<18x18xf32>
    %cst_44 = arith.constant dense<0xFF800000> : vector<18xf32>
    %135 = vector.multi_reduction <maximumf>, %134, %cst_44 [1] : vector<18x18xf32> to vector<18xf32>
    %136 = vector.shape_cast %135 : vector<18xf32> to vector<18x1xf32>
    %137 = vector.broadcast %136 : vector<18x1xf32> to vector<18x18xf32>
    %138 = arith.subf %134, %137 : vector<18x18xf32>
    %139 = math.exp %138 : vector<18x18xf32>
    %cst_45 = arith.constant dense<0.000000e+00> : vector<18xf32>
    %140 = vector.multi_reduction <add>, %139, %cst_45 [1] : vector<18x18xf32> to vector<18xf32>
    %141 = vector.shape_cast %140 : vector<18xf32> to vector<18x1xf32>
    %142 = tpu.reciprocal %141 {approx = true} : vector<18x1xf32> -> vector<18x1xf32>
    %143 = vector.broadcast %142 : vector<18x1xf32> to vector<18x18xf32>
    %144 = arith.mulf %139, %143 : vector<18x18xf32>
    %145 = arith.truncf %144 : vector<18x18xf32> to vector<18x18xbf16>
    %cst_46 = arith.constant dense<0.000000e+00> : vector<18x8xf32>
    %146 = tpu.matmul %145, %129, %cst_46 {dimension_numbers = #tpu.dot_dimension_numbers<[1], [0], [0], [1], [0, 0, 1, 1], [], []>} : vector<18x18xbf16>, vector<18x8xbf16>, vector<18x8xf32> -> vector<18x8xf32>
    %c24 = arith.constant 24 : index
    %c0_47 = arith.constant 0 : index
    %147 = vector.load %arg6[%c24, %c0_47] : memref<32x32xf32, #tpu.memory_space<vmem>>, vector<8x32xf32>
    %148 = arith.truncf %146 : vector<18x8xf32> to vector<18x8xbf16>
    %149 = arith.truncf %147 : vector<8x32xf32> to vector<8x32xbf16>
    %cst_48 = arith.constant dense<0.000000e+00> : vector<18x32xf32>
    %150 = tpu.matmul %148, %149, %cst_48 {dimension_numbers = #tpu.dot_dimension_numbers<[1], [0], [0], [1], [0, 0, 1, 1], [], []>} : vector<18x8xbf16>, vector<8x32xbf16>, vector<18x32xf32> -> vector<18x32xf32>
    %151 = arith.addf %123, %150 : vector<18x32xf32>
    %152 = arith.addf %1, %151 : vector<18x32xf32>
    %c0_49 = arith.constant 0 : index
    %c0_50 = arith.constant 0 : index
    %153 = vector.load %arg7[%c0_49, %c0_50] : memref<1x32xf32, #tpu.memory_space<vmem>>, vector<1x32xf32>
    %154 = vector.broadcast %153 : vector<1x32xf32> to vector<18x32xf32>
    %155 = arith.addf %152, %154 : vector<18x32xf32>
    %c0_51 = arith.constant 0 : index
    %c0_52 = arith.constant 0 : index
    %c0_53 = arith.constant 0 : index
    %156 = vector.load %arg8[%c0_51, %c0_52, %c0_53] : memref<1x18x32xf32, #tpu.memory_space<vmem>>, vector<1x18x32xf32>
    %157 = vector.shape_cast %156 : vector<1x18x32xf32> to vector<18x32xf32>
    %158 = vector.shape_cast %155 : vector<18x32xf32> to vector<1x18x32xf32>
    tpu.vector_store %arg8[%c0_51, %c0_52, %c0_53], %158 {strides = array<i32>} : memref<1x18x32xf32, #tpu.memory_space<vmem>>, vector<1x18x32xf32>,
    return
  }
  func.func @transform_0(%arg0: i32) -> (i32, i32, i32) {
    %c0_i32 = arith.constant 0 : i32
    %c0_i32_0 = arith.constant 0 : i32
    %c0_i32_1 = arith.constant 0 : i32
    return %arg0, %c0_i32, %c0_i32_0 : i32, i32, i32
  }
  func.func @transform_1(%arg0: i32) -> (i32, i32) {
    %c0_i32 = arith.constant 0 : i32
    %c0_i32_0 = arith.constant 0 : i32
    %c0_i32_1 = arith.constant 0 : i32
    return %c0_i32, %c0_i32_0 : i32, i32
  }
  func.func @transform_2(%arg0: i32) -> (i32, i32) {
    %c0_i32 = arith.constant 0 : i32
    %c0_i32_0 = arith.constant 0 : i32
    %c0_i32_1 = arith.constant 0 : i32
    return %c0_i32, %c0_i32_0 : i32, i32
  }
  func.func @transform_3(%arg0: i32) -> (i32, i32) {
    %c0_i32 = arith.constant 0 : i32
    %c0_i32_0 = arith.constant 0 : i32
    %c0_i32_1 = arith.constant 0 : i32
    return %c0_i32, %c0_i32_0 : i32, i32
  }
  func.func @transform_4(%arg0: i32) -> (i32, i32) {
    %c0_i32 = arith.constant 0 : i32
    %c0_i32_0 = arith.constant 0 : i32
    %c0_i32_1 = arith.constant 0 : i32
    return %c0_i32, %c0_i32_0 : i32, i32
  }
  func.func @transform_5(%arg0: i32) -> (i32, i32) {
    %c0_i32 = arith.constant 0 : i32
    %c0_i32_0 = arith.constant 0 : i32
    %c0_i32_1 = arith.constant 0 : i32
    return %c0_i32, %c0_i32_0 : i32, i32
  }
  func.func @transform_6(%arg0: i32) -> (i32, i32) {
    %c0_i32 = arith.constant 0 : i32
    %c0_i32_0 = arith.constant 0 : i32
    %c0_i32_1 = arith.constant 0 : i32
    return %c0_i32, %c0_i32_0 : i32, i32
  }
  func.func @transform_7(%arg0: i32) -> (i32, i32, i32) {
    %c0_i32 = arith.constant 0 : i32
    %c0_i32_0 = arith.constant 0 : i32
    %c0_i32_1 = arith.constant 0 : i32
    return %arg0, %c0_i32, %c0_i32_0 : i32, i32, i32
  }
}

module attributes {stable_mosaic.version = 11 : i64} {
  func.func @_cross_attn_block_kernel(%arg0: i32, %arg1: memref<1x18x32xf32, #tpu.memory_space<vmem>>, %arg2: memref<1x16x32xf32, #tpu.memory_space<vmem>>, %arg3: memref<1x32xf32, #tpu.memory_space<vmem>>, %arg4: memref<1x32xf32, #tpu.memory_space<vmem>>, %arg5: memref<1x32xf32, #tpu.memory_space<vmem>>, %arg6: memref<1x32xf32, #tpu.memory_space<vmem>>, %arg7: memref<32x64xf32, #tpu.memory_space<vmem>>, %arg8: memref<1x64xf32, #tpu.memory_space<vmem>>, %arg9: memref<32x32xf32, #tpu.memory_space<vmem>>, %arg10: memref<1x32xf32, #tpu.memory_space<vmem>>, %arg11: memref<32x32xf32, #tpu.memory_space<vmem>>, %arg12: memref<1x32xf32, #tpu.memory_space<vmem>>, %arg13: memref<1x18x32xf32, #tpu.memory_space<vmem>>) attributes {dimension_semantics = [#tpu.dimension_semantics<parallel>], iteration_bounds = array<i64: 2>, scalar_prefetch = 0 : i64, scratch_operands = 0 : i64, tpu.core_type = #tpu.core_type<tc>, window_params = [{transform_indices = @transform_0, window_bounds = array<i64: 1, 18, 32>}, {transform_indices = @transform_1, window_bounds = array<i64: 1, 16, 32>}, {pipeline_mode = #tpu.pipeline_mode<synchronous>, transform_indices = @transform_2, window_bounds = array<i64: 1, 32>}, {pipeline_mode = #tpu.pipeline_mode<synchronous>, transform_indices = @transform_3, window_bounds = array<i64: 1, 32>}, {pipeline_mode = #tpu.pipeline_mode<synchronous>, transform_indices = @transform_4, window_bounds = array<i64: 1, 32>}, {pipeline_mode = #tpu.pipeline_mode<synchronous>, transform_indices = @transform_5, window_bounds = array<i64: 1, 32>}, {pipeline_mode = #tpu.pipeline_mode<synchronous>, transform_indices = @transform_6, window_bounds = array<i64: 32, 64>}, {pipeline_mode = #tpu.pipeline_mode<synchronous>, transform_indices = @transform_7, window_bounds = array<i64: 1, 64>}, {pipeline_mode = #tpu.pipeline_mode<synchronous>, transform_indices = @transform_8, window_bounds = array<i64: 32, 32>}, {pipeline_mode = #tpu.pipeline_mode<synchronous>, transform_indices = @transform_9, window_bounds = array<i64: 1, 32>}, {pipeline_mode = #tpu.pipeline_mode<synchronous>, transform_indices = @transform_10, window_bounds = array<i64: 32, 32>}, {pipeline_mode = #tpu.pipeline_mode<synchronous>, transform_indices = @transform_11, window_bounds = array<i64: 1, 32>}, {transform_indices = @transform_12, window_bounds = array<i64: 1, 18, 32>}]} {
    %c0 = arith.constant 0 : index
    %c0_0 = arith.constant 0 : index
    %c0_1 = arith.constant 0 : index
    %0 = vector.load %arg1[%c0, %c0_0, %c0_1] : memref<1x18x32xf32, #tpu.memory_space<vmem>>, vector<1x18x32xf32>
    %1 = vector.shape_cast %0 : vector<1x18x32xf32> to vector<18x32xf32>
    %c0_2 = arith.constant 0 : index
    %c0_3 = arith.constant 0 : index
    %c0_4 = arith.constant 0 : index
    %2 = vector.load %arg2[%c0_2, %c0_3, %c0_4] : memref<1x16x32xf32, #tpu.memory_space<vmem>>, vector<1x16x32xf32>
    %3 = vector.shape_cast %2 : vector<1x16x32xf32> to vector<16x32xf32>
    %c0_5 = arith.constant 0 : index
    %c0_6 = arith.constant 0 : index
    %4 = vector.load %arg3[%c0_5, %c0_6] : memref<1x32xf32, #tpu.memory_space<vmem>>, vector<1x32xf32>
    %c0_7 = arith.constant 0 : index
    %c0_8 = arith.constant 0 : index
    %5 = vector.load %arg4[%c0_7, %c0_8] : memref<1x32xf32, #tpu.memory_space<vmem>>, vector<1x32xf32>
    %cst = arith.constant dense<0.000000e+00> : vector<18xf32>
    %6 = vector.multi_reduction <add>, %1, %cst [1] : vector<18x32xf32> to vector<18xf32>
    %7 = vector.shape_cast %6 : vector<18xf32> to vector<18x1xf32>
    %cst_9 = arith.constant 3.200000e+01 : f32
    %8 = vector.broadcast %cst_9 : f32 to vector<18x1xf32>
    %9 = arith.divf %7, %8 : vector<18x1xf32>
    %10 = vector.broadcast %9 : vector<18x1xf32> to vector<18x32xf32>
    %11 = arith.subf %1, %10 : vector<18x32xf32>
    %12 = arith.mulf %11, %11 : vector<18x32xf32>
    %cst_10 = arith.constant dense<0.000000e+00> : vector<18xf32>
    %13 = vector.multi_reduction <add>, %12, %cst_10 [1] : vector<18x32xf32> to vector<18xf32>
    %14 = vector.shape_cast %13 : vector<18xf32> to vector<18x1xf32>
    %cst_11 = arith.constant 3.200000e+01 : f32
    %15 = vector.broadcast %cst_11 : f32 to vector<18x1xf32>
    %16 = arith.divf %14, %15 : vector<18x1xf32>
    %17 = vector.broadcast %9 : vector<18x1xf32> to vector<18x32xf32>
    %18 = arith.subf %1, %17 : vector<18x32xf32>
    %cst_12 = arith.constant 9.99999974E-6 : f32
    %19 = vector.broadcast %cst_12 : f32 to vector<18x1xf32>
    %20 = arith.addf %16, %19 : vector<18x1xf32>
    %21 = math.rsqrt %20 : vector<18x1xf32>
    %22 = vector.broadcast %21 : vector<18x1xf32> to vector<18x32xf32>
    %23 = arith.mulf %18, %22 : vector<18x32xf32>
    %24 = vector.broadcast %4 : vector<1x32xf32> to vector<18x32xf32>
    %25 = arith.mulf %23, %24 : vector<18x32xf32>
    %26 = vector.broadcast %5 : vector<1x32xf32> to vector<18x32xf32>
    %27 = arith.addf %25, %26 : vector<18x32xf32>
    %c0_13 = arith.constant 0 : index
    %c0_14 = arith.constant 0 : index
    %28 = vector.load %arg5[%c0_13, %c0_14] : memref<1x32xf32, #tpu.memory_space<vmem>>, vector<1x32xf32>
    %c0_15 = arith.constant 0 : index
    %c0_16 = arith.constant 0 : index
    %29 = vector.load %arg6[%c0_15, %c0_16] : memref<1x32xf32, #tpu.memory_space<vmem>>, vector<1x32xf32>
    %cst_17 = arith.constant dense<0.000000e+00> : vector<16xf32>
    %30 = vector.multi_reduction <add>, %3, %cst_17 [1] : vector<16x32xf32> to vector<16xf32>
    %31 = vector.shape_cast %30 : vector<16xf32> to vector<16x1xf32>
    %cst_18 = arith.constant 3.200000e+01 : f32
    %32 = vector.broadcast %cst_18 : f32 to vector<16x1xf32>
    %33 = arith.divf %31, %32 : vector<16x1xf32>
    %34 = vector.broadcast %33 : vector<16x1xf32> to vector<16x32xf32>
    %35 = arith.subf %3, %34 : vector<16x32xf32>
    %36 = arith.mulf %35, %35 : vector<16x32xf32>
    %cst_19 = arith.constant dense<0.000000e+00> : vector<16xf32>
    %37 = vector.multi_reduction <add>, %36, %cst_19 [1] : vector<16x32xf32> to vector<16xf32>
    %38 = vector.shape_cast %37 : vector<16xf32> to vector<16x1xf32>
    %cst_20 = arith.constant 3.200000e+01 : f32
    %39 = vector.broadcast %cst_20 : f32 to vector<16x1xf32>
    %40 = arith.divf %38, %39 : vector<16x1xf32>
    %41 = vector.broadcast %33 : vector<16x1xf32> to vector<16x32xf32>
    %42 = arith.subf %3, %41 : vector<16x32xf32>
    %cst_21 = arith.constant 9.99999974E-6 : f32
    %43 = vector.broadcast %cst_21 : f32 to vector<16x1xf32>
    %44 = arith.addf %40, %43 : vector<16x1xf32>
    %45 = math.rsqrt %44 : vector<16x1xf32>
    %46 = vector.broadcast %45 : vector<16x1xf32> to vector<16x32xf32>
    %47 = arith.mulf %42, %46 : vector<16x32xf32>
    %48 = vector.broadcast %28 : vector<1x32xf32> to vector<16x32xf32>
    %49 = arith.mulf %47, %48 : vector<16x32xf32>
    %50 = vector.broadcast %29 : vector<1x32xf32> to vector<16x32xf32>
    %51 = arith.addf %49, %50 : vector<16x32xf32>
    %c0_22 = arith.constant 0 : index
    %c0_23 = arith.constant 0 : index
    %52 = vector.load %arg7[%c0_22, %c0_23] : memref<32x64xf32, #tpu.memory_space<vmem>>, vector<32x64xf32>
    %c0_24 = arith.constant 0 : index
    %c0_25 = arith.constant 0 : index
    %53 = vector.load %arg8[%c0_24, %c0_25] : memref<1x64xf32, #tpu.memory_space<vmem>>, vector<1x64xf32>
    %54 = arith.truncf %51 : vector<16x32xf32> to vector<16x32xbf16>
    %55 = arith.truncf %52 : vector<32x64xf32> to vector<32x64xbf16>
    %cst_26 = arith.constant dense<0.000000e+00> : vector<16x64xf32>
    %56 = tpu.matmul %54, %55, %cst_26 {dimension_numbers = #tpu.dot_dimension_numbers<[1], [0], [0], [1], [0, 0, 1, 1], [], []>} : vector<16x32xbf16>, vector<32x64xbf16>, vector<16x64xf32> -> vector<16x64xf32>
    %57 = vector.broadcast %53 : vector<1x64xf32> to vector<16x64xf32>
    %58 = arith.addf %56, %57 : vector<16x64xf32>
    %c0_27 = arith.constant 0 : index
    %c0_28 = arith.constant 0 : index
    %59 = vector.load %arg9[%c0_27, %c0_28] : memref<32x32xf32, #tpu.memory_space<vmem>>, vector<32x32xf32>
    %c0_29 = arith.constant 0 : index
    %c0_30 = arith.constant 0 : index
    %60 = vector.load %arg10[%c0_29, %c0_30] : memref<1x32xf32, #tpu.memory_space<vmem>>, vector<1x32xf32>
    %61 = arith.truncf %27 : vector<18x32xf32> to vector<18x32xbf16>
    %62 = arith.truncf %59 : vector<32x32xf32> to vector<32x32xbf16>
    %cst_31 = arith.constant dense<0.000000e+00> : vector<18x32xf32>
    %63 = tpu.matmul %61, %62, %cst_31 {dimension_numbers = #tpu.dot_dimension_numbers<[1], [0], [0], [1], [0, 0, 1, 1], [], []>} : vector<18x32xbf16>, vector<32x32xbf16>, vector<18x32xf32> -> vector<18x32xf32>
    %64 = vector.broadcast %60 : vector<1x32xf32> to vector<18x32xf32>
    %65 = arith.addf %63, %64 : vector<18x32xf32>
    %66 = vector.extract_strided_slice %58 {offsets = [0, 0], sizes = [16, 32], strides = [1, 1]} : vector<16x64xf32> to vector<16x32xf32>
    %67 = vector.extract_strided_slice %58 {offsets = [0, 32], sizes = [16, 32], strides = [1, 1]} : vector<16x64xf32> to vector<16x32xf32>
    %cst_32 = arith.constant 0.000000e+00 : f32
    %68 = vector.broadcast %cst_32 : f32 to vector<18x32xf32>
    %69 = vector.extract_strided_slice %65 {offsets = [0, 0], sizes = [18, 8], strides = [1, 1]} : vector<18x32xf32> to vector<18x8xf32>
    %70 = arith.truncf %69 : vector<18x8xf32> to vector<18x8xbf16>
    %71 = vector.extract_strided_slice %66 {offsets = [0, 0], sizes = [16, 8], strides = [1, 1]} : vector<16x32xf32> to vector<16x8xf32>
    %72 = arith.truncf %71 : vector<16x8xf32> to vector<16x8xbf16>
    %73 = vector.extract_strided_slice %67 {offsets = [0, 0], sizes = [16, 8], strides = [1, 1]} : vector<16x32xf32> to vector<16x8xf32>
    %74 = arith.truncf %73 : vector<16x8xf32> to vector<16x8xbf16>
    %cst_33 = arith.constant dense<0.000000e+00> : vector<18x16xf32>
    %75 = tpu.matmul %70, %72, %cst_33 {dimension_numbers = #tpu.dot_dimension_numbers<[1], [1], [0], [0], [0, 0, 1, 0], [], []>} : vector<18x8xbf16>, vector<16x8xbf16>, vector<18x16xf32> -> vector<18x16xf32>
    %cst_34 = arith.constant 0.353553385 : f32
    %76 = vector.broadcast %cst_34 : f32 to vector<18x16xf32>
    %77 = arith.mulf %75, %76 : vector<18x16xf32>
    %cst_35 = arith.constant dense<0xFF800000> : vector<18xf32>
    %78 = vector.multi_reduction <maximumf>, %77, %cst_35 [1] : vector<18x16xf32> to vector<18xf32>
    %79 = vector.shape_cast %78 : vector<18xf32> to vector<18x1xf32>
    %80 = vector.broadcast %79 : vector<18x1xf32> to vector<18x16xf32>
    %81 = arith.subf %77, %80 : vector<18x16xf32>
    %82 = math.exp %81 : vector<18x16xf32>
    %cst_36 = arith.constant dense<0.000000e+00> : vector<18xf32>
    %83 = vector.multi_reduction <add>, %82, %cst_36 [1] : vector<18x16xf32> to vector<18xf32>
    %84 = vector.shape_cast %83 : vector<18xf32> to vector<18x1xf32>
    %85 = tpu.reciprocal %84 {approx = true} : vector<18x1xf32> -> vector<18x1xf32>
    %86 = vector.broadcast %85 : vector<18x1xf32> to vector<18x16xf32>
    %87 = arith.mulf %82, %86 : vector<18x16xf32>
    %88 = arith.truncf %87 : vector<18x16xf32> to vector<18x16xbf16>
    %cst_37 = arith.constant dense<0.000000e+00> : vector<18x8xf32>
    %89 = tpu.matmul %88, %74, %cst_37 {dimension_numbers = #tpu.dot_dimension_numbers<[1], [0], [0], [1], [0, 0, 1, 1], [], []>} : vector<18x16xbf16>, vector<16x8xbf16>, vector<18x8xf32> -> vector<18x8xf32>
    %c0_38 = arith.constant 0 : index
    %c0_39 = arith.constant 0 : index
    %90 = vector.load %arg11[%c0_38, %c0_39] : memref<32x32xf32, #tpu.memory_space<vmem>>, vector<8x32xf32>
    %91 = arith.truncf %89 : vector<18x8xf32> to vector<18x8xbf16>
    %92 = arith.truncf %90 : vector<8x32xf32> to vector<8x32xbf16>
    %cst_40 = arith.constant dense<0.000000e+00> : vector<18x32xf32>
    %93 = tpu.matmul %91, %92, %cst_40 {dimension_numbers = #tpu.dot_dimension_numbers<[1], [0], [0], [1], [0, 0, 1, 1], [], []>} : vector<18x8xbf16>, vector<8x32xbf16>, vector<18x32xf32> -> vector<18x32xf32>
    %94 = arith.addf %68, %93 : vector<18x32xf32>
    %95 = vector.extract_strided_slice %65 {offsets = [0, 8], sizes = [18, 8], strides = [1, 1]} : vector<18x32xf32> to vector<18x8xf32>
    %96 = arith.truncf %95 : vector<18x8xf32> to vector<18x8xbf16>
    %97 = vector.extract_strided_slice %66 {offsets = [0, 8], sizes = [16, 8], strides = [1, 1]} : vector<16x32xf32> to vector<16x8xf32>
    %98 = arith.truncf %97 : vector<16x8xf32> to vector<16x8xbf16>
    %99 = vector.extract_strided_slice %67 {offsets = [0, 8], sizes = [16, 8], strides = [1, 1]} : vector<16x32xf32> to vector<16x8xf32>
    %100 = arith.truncf %99 : vector<16x8xf32> to vector<16x8xbf16>
    %cst_41 = arith.constant dense<0.000000e+00> : vector<18x16xf32>
    %101 = tpu.matmul %96, %98, %cst_41 {dimension_numbers = #tpu.dot_dimension_numbers<[1], [1], [0], [0], [0, 0, 1, 0], [], []>} : vector<18x8xbf16>, vector<16x8xbf16>, vector<18x16xf32> -> vector<18x16xf32>
    %cst_42 = arith.constant 0.353553385 : f32
    %102 = vector.broadcast %cst_42 : f32 to vector<18x16xf32>
    %103 = arith.mulf %101, %102 : vector<18x16xf32>
    %cst_43 = arith.constant dense<0xFF800000> : vector<18xf32>
    %104 = vector.multi_reduction <maximumf>, %103, %cst_43 [1] : vector<18x16xf32> to vector<18xf32>
    %105 = vector.shape_cast %104 : vector<18xf32> to vector<18x1xf32>
    %106 = vector.broadcast %105 : vector<18x1xf32> to vector<18x16xf32>
    %107 = arith.subf %103, %106 : vector<18x16xf32>
    %108 = math.exp %107 : vector<18x16xf32>
    %cst_44 = arith.constant dense<0.000000e+00> : vector<18xf32>
    %109 = vector.multi_reduction <add>, %108, %cst_44 [1] : vector<18x16xf32> to vector<18xf32>
    %110 = vector.shape_cast %109 : vector<18xf32> to vector<18x1xf32>
    %111 = tpu.reciprocal %110 {approx = true} : vector<18x1xf32> -> vector<18x1xf32>
    %112 = vector.broadcast %111 : vector<18x1xf32> to vector<18x16xf32>
    %113 = arith.mulf %108, %112 : vector<18x16xf32>
    %114 = arith.truncf %113 : vector<18x16xf32> to vector<18x16xbf16>
    %cst_45 = arith.constant dense<0.000000e+00> : vector<18x8xf32>
    %115 = tpu.matmul %114, %100, %cst_45 {dimension_numbers = #tpu.dot_dimension_numbers<[1], [0], [0], [1], [0, 0, 1, 1], [], []>} : vector<18x16xbf16>, vector<16x8xbf16>, vector<18x8xf32> -> vector<18x8xf32>
    %c8 = arith.constant 8 : index
    %c0_46 = arith.constant 0 : index
    %116 = vector.load %arg11[%c8, %c0_46] : memref<32x32xf32, #tpu.memory_space<vmem>>, vector<8x32xf32>
    %117 = arith.truncf %115 : vector<18x8xf32> to vector<18x8xbf16>
    %118 = arith.truncf %116 : vector<8x32xf32> to vector<8x32xbf16>
    %cst_47 = arith.constant dense<0.000000e+00> : vector<18x32xf32>
    %119 = tpu.matmul %117, %118, %cst_47 {dimension_numbers = #tpu.dot_dimension_numbers<[1], [0], [0], [1], [0, 0, 1, 1], [], []>} : vector<18x8xbf16>, vector<8x32xbf16>, vector<18x32xf32> -> vector<18x32xf32>
    %120 = arith.addf %94, %119 : vector<18x32xf32>
    %121 = vector.extract_strided_slice %65 {offsets = [0, 16], sizes = [18, 8], strides = [1, 1]} : vector<18x32xf32> to vector<18x8xf32>
    %122 = arith.truncf %121 : vector<18x8xf32> to vector<18x8xbf16>
    %123 = vector.extract_strided_slice %66 {offsets = [0, 16], sizes = [16, 8], strides = [1, 1]} : vector<16x32xf32> to vector<16x8xf32>
    %124 = arith.truncf %123 : vector<16x8xf32> to vector<16x8xbf16>
    %125 = vector.extract_strided_slice %67 {offsets = [0, 16], sizes = [16, 8], strides = [1, 1]} : vector<16x32xf32> to vector<16x8xf32>
    %126 = arith.truncf %125 : vector<16x8xf32> to vector<16x8xbf16>
    %cst_48 = arith.constant dense<0.000000e+00> : vector<18x16xf32>
    %127 = tpu.matmul %122, %124, %cst_48 {dimension_numbers = #tpu.dot_dimension_numbers<[1], [1], [0], [0], [0, 0, 1, 0], [], []>} : vector<18x8xbf16>, vector<16x8xbf16>, vector<18x16xf32> -> vector<18x16xf32>
    %cst_49 = arith.constant 0.353553385 : f32
    %128 = vector.broadcast %cst_49 : f32 to vector<18x16xf32>
    %129 = arith.mulf %127, %128 : vector<18x16xf32>
    %cst_50 = arith.constant dense<0xFF800000> : vector<18xf32>
    %130 = vector.multi_reduction <maximumf>, %129, %cst_50 [1] : vector<18x16xf32> to vector<18xf32>
    %131 = vector.shape_cast %130 : vector<18xf32> to vector<18x1xf32>
    %132 = vector.broadcast %131 : vector<18x1xf32> to vector<18x16xf32>
    %133 = arith.subf %129, %132 : vector<18x16xf32>
    %134 = math.exp %133 : vector<18x16xf32>
    %cst_51 = arith.constant dense<0.000000e+00> : vector<18xf32>
    %135 = vector.multi_reduction <add>, %134, %cst_51 [1] : vector<18x16xf32> to vector<18xf32>
    %136 = vector.shape_cast %135 : vector<18xf32> to vector<18x1xf32>
    %137 = tpu.reciprocal %136 {approx = true} : vector<18x1xf32> -> vector<18x1xf32>
    %138 = vector.broadcast %137 : vector<18x1xf32> to vector<18x16xf32>
    %139 = arith.mulf %134, %138 : vector<18x16xf32>
    %140 = arith.truncf %139 : vector<18x16xf32> to vector<18x16xbf16>
    %cst_52 = arith.constant dense<0.000000e+00> : vector<18x8xf32>
    %141 = tpu.matmul %140, %126, %cst_52 {dimension_numbers = #tpu.dot_dimension_numbers<[1], [0], [0], [1], [0, 0, 1, 1], [], []>} : vector<18x16xbf16>, vector<16x8xbf16>, vector<18x8xf32> -> vector<18x8xf32>
    %c16 = arith.constant 16 : index
    %c0_53 = arith.constant 0 : index
    %142 = vector.load %arg11[%c16, %c0_53] : memref<32x32xf32, #tpu.memory_space<vmem>>, vector<8x32xf32>
    %143 = arith.truncf %141 : vector<18x8xf32> to vector<18x8xbf16>
    %144 = arith.truncf %142 : vector<8x32xf32> to vector<8x32xbf16>
    %cst_54 = arith.constant dense<0.000000e+00> : vector<18x32xf32>
    %145 = tpu.matmul %143, %144, %cst_54 {dimension_numbers = #tpu.dot_dimension_numbers<[1], [0], [0], [1], [0, 0, 1, 1], [], []>} : vector<18x8xbf16>, vector<8x32xbf16>, vector<18x32xf32> -> vector<18x32xf32>
    %146 = arith.addf %120, %145 : vector<18x32xf32>
    %147 = vector.extract_strided_slice %65 {offsets = [0, 24], sizes = [18, 8], strides = [1, 1]} : vector<18x32xf32> to vector<18x8xf32>
    %148 = arith.truncf %147 : vector<18x8xf32> to vector<18x8xbf16>
    %149 = vector.extract_strided_slice %66 {offsets = [0, 24], sizes = [16, 8], strides = [1, 1]} : vector<16x32xf32> to vector<16x8xf32>
    %150 = arith.truncf %149 : vector<16x8xf32> to vector<16x8xbf16>
    %151 = vector.extract_strided_slice %67 {offsets = [0, 24], sizes = [16, 8], strides = [1, 1]} : vector<16x32xf32> to vector<16x8xf32>
    %152 = arith.truncf %151 : vector<16x8xf32> to vector<16x8xbf16>
    %cst_55 = arith.constant dense<0.000000e+00> : vector<18x16xf32>
    %153 = tpu.matmul %148, %150, %cst_55 {dimension_numbers = #tpu.dot_dimension_numbers<[1], [1], [0], [0], [0, 0, 1, 0], [], []>} : vector<18x8xbf16>, vector<16x8xbf16>, vector<18x16xf32> -> vector<18x16xf32>
    %cst_56 = arith.constant 0.353553385 : f32
    %154 = vector.broadcast %cst_56 : f32 to vector<18x16xf32>
    %155 = arith.mulf %153, %154 : vector<18x16xf32>
    %cst_57 = arith.constant dense<0xFF800000> : vector<18xf32>
    %156 = vector.multi_reduction <maximumf>, %155, %cst_57 [1] : vector<18x16xf32> to vector<18xf32>
    %157 = vector.shape_cast %156 : vector<18xf32> to vector<18x1xf32>
    %158 = vector.broadcast %157 : vector<18x1xf32> to vector<18x16xf32>
    %159 = arith.subf %155, %158 : vector<18x16xf32>
    %160 = math.exp %159 : vector<18x16xf32>
    %cst_58 = arith.constant dense<0.000000e+00> : vector<18xf32>
    %161 = vector.multi_reduction <add>, %160, %cst_58 [1] : vector<18x16xf32> to vector<18xf32>
    %162 = vector.shape_cast %161 : vector<18xf32> to vector<18x1xf32>
    %163 = tpu.reciprocal %162 {approx = true} : vector<18x1xf32> -> vector<18x1xf32>
    %164 = vector.broadcast %163 : vector<18x1xf32> to vector<18x16xf32>
    %165 = arith.mulf %160, %164 : vector<18x16xf32>
    %166 = arith.truncf %165 : vector<18x16xf32> to vector<18x16xbf16>
    %cst_59 = arith.constant dense<0.000000e+00> : vector<18x8xf32>
    %167 = tpu.matmul %166, %152, %cst_59 {dimension_numbers = #tpu.dot_dimension_numbers<[1], [0], [0], [1], [0, 0, 1, 1], [], []>} : vector<18x16xbf16>, vector<16x8xbf16>, vector<18x8xf32> -> vector<18x8xf32>
    %c24 = arith.constant 24 : index
    %c0_60 = arith.constant 0 : index
    %168 = vector.load %arg11[%c24, %c0_60] : memref<32x32xf32, #tpu.memory_space<vmem>>, vector<8x32xf32>
    %169 = arith.truncf %167 : vector<18x8xf32> to vector<18x8xbf16>
    %170 = arith.truncf %168 : vector<8x32xf32> to vector<8x32xbf16>
    %cst_61 = arith.constant dense<0.000000e+00> : vector<18x32xf32>
    %171 = tpu.matmul %169, %170, %cst_61 {dimension_numbers = #tpu.dot_dimension_numbers<[1], [0], [0], [1], [0, 0, 1, 1], [], []>} : vector<18x8xbf16>, vector<8x32xbf16>, vector<18x32xf32> -> vector<18x32xf32>
    %172 = arith.addf %146, %171 : vector<18x32xf32>
    %173 = arith.addf %1, %172 : vector<18x32xf32>
    %c0_62 = arith.constant 0 : index
    %c0_63 = arith.constant 0 : index
    %174 = vector.load %arg12[%c0_62, %c0_63] : memref<1x32xf32, #tpu.memory_space<vmem>>, vector<1x32xf32>
    %175 = vector.broadcast %174 : vector<1x32xf32> to vector<18x32xf32>
    %176 = arith.addf %173, %175 : vector<18x32xf32>
    %c0_64 = arith.constant 0 : index
    %c0_65 = arith.constant 0 : index
    %c0_66 = arith.constant 0 : index
    %177 = vector.load %arg13[%c0_64, %c0_65, %c0_66] : memref<1x18x32xf32, #tpu.memory_space<vmem>>, vector<1x18x32xf32>
    %178 = vector.shape_cast %177 : vector<1x18x32xf32> to vector<18x32xf32>
    %179 = vector.shape_cast %176 : vector<18x32xf32> to vector<1x18x32xf32>
    tpu.vector_store %arg13[%c0_64, %c0_65, %c0_66], %179 {strides = array<i32>} : memref<1x18x32xf32, #tpu.memory_space<vmem>>, vector<1x18x32xf32>,
    return
  }
  func.func @transform_0(%arg0: i32) -> (i32, i32, i32) {
    %c0_i32 = arith.constant 0 : i32
    %c0_i32_0 = arith.constant 0 : i32
    %c0_i32_1 = arith.constant 0 : i32
    return %arg0, %c0_i32, %c0_i32_0 : i32, i32, i32
  }
  func.func @transform_1(%arg0: i32) -> (i32, i32, i32) {
    %c0_i32 = arith.constant 0 : i32
    %c0_i32_0 = arith.constant 0 : i32
    %c0_i32_1 = arith.constant 0 : i32
    return %arg0, %c0_i32, %c0_i32_0 : i32, i32, i32
  }
  func.func @transform_2(%arg0: i32) -> (i32, i32) {
    %c0_i32 = arith.constant 0 : i32
    %c0_i32_0 = arith.constant 0 : i32
    %c0_i32_1 = arith.constant 0 : i32
    return %c0_i32, %c0_i32_0 : i32, i32
  }
  func.func @transform_3(%arg0: i32) -> (i32, i32) {
    %c0_i32 = arith.constant 0 : i32
    %c0_i32_0 = arith.constant 0 : i32
    %c0_i32_1 = arith.constant 0 : i32
    return %c0_i32, %c0_i32_0 : i32, i32
  }
  func.func @transform_4(%arg0: i32) -> (i32, i32) {
    %c0_i32 = arith.constant 0 : i32
    %c0_i32_0 = arith.constant 0 : i32
    %c0_i32_1 = arith.constant 0 : i32
    return %c0_i32, %c0_i32_0 : i32, i32
  }
  func.func @transform_5(%arg0: i32) -> (i32, i32) {
    %c0_i32 = arith.constant 0 : i32
    %c0_i32_0 = arith.constant 0 : i32
    %c0_i32_1 = arith.constant 0 : i32
    return %c0_i32, %c0_i32_0 : i32, i32
  }
  func.func @transform_6(%arg0: i32) -> (i32, i32) {
    %c0_i32 = arith.constant 0 : i32
    %c0_i32_0 = arith.constant 0 : i32
    %c0_i32_1 = arith.constant 0 : i32
    return %c0_i32, %c0_i32_0 : i32, i32
  }
  func.func @transform_7(%arg0: i32) -> (i32, i32) {
    %c0_i32 = arith.constant 0 : i32
    %c0_i32_0 = arith.constant 0 : i32
    %c0_i32_1 = arith.constant 0 : i32
    return %c0_i32, %c0_i32_0 : i32, i32
  }
  func.func @transform_8(%arg0: i32) -> (i32, i32) {
    %c0_i32 = arith.constant 0 : i32
    %c0_i32_0 = arith.constant 0 : i32
    %c0_i32_1 = arith.constant 0 : i32
    return %c0_i32, %c0_i32_0 : i32, i32
  }
  func.func @transform_9(%arg0: i32) -> (i32, i32) {
    %c0_i32 = arith.constant 0 : i32
    %c0_i32_0 = arith.constant 0 : i32
    %c0_i32_1 = arith.constant 0 : i32
    return %c0_i32, %c0_i32_0 : i32, i32
  }
  func.func @transform_10(%arg0: i32) -> (i32, i32) {
    %c0_i32 = arith.constant 0 : i32
    %c0_i32_0 = arith.constant 0 : i32
    %c0_i32_1 = arith.constant 0 : i32
    return %c0_i32, %c0_i32_0 : i32, i32
  }
  func.func @transform_11(%arg0: i32) -> (i32, i32) {
    %c0_i32 = arith.constant 0 : i32
    %c0_i32_0 = arith.constant 0 : i32
    %c0_i32_1 = arith.constant 0 : i32
    return %c0_i32, %c0_i32_0 : i32, i32
  }
  func.func @transform_12(%arg0: i32) -> (i32, i32, i32) {
    %c0_i32 = arith.constant 0 : i32
    %c0_i32_0 = arith.constant 0 : i32
    %c0_i32_1 = arith.constant 0 : i32
    return %arg0, %c0_i32, %c0_i32_0 : i32, i32, i32
  }
}

module attributes {stable_mosaic.version = 11 : i64} {
  func.func @_head_kernel(%arg0: i32, %arg1: memref<1x8x32xf32, #tpu.memory_space<vmem>>, %arg2: memref<1x32xf32, #tpu.memory_space<vmem>>, %arg3: memref<1x32xf32, #tpu.memory_space<vmem>>, %arg4: memref<50x32xf32, #tpu.memory_space<vmem>>, %arg5: memref<1x8x50xf32, #tpu.memory_space<vmem>>) attributes {dimension_semantics = [#tpu.dimension_semantics<parallel>], iteration_bounds = array<i64: 2>, scalar_prefetch = 0 : i64, scratch_operands = 0 : i64, tpu.core_type = #tpu.core_type<tc>, window_params = [{transform_indices = @transform_0, window_bounds = array<i64: 1, 8, 32>}, {pipeline_mode = #tpu.pipeline_mode<synchronous>, transform_indices = @transform_1, window_bounds = array<i64: 1, 32>}, {pipeline_mode = #tpu.pipeline_mode<synchronous>, transform_indices = @transform_2, window_bounds = array<i64: 1, 32>}, {pipeline_mode = #tpu.pipeline_mode<synchronous>, transform_indices = @transform_3, window_bounds = array<i64: 50, 32>}, {transform_indices = @transform_4, window_bounds = array<i64: 1, 8, 50>}]} {
    %c0 = arith.constant 0 : index
    %c0_0 = arith.constant 0 : index
    %c0_1 = arith.constant 0 : index
    %0 = vector.load %arg1[%c0, %c0_0, %c0_1] : memref<1x8x32xf32, #tpu.memory_space<vmem>>, vector<1x8x32xf32>
    %1 = vector.shape_cast %0 : vector<1x8x32xf32> to vector<8x32xf32>
    %c0_2 = arith.constant 0 : index
    %c0_3 = arith.constant 0 : index
    %2 = vector.load %arg2[%c0_2, %c0_3] : memref<1x32xf32, #tpu.memory_space<vmem>>, vector<1x32xf32>
    %c0_4 = arith.constant 0 : index
    %c0_5 = arith.constant 0 : index
    %3 = vector.load %arg3[%c0_4, %c0_5] : memref<1x32xf32, #tpu.memory_space<vmem>>, vector<1x32xf32>
    %cst = arith.constant dense<0.000000e+00> : vector<8xf32>
    %4 = vector.multi_reduction <add>, %1, %cst [1] : vector<8x32xf32> to vector<8xf32>
    %5 = vector.shape_cast %4 : vector<8xf32> to vector<8x1xf32>
    %cst_6 = arith.constant 3.200000e+01 : f32
    %6 = vector.broadcast %cst_6 : f32 to vector<8x1xf32>
    %7 = arith.divf %5, %6 : vector<8x1xf32>
    %8 = vector.broadcast %7 : vector<8x1xf32> to vector<8x32xf32>
    %9 = arith.subf %1, %8 : vector<8x32xf32>
    %10 = arith.mulf %9, %9 : vector<8x32xf32>
    %cst_7 = arith.constant dense<0.000000e+00> : vector<8xf32>
    %11 = vector.multi_reduction <add>, %10, %cst_7 [1] : vector<8x32xf32> to vector<8xf32>
    %12 = vector.shape_cast %11 : vector<8xf32> to vector<8x1xf32>
    %cst_8 = arith.constant 3.200000e+01 : f32
    %13 = vector.broadcast %cst_8 : f32 to vector<8x1xf32>
    %14 = arith.divf %12, %13 : vector<8x1xf32>
    %15 = vector.broadcast %7 : vector<8x1xf32> to vector<8x32xf32>
    %16 = arith.subf %1, %15 : vector<8x32xf32>
    %cst_9 = arith.constant 9.99999974E-6 : f32
    %17 = vector.broadcast %cst_9 : f32 to vector<8x1xf32>
    %18 = arith.addf %14, %17 : vector<8x1xf32>
    %19 = math.rsqrt %18 : vector<8x1xf32>
    %20 = vector.broadcast %19 : vector<8x1xf32> to vector<8x32xf32>
    %21 = arith.mulf %16, %20 : vector<8x32xf32>
    %22 = vector.broadcast %2 : vector<1x32xf32> to vector<8x32xf32>
    %23 = arith.mulf %21, %22 : vector<8x32xf32>
    %24 = vector.broadcast %3 : vector<1x32xf32> to vector<8x32xf32>
    %25 = arith.addf %23, %24 : vector<8x32xf32>
    %26 = arith.truncf %25 : vector<8x32xf32> to vector<8x32xbf16>
    %c0_10 = arith.constant 0 : index
    %c0_11 = arith.constant 0 : index
    %27 = vector.load %arg4[%c0_10, %c0_11] : memref<50x32xf32, #tpu.memory_space<vmem>>, vector<50x32xf32>
    %28 = arith.truncf %27 : vector<50x32xf32> to vector<50x32xbf16>
    %cst_12 = arith.constant dense<0.000000e+00> : vector<8x50xf32>
    %29 = tpu.matmul %26, %28, %cst_12 {dimension_numbers = #tpu.dot_dimension_numbers<[1], [1], [0], [0], [0, 0, 1, 0], [], []>} : vector<8x32xbf16>, vector<50x32xbf16>, vector<8x50xf32> -> vector<8x50xf32>
    %c0_13 = arith.constant 0 : index
    %c0_14 = arith.constant 0 : index
    %c0_15 = arith.constant 0 : index
    %30 = vector.load %arg5[%c0_13, %c0_14, %c0_15] : memref<1x8x50xf32, #tpu.memory_space<vmem>>, vector<1x8x50xf32>
    %31 = vector.shape_cast %30 : vector<1x8x50xf32> to vector<8x50xf32>
    %32 = vector.shape_cast %29 : vector<8x50xf32> to vector<1x8x50xf32>
    tpu.vector_store %arg5[%c0_13, %c0_14, %c0_15], %32 {strides = array<i32>} : memref<1x8x50xf32, #tpu.memory_space<vmem>>, vector<1x8x50xf32>,
    return
  }
  func.func @transform_0(%arg0: i32) -> (i32, i32, i32) {
    %c0_i32 = arith.constant 0 : i32
    %c0_i32_0 = arith.constant 0 : i32
    %c0_i32_1 = arith.constant 0 : i32
    return %arg0, %c0_i32, %c0_i32_0 : i32, i32, i32
  }
  func.func @transform_1(%arg0: i32) -> (i32, i32) {
    %c0_i32 = arith.constant 0 : i32
    %c0_i32_0 = arith.constant 0 : i32
    %c0_i32_1 = arith.constant 0 : i32
    return %c0_i32, %c0_i32_0 : i32, i32
  }
  func.func @transform_2(%arg0: i32) -> (i32, i32) {
    %c0_i32 = arith.constant 0 : i32
    %c0_i32_0 = arith.constant 0 : i32
    %c0_i32_1 = arith.constant 0 : i32
    return %c0_i32, %c0_i32_0 : i32, i32
  }
  func.func @transform_3(%arg0: i32) -> (i32, i32) {
    %c0_i32 = arith.constant 0 : i32
    %c0_i32_0 = arith.constant 0 : i32
    %c0_i32_1 = arith.constant 0 : i32
    return %c0_i32, %c0_i32_0 : i32, i32
  }
  func.func @transform_4(%arg0: i32) -> (i32, i32, i32) {
    %c0_i32 = arith.constant 0 : i32
    %c0_i32_0 = arith.constant 0 : i32
    %c0_i32_1 = arith.constant 0 : i32
    return %arg0, %c0_i32, %c0_i32_0 : i32, i32, i32
  }
}

</mosaic_0001>

<bundles_post_ra>
// kernel: decoder_forward.13
= control target key start
LH: loop header
LB: loop body
LE: loop exit
PB: predicated region body
PF: predicated region fallthrough
CT: control target
= control target key end

     0   :  { %9 = vsyncpa [#allocation3], 0  ;;  %s667_s0 = inlined_call_operand.vmem [shape: f32[2,8,32], index: 0, kind: input, shape index: {}]   ;;  %s668_s1 = inlined_call_operand.vmem [shape: f32[1,32], index: 1, kind: input, shape index: {}]   ;;  %s669_s2 = inlined_call_operand.vmem [shape: f32[1,32], index: 2, kind: input, shape index: {}]   ;;  %s670_s3 = inlined_call_operand.vmem [shape: f32[50,32], index: 3, kind: input, shape index: {}]   ;;  %s671_s4 = inlined_call_operand.hbm [shape: f32[2,8,50], index: 4, kind: output, shape index: {}]  }
   0x1   :  { %11 = vsyncpa [#allocation3 + $0x1], 0  ;;  %s533_s15 = smov 0   ;;  %s535_s16 = smov 0  }
   0x2   :  { %s537_s17 = smov 0   ;;  %s539_s18 = smov 0  }
   0x3 LB: > { %s554_s19 = sadd.s32 4294967295, %s503_s18   ;;  %s368_s20 = sadd.s32 4294967294, %s503_s18   ;;  %s503_s18 = sphi %s539_s18, %s677_s18   ;;  %s499_s17 = sphi %s537_s17, %s676_s17   ;;  %s495_s16 = sphi %s535_s16, %s675_s16   ;;  %s491_s15 = sphi %s533_s15, %s674_s15  }
   0x4   : > { %s558_s21 = sadd.s32 1, %s503_s18   ;;  %s113_s22 = sadd.s32 1, %s499_s17 }
   0x5   : > { %s110_s23 = ssub.s32 %s503_s18, %s558_s21  ;;  %p123_p0 = scmp.ne.s32.totalorder %s499_s17, %s495_s16 }
   0x6   : > { %p111_p1 = scmp.eq.s32.totalorder %s110_s23, 0  ;;  %p124_p2 = scmp.eq.s32.totalorder %s554_s19, 1 }
   0x7   : > { %p129_p3 = scmp.ne.s32.totalorder %s495_s16, %s491_s15  ;;  %p130_p4 = scmp.eq.s32.totalorder %s368_s20, 1 }
   0x8   : > { %s569_s24 = scalar_select %p111_p1, %s499_s17, %s113_s22  }
   0x9   : > { %p571_p5 = por %p124_p2, %p123_p0  ;;  %p575_p6 = por %p130_p4, %p129_p3 }
   0xa   : > { %p371_p7 = scmp.ge.s32.totalorder %s503_s18, 1  ;;  %p164_p8 = scmp.lt.s32.totalorder %s503_s18, 3 }
   0xc   : > { %p165_p9 = pnand %p371_p7, %p164_p8 }
   0xd   : > { %p189_p10 = scmp.lt.s32.totalorder (!%p165_p9), %s554_s19, 1  ;;  %vm197_vm0 = vcmask (!%p165_p9), 261120   ;;  %v227_v2 = vld [vmem:[%s670_s3] sm:$0xff] (!%p165_p9)  ;;  %v228_v3 = vld [vmem:[%s670_s3 + $0x8] sm:$0xff] (!%p165_p9)  ;;  %v505_v4 = vmov (!%p165_p9), 0.0   ;;  %v229_v12 = vld [vmem:[%s670_s3 + $0x10] sm:$0xff] (!%p165_p9) }
   0xe   : > { %168 = sbr.rel (%p165_p9) target bundleno = 568 (0x238), region = 36  ;;  %386 = vmatprep.subr.bf16.mxu0 (!%p165_p9), %v505_v4  ;;  %v234_v5 = vpack.c.bf16 (!%p165_p9), %v228_v3, %v227_v2  ;;  %v230_v13 = vld [vmem:[%s670_s3 + $0x18] sm:$0xff] (!%p165_p9)  ;;  %v231_v16 = vld [vmem:[%s670_s3 + $0x20] sm:$0xff] (!%p165_p9)  ;;  %v232_v17 = vld [vmem:[%s670_s3 + $0x28] sm:$0xff] (!%p165_p9)  ;;  %vm506_vm1 = vmmov (!%p165_p9), 0   ;;  %s186_s7 = sand.u32 (!%p165_p9), 1, %s495_s16  }
   0xf   : > { %v235_v14 = vpack.c.bf16 (!%p165_p9), %v230_v13, %v229_v12  ;;  %v236_v18 = vpack.c.bf16 (!%p165_p9), %v232_v17, %v231_v16  ;;  %v233_v20 = vld [vmem:[%s670_s3 + $0x30] sm:$0x3] (!%p165_p9)  ;;  %394 = vmatprep.mubr.msk.bf16.mxu0 (!%p165_p9), %vm506_vm1, %v505_v4  ;;  %v374_v27 = vld [vmem:[%s668_s1] ss:$0 sm:$0xff] (!%p165_p9)  ;;  %s372_s8 = sshll.u32 (!%p165_p9), %s186_s7, 3  ;;  %s378_s9 = sshll.u32 (!%p165_p9), %s554_s19, 7 }
  0x10   : > { %v242_v6 = vsel (!%p165_p9), %vm197_vm0, %v234_v5, 0  ;;  %v237_v21 = vpack.c.bf16 (!%p165_p9), %v233_v20, %v233_v20  ;;  %v375_v29 = vld [vmem:[%s669_s2] ss:$0 sm:$0xff] (!%p165_p9)  ;;  %s188_s10 = scalar_lea.vmem (!%p165_p9), [#allocation2], %s372_s8  ;;  %vm293_vm2 = vcmask (!%p165_p9), 408576   ;;  %s625_s14 = scalar_lea.hbm (!%p165_p9), %s671_s4, %s378_s9 }
  0x11   : > { %387 = vmatpush3.bf16.xpose.msra.mxu0 (!%p165_p9), %v242_v6  ;;  %v245_v15 = vsel (!%p165_p9), %vm197_vm0, %v235_v14, 0  ;;  %v248_v19 = vsel (!%p165_p9), %vm197_vm0, %v236_v18, 0  ;;  %s309_s11 = sshll.u32 (!%p165_p9), %s188_s10, 4  ;;  %s296_s20 = scalar_lea.sflag (!%p165_p9), [#allocation3], %s186_s7  ;;  %s627_s11 = int_to_ptr.vmem [resolvable:$true] %s309_s11 }
  0x12   : > { %388 = vmatprep.subr.bf16.mxu0 (!%p165_p9), %v505_v4  ;;  %v251_v22 = vsel (!%p165_p9), %vm197_vm0, %v237_v21, 0  ;;  %s441_s22 = scalar_lea.vmem (!%p165_p9), %s627_s11, 128 }
  0x13   : > { %p442_p11 = scmp.ne.s32.totalorder (!%p165_p9), %s627_s11, %s441_s22 }
  0x15   : > { %s190_s27 = scalar_select %p189_p10, %s554_s19, 1 }
  0x16   : > { %p443_p12 = pnand %p442_p11, %p571_p5  ;;  %s507_s19 = smov [#allocation2]  }
  0x17   : > { %s373_s28 = sshll.u32 %s190_s27, 3  ;;  %s445_s23 = sshll.u32 %s507_s19, 4  ;;  %s446_s23 = int_to_ptr.vmem [resolvable:$false] %s445_s23 }
  0x18   : > { %s192_s5 = scalar_lea.vmem %s667_s0, %s373_s28  ;;  %p444_p13 = pneg %p443_p12 }
  0x19   : > { %v194_v0 = vld [vmem:[%s192_s5] sm:$0xff]  ;;  %389 = vmatpush3.bf16.xpose.msra.mxu0 %v245_v15  ;;  %s447_s27 = scalar_lea.vmem %s446_s23, 256  ;;  %p448_p0 = scmp.lt.s32.totalorder %s627_s11, %s446_s23 }
  0x1a   : > { %v198_v1 = vsel %vm197_vm0, %v194_v0, 0.0  ;;  %390 = vmatprep.subr.bf16.mxu0 %v505_v4  ;;  %p449_p1 = scmp.lt.s32.totalorder %s447_s27, %s441_s22 }
  0x1b   : > { %199 = vadd.xlane.f32.xlu0 %v198_v1 }
  0x1c   : > { %p450_p2 = por %p449_p1, %p448_p0 }
  0x1e   : > { %p451_p3 = pnand %p450_p2, %p444_p13 }
  0x21   : > { %391 = vmatpush3.bf16.xpose.msra.mxu0 %v248_v19 }
  0x22   : > { %392 = vmatprep.subr.bf16.mxu0 %v505_v4 }
  0x29   : > { %393 = vmatpush3.bf16.xpose.msra.mxu0 %v251_v22 }
  0xa8   : > { %v200_v7 = vpop.xlane.xlu0 %199 }
  0xa9   : > { %v202_v8 = vmul.f32 0.03125, %v200_v7 }
  0xab   : > { %v203_v9 = vsub.f32 %v194_v0, %v202_v8 }
  0xad   : > { %v204_v10 = vmul.f32 %v203_v9, %v203_v9 }
  0xaf   : > { %v205_v11 = vsel %vm197_vm0, %v204_v10, 0.0 }
  0xb0   : > { %206 = vadd.xlane.f32.xlu0 %v205_v11 }
 0x13d   : > { %v207_v23 = vpop.xlane.xlu0 %206 }
 0x13e   : > { %v208_v24 = vmul.f32 0.03125, %v207_v23 }
 0x140   : > { %v209_v25 = vadd.f32 1e-05, %v208_v24 }
 0x142   : > { %439 = vrsqrt.f32 %v209_v25 }
 0x14c   : > { %v440_v26 = vpop.eup %439 }
 0x14d   : > { %v211_v28 = vmul.f32 %v440_v26, %v203_v9 }
 0x14f   : > { %v218_v30 = vmul.f32 %v374_v27, %v211_v28 }
 0x151   : > { %v225_v31 = vadd.f32 %v375_v29, %v218_v30 }
 0x153   : > { %v226_v32 = vpack.c.bf16 %v225_v31, %v225_v31 }
 0x155   : > { %395 = vmatmul.mubr.msk.bf16.vlgmr.msra.gmra.mrb[0].mxu0 %vm197_vm0, %v226_v32 }
 0x228   : > { %v287_v33 = vpop.f32.mrb[0].mxu0 }
 0x229   : > { %294 = vst.msk [vmem:[%s188_s10] sm:$0xff] %vm293_vm2, %v287_v33  ;;  %v396_v34 = vpop.f32.mrb[1].mxu0 }
 0x22a   : > { %v290_v35 = vpop.f32.mrb[2].mxu0 }
 0x22b   : > { %454 = shalt.err (!%p451_p3)
}
 0x22c   : > { %s455_s28 = scalar_lea.hbm %s625_s14, 128  ;;  %s459_s5 = scalar_lea.hbm %s671_s4, 256 }
 0x22d   : > { %p456_p4 = scmp.ne.s32.totalorder %s625_s14, %s455_s28  ;;  %p460_p9 = scmp.lt.u32.totalorder %s625_s14, %s671_s4 }
 0x22e   : > { %p461_p10 = scmp.lt.u32.totalorder %s459_s5, %s455_s28  ;;  %p463_p12 = scmp.lt.u32.totalorder %s455_s28, %s625_s14 }
 0x22f   : > { %p457_p7 = pnand %p456_p4, %p571_p5 }
 0x230   : > { %p462_p11 = por %p461_p10, %p460_p9 }
 0x231   : > { %p458_p8 = pneg %p457_p7 }
 0x232   : > { %p464_p13 = por %p463_p12, %p462_p11 }
 0x234   : > { %p465_p0 = pnand %p464_p13, %p458_p8 }
 0x236   : > { %468 = shalt.err (!%p465_p0)
}
 0x237   : > { %398 = dma.vmem_to_hbm [thread:$0]  (%p571_p5), %s627_s11, 128, %s625_s14, %s296_s20   ;;  %v397_v36 = vpop.f32.mrb[3].mxu0 }
 0x238 PF: > { %p404_p1 = scmp.ge.s32.totalorder %s503_s18, 2  ;;  %s321_s8 = sand.u32 1, %s491_s15  }
 0x239   : > { %s322_s9 = scalar_lea.sflag [#allocation3], %s321_s8 }
 0x23a   : > { %p401_p2 = pnand %p404_p1, %p575_p6 }
 0x23c   : > { %486 = dma.done.wait (!%p401_p2), %s322_s9, 128  }
 0x23d   : > { %488 = vsyncadd (!%p401_p2), %s322_s9, 4294967168  ;;  %p14_p3 = scmp.ge.s32.totalorder %s558_s21, 4   ;;  %s674_s15 = smov %s495_s16 }
 0x23e   : > { %s675_s16 = smov %s499_s17  ;;  %s676_s17 = smov %s569_s24 }
 0x23f   : > { %s677_s18 = smov %s558_s21  ;;  %16 = sbr.rel (!%p14_p3) target bundleno = 3 (0x3), region = 71 }
 0x246   :  { %327 = vsyncpa [#allocation3], 1 }
 0x247   :  { %329 = vsyncpa [#allocation3 + $0x1], 1 }

// kernel: decoder_forward.9
= control target key start
LH: loop header
LB: loop body
LE: loop exit
PB: predicated region body
PF: predicated region fallthrough
CT: control target
= control target key end

     0   :  { %s709_s24 = smov 0   ;;  %s831_s0 = inlined_call_operand.vmem [shape: f32[2,18,32], index: 0, kind: input, shape index: {}]   ;;  %s832_s1 = inlined_call_operand.vmem [shape: f32[1,32], index: 1, kind: input, shape index: {}]   ;;  %s833_s2 = inlined_call_operand.vmem [shape: f32[1,32], index: 2, kind: input, shape index: {}]   ;;  %s834_s3 = inlined_call_operand.vmem [shape: f32[32,128], index: 3, kind: input, shape index: {}]   ;;  %s835_s4 = inlined_call_operand.vmem [shape: f32[1,128], index: 4, kind: input, shape index: {}]   ;;  %s836_s5 = inlined_call_operand.vmem [shape: f32[128,32], index: 5, kind: input, shape index: {}]   ;;  %s837_s6 = inlined_call_operand.vmem [shape: f32[1,32], index: 6, kind: input, shape index: {}]   ;;  %s838_s7 = inlined_call_operand.vmem [shape: f32[2,18,32], index: 7, kind: output, shape index: {}]  }
   0x1 LB: > { %s583_s25 = sadd.s32 4294967295, %s667_s24   ;;  %p587_p0 = scmp.ge.s32.totalorder %s667_s24, 1  ;;  %s667_s24 = sphi %s709_s24, %s17_s24  }
   0x2   : > { %p237_p1 = scmp.lt.s32.totalorder %s667_s24, 3 }
   0x4   : > { %p238_p2 = pnand %p587_p0, %p237_p1 }
   0x5   : > { %p269_p3 = scmp.lt.s32.totalorder (!%p238_p2), %s583_s25, 1  ;;  %vm285_vm0 = vcmask (!%p238_p2), 261120   ;;  %vm292_vm1 = vcmask (!%p238_p2), 254976   ;;  %v345_v21 = vld [vmem:[%s834_s3] sm:$0xff] (!%p238_p2)  ;;  %v346_v22 = vld [vmem:[%s834_s3 + $0x8] sm:$0xff] (!%p238_p2)  ;;  %v347_v24 = vld [vmem:[%s834_s3 + $0x10] sm:$0xff] (!%p238_p2) }
   0x6   : > { %241 = sbr.rel (%p238_p2) target bundleno = 804 (0x324), region = 48  ;;  %v352_v23 = vpack.c.bf16 (!%p238_p2), %v346_v22, %v345_v21  ;;  %v348_v25 = vld [vmem:[%s834_s3 + $0x18] sm:$0xff] (!%p238_p2)  ;;  %v590_v38 = vld [vmem:[%s832_s1] ss:$0 sm:$0xff] (!%p238_p2)  ;;  %v442_v53 = vld [vmem:[%s836_s5 + $0x8] sm:$0xff] (!%p238_p2) }
   0x7   : > { %v353_v26 = vpack.c.bf16 (!%p238_p2), %v348_v25, %v347_v24  ;;  %v591_v44 = vld [vmem:[%s833_s2] ss:$0 sm:$0xff] (!%p238_p2)  ;;  %v443_v55 = vld [vmem:[%s836_s5 + $0x10] sm:$0xff] (!%p238_p2)  ;;  %v444_v56 = vld [vmem:[%s836_s5 + $0x18] sm:$0xff] (!%p238_p2) }
   0x8   : > { %612 = vmatprep.subr.bf16.mxu0 (!%p238_p2), %v352_v23  ;;  %v441_v52 = vld [vmem:[%s836_s5] sm:$0xff] (!%p238_p2)  ;;  %v461_v57 = vpack.c.bf16 (!%p238_p2), %v444_v56, %v443_v55  ;;  %v446_v59 = vld [vmem:[%s836_s5 + $0x28] sm:$0xff] (!%p238_p2)  ;;  %v447_v60 = vld [vmem:[%s836_s5 + $0x30] sm:$0xff] (!%p238_p2) }
   0x9   : > { %613 = vmatpush3.bf16.msra.mxu0 (!%p238_p2), %v352_v23  ;;  %v460_v54 = vpack.c.bf16 (!%p238_p2), %v442_v53, %v441_v52  ;;  %v445_v58 = vld [vmem:[%s836_s5 + $0x20] sm:$0xff] (!%p238_p2)  ;;  %v448_v62 = vld [vmem:[%s836_s5 + $0x38] sm:$0xff] (!%p238_p2) }
   0xa   : > { %614 = vmatprep.subr.bf16.mxu0 (!%p238_p2), %v353_v26  ;;  %v462_v61 = vpack.c.bf16 (!%p238_p2), %v446_v59, %v445_v58  ;;  %v463_v63 = vpack.c.bf16 (!%p238_p2), %v448_v62, %v447_v60  ;;  %v595_v52 = vld [vmem:[%s837_s6] ss:$0 sm:$0xff] (!%p238_p2) }
   0xb   : > { %620 = vmatprep.subr.bf16.mxu1 (!%p238_p2), %v460_v54 }
   0xc   : > { %621 = vmatpush3.bf16.msra.mxu1 (!%p238_p2), %v460_v54 }
   0xd   : > { %s840_s25 = smov (!%p269_p3, %s583_s25), 1  ;;  %615 = vmatpush3.bf16.msra.mxu0 %v353_v26  ;;  %622 = vmatprep.subr.bf16.mxu1 %v461_v57 }
   0xe   : > { %s640_s26 = smul.u32 24, %s840_s25 }
  0x10   : > { %s273_s29 = scalar_lea.vmem %s831_s0, %s640_s26  ;;  %623 = vmatpush3.bf16.msra.mxu1 %v461_v57  ;;  %s278_s17 = scalar_lea.vmem %s838_s7, %s640_s26 }
  0x11   : > { %v725_v0 = vld [vmem:[%s273_s29] sm:$0xff]  ;;  %v727_v1 = vld [vmem:[%s273_s29 + $0x10] sm:$0x3]  ;;  %v729_v2 = vld [vmem:[%s273_s29 + $0x8] sm:$0xff]  ;;  %624 = vmatprep.subr.bf16.mxu1 %v462_v61 }
  0x12   : > { %v286_v3 = vsel %vm285_vm0, %v725_v0, 0.0  ;;  %v293_v4 = vsel %vm292_vm1, %v727_v1, 0.0  ;;  %v289_v5 = vsel %vm285_vm0, %v729_v2, 0.0 }
  0x13   : > { %287 = vadd.xlane.f32.xlu0 %v286_v3  ;;  %294 = vadd.xlane.f32.xlu1 %v293_v4  ;;  %v449_v3 = vld [vmem:[%s836_s5 + $0x40] sm:$0xff]  ;;  %v450_v4 = vld [vmem:[%s836_s5 + $0x48] sm:$0xff] }
  0x14   : > { %625 = vmatpush3.bf16.msra.mxu1 %v462_v61 }
  0x15   : > { %626 = vmatprep.subr.bf16.mxu1 %v463_v63 }
  0x17   : > { %290 = vadd.xlane.f32.xlu0 %v289_v5  ;;  %v464_v5 = vpack.c.bf16 %v450_v4, %v449_v3 }
  0x18   : > { %627 = vmatpush3.bf16.msra.mxu1 %v463_v63 }
  0x19   : > { %628 = vmatprep.subr.bf16.mxu1 %v464_v5 }
  0x1c   : > { %629 = vmatpush3.bf16.msra.mxu1 %v464_v5 }
  0xa0   : > { %v288_v6 = vpop.xlane.xlu0 %287  ;;  %v295_v7 = vpop.xlane.xlu1 %294 }
  0xa1   : > { %v297_v8 = vmul.f32 0.03125, %v288_v6  ;;  %v299_v9 = vmul.f32 0.03125, %v295_v7  ;;  %v451_v6 = vld [vmem:[%s836_s5 + $0x50] sm:$0xff]  ;;  %v452_v7 = vld [vmem:[%s836_s5 + $0x58] sm:$0xff] }
  0xa3   : > { %v300_v10 = vsub.f32 %v725_v0, %v297_v8  ;;  %v302_v11 = vsub.f32 %v727_v1, %v299_v9  ;;  %v465_v8 = vpack.c.bf16 %v452_v7, %v451_v6  ;;  %v453_v9 = vld [vmem:[%s836_s5 + $0x60] sm:$0xff] }
  0xa4   : > { %v291_v12 = vpop.xlane.xlu0 %290 }
  0xa5   : > { %v298_v13 = vmul.f32 0.03125, %v291_v12  ;;  %v303_v14 = vmul.f32 %v300_v10, %v300_v10  ;;  %v305_v15 = vmul.f32 %v302_v11, %v302_v11  ;;  %630 = vmatprep.subr.bf16.mxu1 %v465_v8  ;;  %v455_v12 = vld [vmem:[%s836_s5 + $0x70] sm:$0xff] }
  0xa6   : > { %631 = vmatpush3.bf16.msra.mxu1 %v465_v8 }
  0xa7   : > { %v301_v16 = vsub.f32 %v729_v2, %v298_v13  ;;  %v306_v17 = vsel %vm285_vm0, %v303_v14, 0.0  ;;  %v312_v18 = vsel %vm292_vm1, %v305_v15, 0.0  ;;  %v456_v13 = vld [vmem:[%s836_s5 + $0x78] sm:$0xff]  ;;  %v592_v15 = vld [vmem:[%s835_s4] ss:$0 sm:$0xff] }
  0xa8   : > { %307 = vadd.xlane.f32.xlu1 %v306_v17  ;;  %v467_v14 = vpack.c.bf16 %v456_v13, %v455_v12 }
  0xa9   : > { %v304_v19 = vmul.f32 %v301_v16, %v301_v16 }
  0xab   : > { %v309_v20 = vsel %vm285_vm0, %v304_v19, 0.0 }
  0xac   : > { %313 = vadd.xlane.f32.xlu1 %v312_v18  ;;  %310 = vadd.xlane.f32.xlu0 %v309_v20 }
 0x135   : > { %v308_v27 = vpop.xlane.xlu1 %307 }
 0x136   : > { %v315_v28 = vmul.f32 0.03125, %v308_v27 }
 0x138   : > { %v318_v29 = vadd.f32 1e-05, %v315_v28 }
 0x139   : > { %v314_v30 = vpop.xlane.xlu1 %313  ;;  %v311_v31 = vpop.xlane.xlu0 %310 }
 0x13a   : > { %649 = vrsqrt.f32 %v318_v29  ;;  %v317_v32 = vmul.f32 0.03125, %v314_v30  ;;  %v316_v33 = vmul.f32 0.03125, %v311_v31 }
 0x13c   : > { %v320_v34 = vadd.f32 1e-05, %v317_v32  ;;  %v319_v35 = vadd.f32 1e-05, %v316_v33 }
 0x13e   : > { %651 = vrsqrt.f32 %v320_v34 }
 0x13f   : > { %653 = vrsqrt.f32 %v319_v35 }
 0x144   : > { %v650_v36 = vpop.eup %649 }
 0x145   : > { %v324_v37 = vmul.f32 %v650_v36, %v300_v10  ;;  %v454_v10 = vld [vmem:[%s836_s5 + $0x68] sm:$0xff] }
 0x147   : > { %v333_v43 = vmul.f32 %v590_v38, %v324_v37 }
 0x148   : > { %v652_v39 = vpop.eup %651 }
 0x149   : > { %v654_v40 = vpop.eup %653  ;;  %v326_v41 = vmul.f32 %v652_v39, %v302_v11  ;;  %v342_v48 = vadd.f32 %v591_v44, %v333_v43  ;;  %v466_v11 = vpack.c.bf16 %v454_v10, %v453_v9 }
 0x14a   : > { %v325_v42 = vmul.f32 %v654_v40, %v301_v16 }
 0x14b   : > { %v335_v45 = vmul.f32 %v590_v38, %v326_v41  ;;  %632 = vmatprep.subr.bf16.mxu1 %v466_v11 }
 0x14c   : > { %v334_v46 = vmul.f32 %v590_v38, %v325_v42  ;;  %633 = vmatpush3.bf16.msra.mxu1 %v466_v11 }
 0x14d   : > { %v344_v47 = vadd.f32 %v591_v44, %v335_v45  ;;  %634 = vmatprep.subr.bf16.mxu1 %v467_v14 }
 0x14e   : > { %v343_v49 = vadd.f32 %v591_v44, %v334_v46 }
 0x14f   : > { %v351_v50 = vpack.c.bf16 %v344_v47, %v344_v47 }
 0x150   : > { %v350_v51 = vpack.c.bf16 %v343_v49, %v342_v48  ;;  %635 = vmatpush3.bf16.msra.mxu1 %v467_v14 }
 0x152   : > { %616 = vmatprep.mubr.msk.bf16.mxu0 %vm285_vm0, %v350_v51 }
 0x153   : > { %617 = vmatmul.mubr.msk.bf16.vlgmr.msra.gmra.mrb[0].mxu0 %vm285_vm0, %v351_v50 }
 0x226   : > { %v618_v16 = vpop.f32.mrb[0].mxu0 }
 0x227   : > { %v409_v17 = vadd.f32 %v618_v16, %v592_v15  ;;  %v400_v18 = vpop.f32.mrb[1].mxu0 }
 0x228   : > { %v401_v19 = vadd.f32 %v592_v15, %v400_v18  ;;  %v619_v20 = vpop.f32.mrb[2].mxu0 }
 0x229   : > { %v419_v21 = vmul.f32 0.044715, %v409_v17  ;;  %v403_v22 = vpop.f32.mrb[3].mxu0  ;;  %v416_v43 = vmul.f32 0.5, %v409_v17 }
 0x22a   : > { %v417_v23 = vmul.f32 0.044715, %v401_v19  ;;  %v404_v24 = vadd.f32 %v592_v15, %v403_v22  ;;  %v414_v44 = vmul.f32 0.5, %v401_v19 }
 0x22b   : > { %v422_v25 = vmul.f32 %v419_v21, %v409_v17 }
 0x22c   : > { %v418_v26 = vmul.f32 0.044715, %v404_v24  ;;  %v420_v27 = vmul.f32 %v417_v23, %v401_v19  ;;  %v415_v45 = vmul.f32 0.5, %v404_v24 }
 0x22d   : > { %v425_v28 = vmul.f32 %v422_v25, %v409_v17 }
 0x22e   : > { %v421_v29 = vmul.f32 %v418_v26, %v404_v24  ;;  %v423_v30 = vmul.f32 %v420_v27, %v401_v19 }
 0x22f   : > { %v428_v31 = vadd.f32 %v425_v28, %v409_v17 }
 0x230   : > { %v424_v32 = vmul.f32 %v421_v29, %v404_v24  ;;  %v426_v33 = vadd.f32 %v423_v30, %v401_v19 }
 0x231   : > { %v431_v34 = vmul.f32 0.7978846, %v428_v31 }
 0x232   : > { %v427_v35 = vadd.f32 %v424_v32, %v404_v24  ;;  %v429_v36 = vmul.f32 0.7978846, %v426_v33 }
 0x233   : > { %655 = vtanh.f32 %v431_v34 }
 0x234   : > { %v430_v37 = vmul.f32 0.7978846, %v427_v35  ;;  %657 = vtanh.f32 %v429_v36 }
 0x236   : > { %659 = vtanh.f32 %v430_v37 }
 0x23d   : > { %v656_v38 = vpop.eup %655 }
 0x23e   : > { %v658_v39 = vpop.eup %657  ;;  %v437_v40 = vadd.f32 1.0, %v656_v38 }
 0x23f   : > { %v435_v41 = vadd.f32 1.0, %v658_v39 }
 0x240   : > { %v660_v42 = vpop.eup %659  ;;  %v440_v47 = vmul.f32 %v437_v40, %v416_v43 }
 0x241   : > { %v436_v46 = vadd.f32 1.0, %v660_v42  ;;  %v438_v48 = vmul.f32 %v435_v41, %v414_v44 }
 0x242   : > { %v459_v51 = vpack.c.bf16 %v440_v47, %v440_v47 }
 0x243   : > { %v439_v49 = vmul.f32 %v436_v46, %v415_v45 }
 0x245   : > { %v458_v50 = vpack.c.bf16 %v439_v49, %v438_v48 }
 0x247   : > { %636 = vmatprep.mubr.bf16.mxu1 %v458_v50 }
 0x248   : > { %637 = vmatmul.mubr.bf16.vlgmr.msra.gmra.mrb[0].mxu1 %v459_v51 }
 0x31b   : > { %v638_v53 = vpop.f32.mrb[0].mxu1 }
 0x31c   : > { %v517_v54 = vadd.f32 %v638_v53, %v595_v52  ;;  %v508_v55 = vpop.f32.mrb[1].mxu1 }
 0x31d   : > { %v509_v56 = vadd.f32 %v595_v52, %v508_v55  ;;  %v639_v57 = vpop.f32.mrb[2].mxu1 }
 0x31e   : > { %v524_v58 = vadd.f32 %v517_v54, %v727_v1  ;;  %v511_v59 = vpop.f32.mrb[3].mxu1 }
 0x31f   : > { %v522_v60 = vadd.f32 %v509_v56, %v725_v0  ;;  %v512_v61 = vadd.f32 %v595_v52, %v511_v59 }
 0x320   : > { %527 = vst.msk [vmem:[%s278_s17 + $0x10] sm:$0x3] %vm292_vm1, %v524_v58 }
 0x321   : > { %525 = vst.msk [vmem:[%s278_s17] sm:$0xff] %vm285_vm0, %v522_v60  ;;  %v523_v62 = vadd.f32 %v512_v61, %v729_v2 }
 0x323   : > { %526 = vst.msk [vmem:[%s278_s17 + $0x8] sm:$0xff] %vm285_vm0, %v523_v62 }
 0x324 PF: > { %s17_s24 = sadd.s32 1, %s667_s24  }
 0x325   : > { %p14_p4 = scmp.ge.s32.totalorder %s17_s24, 4  }
 0x327   :  { %16 = sbr.rel (!%p14_p4) target bundleno = 1 (0x1), region = 78 }

// kernel: decoder_forward.7
= control target key start
LH: loop header
LB: loop body
LE: loop exit
PB: predicated region body
PF: predicated region fallthrough
CT: control target
= control target key end

     0   :  { %s1765_s24 = smov 0   ;;  %s2029_s0 = inlined_call_operand.vmem [shape: f32[2,18,32], index: 0, kind: input, shape index: {}]   ;;  %s2030_s1 = inlined_call_operand.vmem [shape: f32[1,32], index: 1, kind: input, shape index: {}]   ;;  %s2031_s2 = inlined_call_operand.vmem [shape: f32[1,32], index: 2, kind: input, shape index: {}]   ;;  %s2032_s3 = inlined_call_operand.vmem [shape: f32[32,96], index: 3, kind: input, shape index: {}]   ;;  %s2033_s4 = inlined_call_operand.vmem [shape: f32[1,96], index: 4, kind: input, shape index: {}]   ;;  %s2034_s5 = inlined_call_operand.vmem [shape: f32[32,32], index: 5, kind: input, shape index: {}]   ;;  %s2035_s6 = inlined_call_operand.vmem [shape: f32[1,32], index: 6, kind: input, shape index: {}]   ;;  %s2036_s7 = inlined_call_operand.vmem [shape: f32[2,18,32], index: 7, kind: output, shape index: {}]  }
   0x1 LB: > { %s1433_s25 = sadd.s32 4294967295, %s1712_s24   ;;  %p1437_p0 = scmp.ge.s32.totalorder %s1712_s24, 1  ;;  %s1712_s24 = sphi %s1765_s24, %s17_s24  }
   0x2   : > { %p237_p1 = scmp.lt.s32.totalorder %s1712_s24, 3 }
   0x4   : > { %p238_p2 = pnand %p1437_p0, %p237_p1 }
   0x5   : > { %p269_p3 = scmp.lt.s32.totalorder (!%p238_p2), %s1433_s25, 1  ;;  %vm285_vm0 = vcmask (!%p238_p2), 261120   ;;  %vm292_vm1 = vcmask (!%p238_p2), 254976   ;;  %v345_v21 = vld [vmem:[%s2032_s3] sm:$0xff] (!%p238_p2)  ;;  %v346_v22 = vld [vmem:[%s2032_s3 + $0x8] sm:$0xff] (!%p238_p2)  ;;  %v347_v23 = vld [vmem:[%s2032_s3 + $0x10] sm:$0xff] (!%p238_p2) }
   0x6   : > { %241 = sbr.rel (%p238_p2) target bundleno = 3222 (0xc96), region = 48  ;;  %v352_v24 = vpack.c.bf16 (!%p238_p2), %v346_v22, %v345_v21  ;;  %v348_v25 = vld [vmem:[%s2032_s3 + $0x18] sm:$0xff] (!%p238_p2)  ;;  %v1440_v38 = vld [vmem:[%s2030_s1] ss:$0 sm:$0xff] (!%p238_p2)  ;;  %s1714_s21 = smov (!%p238_p2), 96   ;;  %vm431_vm2 = vcmask (!%p238_p2), 64512  }
   0x7   : > { %v353_v26 = vpack.c.bf16 (!%p238_p2), %v348_v25, %v347_v23  ;;  %v1441_v44 = vld [vmem:[%s2031_s2] ss:$0 sm:$0xff] (!%p238_p2)  ;;  %vm498_vm4 = vcmask (!%p238_p2), 146432   ;;  %vm505_vm7 = vcmask (!%p238_p2), 140288   ;;  %s1715_s22 = smov (!%p238_p2), 64   ;;  %s1716_s23 = smov (!%p238_p2), 120  }
   0x8   : > { %1520 = vmatprep.subr.bf16.mxu0 (!%p238_p2), %v352_v24  ;;  %v1442_v52 = vld [vmem:[%s2033_s4] ss:$0 sm:$0xff] (!%p238_p2)  ;;  %s1717_s27 = smov (!%p238_p2), 88   ;;  %vm546_vm8 = vcmask (!%p238_p2), 1040384   ;;  %vm783_vm9 = vcmask (!%p238_p2), 1043456   ;;  %s1718_s30 = smov (!%p238_p2), 56  }
   0x9   : > { %1521 = vmatpush3.bf16.msra.mxu0 (!%p238_p2), %v352_v24  ;;  %s1719_s8 = smov (!%p238_p2), 80   ;;  %s1720_s9 = smov (!%p238_p2), 112  }
   0xa   : > { %1522 = vmatprep.subr.bf16.mxu0 (!%p238_p2), %v353_v26  ;;  %s1721_s10 = smov (!%p238_p2), 72   ;;  %s1722_s11 = smov (!%p238_p2), 104  }
   0xb   : > { %s1723_s14 = smov (!%p238_p2), 48   ;;  %s1724_s17 = smov (!%p238_p2), 40  }
   0xd   : > { %s2038_s25 = smov (!%p269_p3, %s1433_s25), 1  ;;  %1523 = vmatpush3.bf16.msra.mxu0 %v353_v26 }
   0xe   : > { %s1632_s26 = smul.u32 24, %s2038_s25 }
  0x10   : > { %s273_s29 = scalar_lea.vmem %s2029_s0, %s1632_s26 }
  0x11   : > { %v1781_v0 = vld [vmem:[%s273_s29] sm:$0xff]  ;;  %v1783_v1 = vld [vmem:[%s273_s29 + $0x10] sm:$0x3]  ;;  %v1785_v2 = vld [vmem:[%s273_s29 + $0x8] sm:$0xff] }
  0x12   : > { %v286_v3 = vsel %vm285_vm0, %v1781_v0, 0.0  ;;  %v293_v4 = vsel %vm292_vm1, %v1783_v1, 0.0  ;;  %v289_v5 = vsel %vm285_vm0, %v1785_v2, 0.0 }
  0x13   : > { %287 = vadd.xlane.f32.xlu0 %v286_v3  ;;  %294 = vadd.xlane.f32.xlu1 %v293_v4 }
  0x17   : > { %290 = vadd.xlane.f32.xlu0 %v289_v5  ;;  %v414_v5 = vlaneseq }
  0xa0   : > { %v288_v6 = vpop.xlane.xlu0 %287  ;;  %v295_v7 = vpop.xlane.xlu1 %294 }
  0xa1   : > { %v297_v8 = vmul.f32 0.03125, %v288_v6  ;;  %v299_v9 = vmul.f32 0.03125, %v295_v7  ;;  %v1836_v6 = vshrl.u32 %v414_v5, 7  ;;  %v1838_v7 = vand.u32 127, %v414_v5 }
  0xa3   : > { %v300_v10 = vsub.f32 %v1781_v0, %v297_v8  ;;  %v302_v11 = vsub.f32 %v1783_v1, %v299_v9  ;;  %v1841_v8 = vadd.s32 8, %v1836_v6  ;;  %vm420_vm3 = vcmp.le.s32.totalorder %v1838_v7, %v1836_v6 }
  0xa4   : > { %v291_v12 = vpop.xlane.xlu0 %290 }
  0xa5   : > { %v298_v13 = vmul.f32 0.03125, %v291_v12  ;;  %v303_v14 = vmul.f32 %v300_v10, %v300_v10  ;;  %v305_v15 = vmul.f32 %v302_v11, %v302_v11  ;;  %vm421_vm5 = vcmp.le.s32.totalorder %v1838_v7, %v1841_v8 }
  0xa7   : > { %v301_v16 = vsub.f32 %v1785_v2, %v298_v13  ;;  %v306_v17 = vsel %vm285_vm0, %v303_v14, 0.0  ;;  %v312_v18 = vsel %vm292_vm1, %v305_v15, 0.0 }
  0xa8   : > { %307 = vadd.xlane.f32.xlu1 %v306_v17 }
  0xa9   : > { %v304_v19 = vmul.f32 %v301_v16, %v301_v16 }
  0xab   : > { %v309_v20 = vsel %vm285_vm0, %v304_v19, 0.0 }
  0xac   : > { %313 = vadd.xlane.f32.xlu1 %v312_v18  ;;  %310 = vadd.xlane.f32.xlu0 %v309_v20 }
 0x135   : > { %v308_v27 = vpop.xlane.xlu1 %307 }
 0x136   : > { %v315_v28 = vmul.f32 0.03125, %v308_v27 }
 0x138   : > { %v318_v29 = vadd.f32 1e-05, %v315_v28 }
 0x139   : > { %v314_v30 = vpop.xlane.xlu1 %313  ;;  %v311_v31 = vpop.xlane.xlu0 %310 }
 0x13a   : > { %1652 = vrsqrt.f32 %v318_v29  ;;  %v317_v32 = vmul.f32 0.03125, %v314_v30  ;;  %v316_v33 = vmul.f32 0.03125, %v311_v31 }
 0x13c   : > { %v320_v34 = vadd.f32 1e-05, %v317_v32  ;;  %v319_v35 = vadd.f32 1e-05, %v316_v33 }
 0x13e   : > { %1654 = vrsqrt.f32 %v320_v34 }
 0x13f   : > { %1656 = vrsqrt.f32 %v319_v35 }
 0x144   : > { %v1653_v36 = vpop.eup %1652 }
 0x145   : > { %v324_v37 = vmul.f32 %v1653_v36, %v300_v10 }
 0x147   : > { %v333_v43 = vmul.f32 %v1440_v38, %v324_v37 }
 0x148   : > { %v1655_v39 = vpop.eup %1654 }
 0x149   : > { %v1657_v40 = vpop.eup %1656  ;;  %v326_v41 = vmul.f32 %v1655_v39, %v302_v11  ;;  %v342_v48 = vadd.f32 %v1441_v44, %v333_v43  ;;  %v1846_v11 = vadd.s32 16, %v1836_v6 }
 0x14a   : > { %v325_v42 = vmul.f32 %v1657_v40, %v301_v16 }
 0x14b   : > { %v335_v45 = vmul.f32 %v1440_v38, %v326_v41  ;;  %vm422_vm6 = vcmp.le.s32.totalorder %v1838_v7, %v1846_v11 }
 0x14c   : > { %v334_v46 = vmul.f32 %v1440_v38, %v325_v42 }
 0x14d   : > { %v344_v47 = vadd.f32 %v1441_v44, %v335_v45 }
 0x14e   : > { %v343_v49 = vadd.f32 %v1441_v44, %v334_v46 }
 0x14f   : > { %v351_v50 = vpack.c.bf16 %v344_v47, %v344_v47 }
 0x150   : > { %v350_v51 = vpack.c.bf16 %v343_v49, %v342_v48 }
 0x152   : > { %1524 = vmatprep.mubr.msk.bf16.mxu0 %vm285_vm0, %v350_v51 }
 0x153   : > { %1525 = vmatmul.mubr.msk.bf16.vlgmr.msra.gmra.mrb[0].mxu0 %vm285_vm0, %v351_v50 }
 0x226   : > { %v1526_v53 = vpop.f32.mrb[0].mxu0 }
 0x227   : > { %v409_v54 = vadd.f32 %v1526_v53, %v1442_v52  ;;  %v400_v55 = vpop.f32.mrb[1].mxu0 }
 0x228   : > { %v1527_v56 = vpop.f32.mrb[2].mxu0  ;;  %v401_v59 = vadd.f32 %v1442_v52, %v400_v55 }
 0x229   : > { %v1822_v57 = vpack.c.bf16 %v409_v54, %v409_v54  ;;  %v403_v58 = vpop.f32.mrb[3].mxu0 }
 0x22a   : > { %v404_v60 = vadd.f32 %v1442_v52, %v403_v58 }
 0x22b   : > { %429 = vrot.lane.b32.xlu1 %v1822_v57, %s1714_s21 }
 0x22c   : > { %v1825_v61 = vpack.c.bf16 %v404_v60, %v401_v59  ;;  %v598_v59 = vld [vmem:[%s2034_s5] sm:$0xff] }
 0x22d   : > { %v601_v60 = vpack.c.bf16 %v598_v59, %v598_v59 }
 0x22e   : > { %427 = vrot.lane.b32.xlu0 %v1825_v61, %s1714_s21  ;;  %1532 = vmatprep.mubr.msk.bf16.mxu1 %vm431_vm2, %v1825_v61 }
 0x29d   : > { %v430_v3 = vpop.permute.xlu1 %429 }
 0x29e   : > { %v442_v4 = vsel %vm431_vm2, %v430_v3, 0 }
 0x2a0   : > { %v428_v62 = vpop.permute.xlu0 %427 }
 0x2a1   : > { %1616 = vmatprep.subr.msk.bf16.mxu1 %vm431_vm2, %v428_v62  ;;  %v439_v63 = vsel %vm431_vm2, %v428_v62, 0  ;;  %v842_v62 = vsel %vm783_vm9, %v601_v60, 0 }
 0x2a2   : > { %1529 = vmatpush3.bf16.xpose.msra.mxu1 %v439_v63 }
 0x2a3   : > { %1617 = vmatprep.subr.msk.bf16.mxu1 %vm431_vm2, %v430_v3 }
 0x2aa   : > { %1531 = vmatpush3.bf16.xpose.msra.mxu1 %v442_v4 }
 0x2b1   : > { %1533 = vmatmul.mubr.msk.bf16.vlgmr.msra.gmra.mrb[0].mxu1 %vm431_vm2, %v1822_v57 }
 0x384   : > { %v1534_v9 = vpop.f32.mrb[0].mxu1 }
 0x385   : > { %v478_v10 = vpop.f32.mrb[1].mxu1  ;;  %v494_v15 = vmul.f32 0.35355338, %v1534_v9 }
 0x386   : > { %v492_v12 = vmul.f32 0.35355338, %v478_v10  ;;  %v1535_v13 = vpop.f32.mrb[2].mxu1 }
 0x387   : > { %v481_v14 = vpop.f32.mrb[3].mxu1  ;;  %v497_v21 = vsel %vm422_vm6, %v494_v15, -1e+30 }
 0x388   : > { %v493_v16 = vmul.f32 0.35355338, %v481_v14  ;;  %v495_v17 = vsel %vm420_vm3, %v492_v12, -1e+30  ;;  %v506_v22 = vsel %vm505_vm7, %v497_v21, -inf }
 0x389   : > { %v499_v18 = vsel %vm498_vm4, %v495_v17, -inf }
 0x38a   : > { %500 = vmax.xlane.f32.xlu1 %v499_v18  ;;  %v496_v19 = vsel %vm421_vm5, %v493_v16, -1e+30 }
 0x38b   : > { %v502_v20 = vsel %vm498_vm4, %v496_v19, -inf }
 0x38c   : > { %503 = vmax.xlane.f32.xlu0 %v502_v20 }
 0x390   : > { %507 = vmax.xlane.f32.xlu0 %v506_v22 }
 0x417   : > { %v501_v23 = vpop.xlane.xlu1 %500 }
 0x418   : > { %v509_v26 = vsub.f32 %v495_v17, %v501_v23 }
 0x419   : > { %v504_v24 = vpop.xlane.xlu0 %503 }
 0x41a   : > { %v510_v25 = vsub.f32 %v496_v19, %v504_v24  ;;  %v512_v30 = vmul.f32 1.442695, %v509_v26 }
 0x41c   : > { %v514_v27 = vmul.f32 1.442695, %v510_v25 }
 0x41d   : > { %v508_v28 = vpop.xlane.xlu0 %507 }
 0x41e   : > { %1658 = vpow2.f32 %v514_v27  ;;  %v511_v29 = vsub.f32 %v497_v21, %v508_v28 }
 0x420   : > { %v516_v31 = vmul.f32 1.442695, %v511_v29 }
 0x422   : > { %1660 = vpow2.f32 %v516_v31 }
 0x423   : > { %1662 = vpow2.f32 %v512_v30 }
 0x428   : > { %v1659_v32 = vpop.eup %1658 }
 0x429   : > { %v521_v33 = vsel %vm498_vm4, %v1659_v32, 0.0 }
 0x42a   : > { %522 = vadd.xlane.f32.xlu0 %v521_v33 }
 0x42c   : > { %v1661_v34 = vpop.eup %1660 }
 0x42d   : > { %v524_v35 = vsel %vm505_vm7, %v1661_v34, 0.0  ;;  %v1663_v36 = vpop.eup %1662 }
 0x42e   : > { %525 = vadd.xlane.f32.xlu1 %v524_v35  ;;  %v518_v37 = vsel %vm498_vm4, %v1663_v36, 0.0 }
 0x432   : > { %519 = vadd.xlane.f32.xlu1 %v518_v37 }
 0x440   : > { %535 = vrot.lane.b32.xlu0 %v1825_v61, %s1715_s22 }
 0x443   : > { %537 = vrot.lane.b32.xlu1 %v1822_v57, %s1715_s22 }
 0x444   : > { %602 = vrot.lane.b32.xlu0 %v1825_v61, %s1716_s23 }
 0x447   : > { %606 = vrot.lane.b32.xlu1 %v1825_v61, %s1717_s27 }
 0x44b   : > { %608 = vrot.lane.b32.xlu1 %v1822_v57, %s1717_s27  ;;  %s278_s27 = scalar_lea.vmem %s2036_s7, %s1632_s26 }
 0x44f   : > { %604 = vrot.lane.b32.xlu1 %v1822_v57, %s1716_s23 }
 0x4b7   : > { %v523_v38 = vpop.xlane.xlu0 %522 }
 0x4bb   : > { %v526_v39 = vpop.xlane.xlu1 %525  ;;  %v536_v40 = vpop.permute.xlu0 %535 }
 0x4bc   : > { %1536 = vmatprep.subr.bf16.mxu0 %v536_v40  ;;  %1664 = vrcp.f32 %v526_v39 }
 0x4bd   : > { %1537 = vmatpush3.bf16.msra.mxu0 %v536_v40  ;;  %1666 = vrcp.f32 %v523_v38 }
 0x4bf   : > { %v520_v41 = vpop.xlane.xlu1 %519  ;;  %v603_v53 = vpop.permute.xlu0 %602 }
 0x4c0   : > { %1668 = vrcp.f32 %v520_v41 }
 0x4c3   : > { %v538_v42 = vpop.permute.xlu1 %537 }
 0x4c4   : > { %v548_v43 = vsel %vm546_vm8, %v538_v42, 0  ;;  %1618 = vmatprep.subr.msk.bf16.mxu0 %vm546_vm8, %v538_v42 }
 0x4c5   : > { %1539 = vmatpush3.bf16.msra.mxu0 %v548_v43 }
 0x4c6   : > { %v1665_v44 = vpop.eup %1664 }
 0x4c7   : > { %v607_v45 = vpop.permute.xlu1 %606  ;;  %v1667_v46 = vpop.eup %1666  ;;  %v532_v48 = vmul.f32 %v1665_v44, %v1661_v34 }
 0x4c8   : > { %1619 = vmatprep.subr.msk.bf16.mxu0 %vm431_vm2, %v607_v45  ;;  %v531_v50 = vmul.f32 %v1667_v46, %v1659_v32  ;;  %v617_v54 = vsel %vm431_vm2, %v607_v45, 0 }
 0x4c9   : > { %v534_v52 = vpack.c.bf16 %v532_v48, %v532_v48  ;;  %v773_v48 = vld [vmem:[%s2034_s5 + $0x8] sm:$0xff] }
 0x4ca   : > { %v1669_v47 = vpop.eup %1668 }
 0x4cb   : > { %v530_v49 = vmul.f32 %v1669_v47, %v1663_v36  ;;  %v609_v55 = vpop.permute.xlu1 %608 }
 0x4cc   : > { %v620_v56 = vsel %vm431_vm2, %v609_v55, 0 }
 0x4cd   : > { %v533_v51 = vpack.c.bf16 %v531_v50, %v530_v49  ;;  %v776_v50 = vpack.c.bf16 %v773_v48, %v773_v48 }
 0x4cf   : > { %1540 = vmatprep.mubr.msk.bf16.mxu0 %vm498_vm4, %v533_v51  ;;  %v605_v58 = vpop.permute.xlu1 %604 }
 0x4d0   : > { %1541 = vmatmul.mubr.msk.bf16.vlgmr.msra.gmra.mrb[4].mxu0 %vm498_vm4, %v534_v52 }
 0x4d1   : > { %1545 = vmatpush3.bf16.xpose.msra.mxu0 %v617_v54  ;;  %1548 = vmatprep.mubr.msk.bf16.mxu0 %vm431_vm2, %v603_v53 }
 0x4d2   : > { %1620 = vmatprep.subr.msk.bf16.mxu0 %vm431_vm2, %v609_v55 }
 0x4d9   : > { %1547 = vmatpush3.bf16.xpose.msra.mxu0 %v620_v56 }
 0x4da   : > { %1623 = vmatprep.subr.msk.bf16.mxu0 %vm783_vm9, %v601_v60 }
 0x4e0   : > { %1549 = vmatmul.mubr.msk.bf16.vlgmr.msra.gmra.mrb[8].mxu0 %vm431_vm2, %v605_v58 }
 0x4e1   : > { %1567 = vmatpush3.bf16.msra.mxu0 %v842_v62  ;;  %v785_v62 = vsel %vm783_vm9, %v776_v50, 0 }
 0x5a3   : > { %v1542_v63 = vpop.f32.mrb[4].mxu0 }
 0x5a4   : > { %v584_v3 = vpop.f32.mrb[5].mxu0  ;;  %v600_v10 = vpack.c.bf16 %v1542_v63, %v1542_v63 }
 0x5a5   : > { %v1543_v4 = vpop.f32.mrb[6].mxu0 }
 0x5a6   : > { %v587_v5 = vpop.f32.mrb[7].mxu0 }
 0x5a7   : > { %v599_v9 = vpack.c.bf16 %v587_v5, %v584_v3 }
 0x5a9   : > { %1568 = vmatprep.mubr.msk.bf16.mxu0 %vm431_vm2, %v599_v9 }
 0x5aa   : > { %1569 = vmatmul.mubr.msk.bf16.vlgmr.msra.gmra.mrb[12].mxu0 %vm431_vm2, %v600_v10 }
 0x5b3   : > { %v1550_v12 = vpop.f32.mrb[8].mxu0 }
 0x5b4   : > { %v656_v13 = vpop.f32.mrb[9].mxu0  ;;  %v672_v14 = vmul.f32 0.35355338, %v1550_v12 }
 0x5b5   : > { %v670_v15 = vmul.f32 0.35355338, %v656_v13  ;;  %v1551_v16 = vpop.f32.mrb[10].mxu0 }
 0x5b6   : > { %v659_v17 = vpop.f32.mrb[11].mxu0  ;;  %v675_v22 = vsel %vm422_vm6, %v672_v14, -1e+30 }
 0x5b7   : > { %v671_v18 = vmul.f32 0.35355338, %v659_v17  ;;  %v673_v19 = vsel %vm420_vm3, %v670_v15, -1e+30  ;;  %v682_v24 = vsel %vm505_vm7, %v675_v22, -inf }
 0x5b8   : > { %v676_v20 = vsel %vm498_vm4, %v673_v19, -inf }
 0x5b9   : > { %677 = vmax.xlane.f32.xlu0 %v676_v20  ;;  %v674_v21 = vsel %vm421_vm5, %v671_v18, -1e+30 }
 0x5ba   : > { %v679_v23 = vsel %vm498_vm4, %v674_v21, -inf }
 0x5bb   : > { %680 = vmax.xlane.f32.xlu1 %v679_v23 }
 0x5bd   : > { %683 = vmax.xlane.f32.xlu0 %v682_v24 }
 0x646   : > { %v678_v25 = vpop.xlane.xlu0 %677 }
 0x647   : > { %v685_v26 = vsub.f32 %v673_v19, %v678_v25 }
 0x648   : > { %v681_v27 = vpop.xlane.xlu1 %680 }
 0x649   : > { %v688_v28 = vmul.f32 1.442695, %v685_v26  ;;  %v686_v29 = vsub.f32 %v674_v21, %v681_v27 }
 0x64a   : > { %v684_v30 = vpop.xlane.xlu0 %683 }
 0x64b   : > { %1670 = vpow2.f32 %v688_v28  ;;  %v690_v31 = vmul.f32 1.442695, %v686_v29  ;;  %v687_v32 = vsub.f32 %v675_v22, %v684_v30 }
 0x64d   : > { %1672 = vpow2.f32 %v690_v31  ;;  %v692_v33 = vmul.f32 1.442695, %v687_v32 }
 0x64f   : > { %1674 = vpow2.f32 %v692_v33 }
 0x655   : > { %v1671_v34 = vpop.eup %1670 }
 0x656   : > { %v694_v35 = vsel %vm498_vm4, %v1671_v34, 0.0 }
 0x657   : > { %v1673_v36 = vpop.eup %1672  ;;  %695 = vadd.xlane.f32.xlu0 %v694_v35 }
 0x658   : > { %v697_v39 = vsel %vm498_vm4, %v1673_v36, 0.0 }
 0x659   : > { %v1675_v37 = vpop.eup %1674 }
 0x65a   : > { %v700_v38 = vsel %vm505_vm7, %v1675_v37, 0.0 }
 0x65b   : > { %701 = vadd.xlane.f32.xlu1 %v700_v38  ;;  %698 = vadd.xlane.f32.xlu0 %v697_v39 }
 0x66c   : > { %713 = vrot.lane.b32.xlu1 %v1822_v57, %s1718_s30 }
 0x670   : > { %896 = vrot.lane.b32.xlu1 %v1825_v61, %s1719_s8 }
 0x671   : > { %711 = vrot.lane.b32.xlu0 %v1825_v61, %s1718_s30 }
 0x674   : > { %898 = vrot.lane.b32.xlu1 %v1822_v57, %s1719_s8 }
 0x675   : > { %892 = vrot.lane.b32.xlu0 %v1825_v61, %s1720_s9 }
 0x678   : > { %894 = vrot.lane.b32.xlu1 %v1822_v57, %s1720_s9 }
 0x679   : > { %1131 = vrot.lane.b32.xlu0 %v1825_v61, %s1721_s10 }
 0x67c   : > { %1133 = vrot.lane.b32.xlu1 %v1822_v57, %s1721_s10 }
 0x67d   : > { %1127 = vrot.lane.b32.xlu0 %v1825_v61, %s1722_s11  ;;  %v1914_v40 = vpop.f32.mrb[12].mxu0 }
 0x67e   : > { %v1916_v41 = vpop.f32.mrb[13].mxu0 }
 0x67f   : > { %v1571_v42 = vpop.f32.mrb[14].mxu0 }
 0x680   : > { %1129 = vrot.lane.b32.xlu1 %v1822_v57, %s1722_s11  ;;  %v1919_v43 = vpop.f32.mrb[15].mxu0 }
 0x6e4   : > { %v696_v44 = vpop.xlane.xlu0 %695 }
 0x6e5   : > { %1676 = vrcp.f32 %v696_v44 }
 0x6e8   : > { %v699_v45 = vpop.xlane.xlu0 %698  ;;  %v702_v46 = vpop.xlane.xlu1 %701 }
 0x6e9   : > { %1678 = vrcp.f32 %v699_v45 }
 0x6ea   : > { %1680 = vrcp.f32 %v702_v46 }
 0x6ec   : > { %v712_v47 = vpop.permute.xlu0 %711  ;;  %v714_v49 = vpop.permute.xlu1 %713 }
 0x6ed   : > { %1552 = vmatprep.subr.bf16.mxu1 %v712_v47  ;;  %v723_v52 = vsel %vm546_vm8, %v714_v49, 0 }
 0x6ee   : > { %1553 = vmatpush3.bf16.msra.mxu1 %v712_v47 }
 0x6ef   : > { %1621 = vmatprep.subr.msk.bf16.mxu1 %vm546_vm8, %v714_v49  ;;  %v1677_v51 = vpop.eup %1676 }
 0x6f0   : > { %v706_v55 = vmul.f32 %v1677_v51, %v1671_v34  ;;  %v897_v63 = vpop.permute.xlu1 %896  ;;  %v893_v13 = vpop.permute.xlu0 %892 }
 0x6f1   : > { %v907_v14 = vsel %vm431_vm2, %v897_v63, 0 }
 0x6f2   : > { %1555 = vmatpush3.bf16.msra.mxu1 %v723_v52 }
 0x6f3   : > { %v1679_v53 = vpop.eup %1678  ;;  %1622 = vmatprep.subr.msk.bf16.mxu1 %vm783_vm9, %v776_v50 }
 0x6f4   : > { %v1681_v54 = vpop.eup %1680  ;;  %v707_v56 = vmul.f32 %v1679_v53, %v1673_v36  ;;  %v899_v15 = vpop.permute.xlu1 %898 }
 0x6f5   : > { %v708_v58 = vmul.f32 %v1681_v54, %v1675_v37  ;;  %v910_v16 = vsel %vm431_vm2, %v899_v15, 0  ;;  %v1132_v17 = vpop.permute.xlu0 %1131 }
 0x6f6   : > { %v709_v59 = vpack.c.bf16 %v707_v56, %v706_v55  ;;  %v1142_v19 = vsel %vm431_vm2, %v1132_v17, 0 }
 0x6f7   : > { %v710_v60 = vpack.c.bf16 %v708_v58, %v708_v58 }
 0x6f8   : > { %1556 = vmatprep.mubr.msk.bf16.mxu1 %vm498_vm4, %v709_v59  ;;  %v895_v18 = vpop.permute.xlu1 %894 }
 0x6f9   : > { %1557 = vmatmul.mubr.msk.bf16.vlgmr.msra.gmra.mrb[4].mxu1 %vm498_vm4, %v710_v60  ;;  %v1128_v20 = vpop.permute.xlu0 %1127 }
 0x6fa   : > { %1561 = vmatpush3.bf16.msra.mxu1 %v785_v62 }
 0x6fb   : > { %1624 = vmatprep.subr.msk.bf16.mxu1 %vm431_vm2, %v897_v63 }
 0x6fc   : > { %v1134_v21 = vpop.permute.xlu1 %1133 }
 0x6fd   : > { %v1145_v22 = vsel %vm431_vm2, %v1134_v21, 0 }
 0x700   : > { %v1130_v23 = vpop.permute.xlu1 %1129 }
 0x7cc   : > { %v1558_v3 = vpop.f32.mrb[4].mxu1 }
 0x7cd   : > { %v759_v4 = vpop.f32.mrb[5].mxu1  ;;  %v775_v12 = vpack.c.bf16 %v1558_v3, %v1558_v3 }
 0x7ce   : > { %v1559_v5 = vpop.f32.mrb[6].mxu1 }
 0x7cf   : > { %v762_v9 = vpop.f32.mrb[7].mxu1 }
 0x7d0   : > { %v774_v10 = vpack.c.bf16 %v762_v9, %v759_v4 }
 0x7d2   : > { %1562 = vmatprep.mubr.msk.bf16.mxu1 %vm431_vm2, %v774_v10 }
 0x7d3   : > { %1563 = vmatmul.mubr.msk.bf16.vlgmr.msra.gmra.mrb[8].mxu1 %vm431_vm2, %v775_v12 }
 0x7d4   : > { %1573 = vmatpush3.bf16.xpose.msra.mxu1 %v907_v14  ;;  %1576 = vmatprep.mubr.msk.bf16.mxu1 %vm431_vm2, %v893_v13 }
 0x7d5   : > { %1625 = vmatprep.subr.msk.bf16.mxu1 %vm431_vm2, %v899_v15 }
 0x7dc   : > { %1575 = vmatpush3.bf16.xpose.msra.mxu1 %v910_v16 }
 0x7dd   : > { %1628 = vmatprep.subr.msk.bf16.mxu1 %vm431_vm2, %v1132_v17 }
 0x7e3   : > { %1577 = vmatmul.mubr.msk.bf16.vlgmr.msra.gmra.mrb[12].mxu1 %vm431_vm2, %v895_v18 }
 0x7e4   : > { %1595 = vmatpush3.bf16.xpose.msra.mxu1 %v1142_v19  ;;  %1598 = vmatprep.mubr.msk.bf16.mxu1 %vm431_vm2, %v1128_v20 }
 0x7e5   : > { %1629 = vmatprep.subr.msk.bf16.mxu1 %vm431_vm2, %v1134_v21 }
 0x7ec   : > { %1597 = vmatpush3.bf16.xpose.msra.mxu1 %v1145_v22 }
 0x7f3   : > { %1599 = vmatmul.mubr.msk.bf16.vlgmr.msra.gmra.mrb[16].mxu1 %vm431_vm2, %v1130_v23 }
 0x8a6   : > { %v1564_v24 = vpop.f32.mrb[8].mxu1 }
 0x8a7   : > { %v1945_v25 = vadd.f32 %v1914_v40, %v1564_v24  ;;  %v821_v26 = vpop.f32.mrb[9].mxu1 }
 0x8a8   : > { %v1948_v27 = vadd.f32 %v1916_v41, %v821_v26  ;;  %v1565_v28 = vpop.f32.mrb[10].mxu1 }
 0x8a9   : > { %v824_v29 = vpop.f32.mrb[11].mxu1 }
 0x8aa   : > { %v1951_v30 = vadd.f32 %v1919_v43, %v824_v29 }
 0x8b6   : > { %v1578_v31 = vpop.f32.mrb[12].mxu1 }
 0x8b7   : > { %v946_v32 = vpop.f32.mrb[13].mxu1  ;;  %v962_v33 = vmul.f32 0.35355338, %v1578_v31 }
 0x8b8   : > { %v960_v34 = vmul.f32 0.35355338, %v946_v32  ;;  %v1579_v35 = vpop.f32.mrb[14].mxu1 }
 0x8b9   : > { %v949_v36 = vpop.f32.mrb[15].mxu1  ;;  %v965_v41 = vsel %vm422_vm6, %v962_v33, -1e+30 }
 0x8ba   : > { %v961_v37 = vmul.f32 0.35355338, %v949_v36  ;;  %v963_v38 = vsel %vm420_vm3, %v960_v34, -1e+30  ;;  %v972_v43 = vsel %vm505_vm7, %v965_v41, -inf }
 0x8bb   : > { %v966_v39 = vsel %vm498_vm4, %v963_v38, -inf }
 0x8bc   : > { %967 = vmax.xlane.f32.xlu0 %v966_v39  ;;  %v964_v40 = vsel %vm421_vm5, %v961_v37, -1e+30 }
 0x8bd   : > { %v969_v42 = vsel %vm498_vm4, %v964_v40, -inf }
 0x8be   : > { %970 = vmax.xlane.f32.xlu1 %v969_v42 }
 0x8c0   : > { %973 = vmax.xlane.f32.xlu0 %v972_v43 }
 0x8c6   : > { %v1600_v44 = vpop.f32.mrb[16].mxu1 }
 0x8c7   : > { %v1181_v45 = vpop.f32.mrb[17].mxu1  ;;  %v1197_v9 = vmul.f32 0.35355338, %v1600_v44 }
 0x8c8   : > { %v1601_v46 = vpop.f32.mrb[18].mxu1  ;;  %v1195_v4 = vmul.f32 0.35355338, %v1181_v45  ;;  %v1063_v45 = vld [vmem:[%s2034_s5 + $0x10] sm:$0xff] }
 0x8c9   : > { %v1184_v47 = vpop.f32.mrb[19].mxu1  ;;  %v1200_v15 = vsel %vm422_vm6, %v1197_v9, -1e+30  ;;  %v1066_v46 = vpack.c.bf16 %v1063_v45, %v1063_v45 }
 0x8ca   : > { %v1196_v5 = vmul.f32 0.35355338, %v1184_v47  ;;  %v1198_v10 = vsel %vm420_vm3, %v1195_v4, -1e+30  ;;  %v1207_v16 = vsel %vm505_vm7, %v1200_v15, -inf }
 0x8cb   : > { %v1201_v13 = vsel %vm498_vm4, %v1198_v10, -inf  ;;  %v1074_v47 = vsel %vm783_vm9, %v1066_v46, 0 }
 0x8cc   : > { %v1199_v12 = vsel %vm421_vm5, %v1196_v5, -1e+30 }
 0x8cd   : > { %v1204_v14 = vsel %vm498_vm4, %v1199_v12, -inf }
 0x949   : > { %v968_v48 = vpop.xlane.xlu0 %967 }
 0x94a   : > { %v975_v49 = vsub.f32 %v963_v38, %v968_v48 }
 0x94b   : > { %v971_v50 = vpop.xlane.xlu1 %970 }
 0x94c   : > { %v978_v51 = vmul.f32 1.442695, %v975_v49  ;;  %v976_v52 = vsub.f32 %v964_v40, %v971_v50 }
 0x94d   : > { %v974_v53 = vpop.xlane.xlu0 %973 }
 0x94e   : > { %1682 = vpow2.f32 %v978_v51  ;;  %v980_v54 = vmul.f32 1.442695, %v976_v52  ;;  %v977_v55 = vsub.f32 %v965_v41, %v974_v53 }
 0x950   : > { %1684 = vpow2.f32 %v980_v54  ;;  %v982_v56 = vmul.f32 1.442695, %v977_v55 }
 0x952   : > { %1686 = vpow2.f32 %v982_v56 }
 0x958   : > { %v1683_v58 = vpop.eup %1682 }
 0x959   : > { %v984_v59 = vsel %vm498_vm4, %v1683_v58, 0.0 }
 0x95a   : > { %v1685_v60 = vpop.eup %1684  ;;  %985 = vadd.xlane.f32.xlu0 %v984_v59 }
 0x95b   : > { %v987_v3 = vsel %vm498_vm4, %v1685_v60, 0.0 }
 0x95c   : > { %v1687_v62 = vpop.eup %1686 }
 0x95d   : > { %v990_v63 = vsel %vm505_vm7, %v1687_v62, 0.0 }
 0x95e   : > { %991 = vadd.xlane.f32.xlu1 %v990_v63  ;;  %988 = vadd.xlane.f32.xlu0 %v987_v3 }
 0x96f   : > { %1003 = vrot.lane.b32.xlu1 %v1822_v57, %s1723_s14 }
 0x974   : > { %1001 = vrot.lane.b32.xlu0 %v1825_v61, %s1723_s14 }
 0x993   : > { %1202 = vmax.xlane.f32.xlu1 %v1201_v13  ;;  %1205 = vmax.xlane.f32.xlu0 %v1204_v14 }
 0x997   : > { %1208 = vmax.xlane.f32.xlu0 %v1207_v16 }
 0x9e7   : > { %v986_v17 = vpop.xlane.xlu0 %985 }
 0x9e8   : > { %1688 = vrcp.f32 %v986_v17 }
 0x9eb   : > { %v989_v6 = vpop.xlane.xlu0 %988  ;;  %v992_v18 = vpop.xlane.xlu1 %991 }
 0x9ec   : > { %1690 = vrcp.f32 %v989_v6 }
 0x9ed   : > { %1692 = vrcp.f32 %v992_v18 }
 0x9ef   : > { %v1002_v8 = vpop.permute.xlu0 %1001  ;;  %v1004_v19 = vpop.permute.xlu1 %1003 }
 0x9f0   : > { %1580 = vmatprep.subr.bf16.mxu0 %v1002_v8  ;;  %v1013_v21 = vsel %vm546_vm8, %v1004_v19, 0 }
 0x9f1   : > { %1581 = vmatpush3.bf16.msra.mxu0 %v1002_v8 }
 0x9f2   : > { %1626 = vmatprep.subr.msk.bf16.mxu0 %vm546_vm8, %v1004_v19  ;;  %v1689_v20 = vpop.eup %1688 }
 0x9f3   : > { %v996_v22 = vmul.f32 %v1689_v20, %v1683_v58 }
 0x9f5   : > { %1583 = vmatpush3.bf16.msra.mxu0 %v1013_v21 }
 0x9f6   : > { %v1691_v7 = vpop.eup %1690  ;;  %1627 = vmatprep.subr.msk.bf16.mxu0 %vm783_vm9, %v1066_v46 }
 0x9f7   : > { %v1693_v11 = vpop.eup %1692  ;;  %v997_v23 = vmul.f32 %v1691_v7, %v1685_v60 }
 0x9f8   : > { %v998_v24 = vmul.f32 %v1693_v11, %v1687_v62 }
 0x9f9   : > { %v999_v26 = vpack.c.bf16 %v997_v23, %v996_v22 }
 0x9fa   : > { %v1000_v28 = vpack.c.bf16 %v998_v24, %v998_v24 }
 0x9fb   : > { %1584 = vmatprep.mubr.msk.bf16.mxu0 %vm498_vm4, %v999_v26 }
 0x9fc   : > { %1585 = vmatmul.mubr.msk.bf16.vlgmr.msra.gmra.mrb[16].mxu0 %vm498_vm4, %v1000_v28 }
 0x9fd   : > { %1589 = vmatpush3.bf16.msra.mxu0 %v1074_v47 }
 0xa20   : > { %v1206_v29 = vpop.xlane.xlu0 %1205  ;;  %v1203_v31 = vpop.xlane.xlu1 %1202 }
 0xa21   : > { %v1211_v32 = vsub.f32 %v1199_v12, %v1206_v29  ;;  %v1210_v34 = vsub.f32 %v1198_v10, %v1203_v31  ;;  %v1298_v10 = vld [vmem:[%s2034_s5 + $0x18] sm:$0xff] }
 0xa22   : > { %v1301_v12 = vpack.c.bf16 %v1298_v10, %v1298_v10 }
 0xa23   : > { %v1215_v33 = vmul.f32 1.442695, %v1211_v32  ;;  %v1213_v37 = vmul.f32 1.442695, %v1210_v34 }
 0xa24   : > { %v1209_v35 = vpop.xlane.xlu0 %1208  ;;  %v1309_v13 = vsel %vm783_vm9, %v1301_v12, 0 }
 0xa25   : > { %1694 = vpow2.f32 %v1215_v33  ;;  %v1212_v36 = vsub.f32 %v1200_v15, %v1209_v35 }
 0xa27   : > { %v1217_v38 = vmul.f32 1.442695, %v1212_v36 }
 0xa29   : > { %1696 = vpow2.f32 %v1217_v38 }
 0xa2a   : > { %1698 = vpow2.f32 %v1213_v37 }
 0xa2f   : > { %v1695_v39 = vpop.eup %1694 }
 0xa30   : > { %v1222_v40 = vsel %vm498_vm4, %v1695_v39, 0.0 }
 0xa31   : > { %1223 = vadd.xlane.f32.xlu0 %v1222_v40 }
 0xa33   : > { %v1697_v41 = vpop.eup %1696 }
 0xa34   : > { %v1225_v42 = vsel %vm505_vm7, %v1697_v41, 0.0  ;;  %v1699_v43 = vpop.eup %1698 }
 0xa35   : > { %1226 = vadd.xlane.f32.xlu1 %v1225_v42  ;;  %v1219_v44 = vsel %vm498_vm4, %v1699_v43, 0.0 }
 0xa39   : > { %1220 = vadd.xlane.f32.xlu1 %v1219_v44 }
 0xa47   : > { %1236 = vrot.lane.b32.xlu0 %v1825_v61, %s1724_s17 }
 0xa4a   : > { %1238 = vrot.lane.b32.xlu1 %v1822_v57, %s1724_s17 }
 0xabe   : > { %v1224_v48 = vpop.xlane.xlu0 %1223 }
 0xabf   : > { %1700 = vrcp.f32 %v1224_v48 }
 0xac2   : > { %v1237_v49 = vpop.permute.xlu0 %1236  ;;  %v1227_v50 = vpop.xlane.xlu1 %1226 }
 0xac3   : > { %1602 = vmatprep.subr.bf16.mxu0 %v1237_v49 }
 0xac6   : > { %v1221_v51 = vpop.xlane.xlu1 %1220 }
 0xac7   : > { %1702 = vrcp.f32 %v1221_v51 }
 0xac8   : > { %1704 = vrcp.f32 %v1227_v50 }
 0xac9   : > { %v1701_v52 = vpop.eup %1700 }
 0xaca   : > { %v1232_v60 = vmul.f32 %v1701_v52, %v1695_v39  ;;  %v1239_v3 = vpop.permute.xlu1 %1238 }
 0xacb   : > { %v1248_v5 = vsel %vm546_vm8, %v1239_v3, 0 }
 0xacf   : > { %v1586_v53 = vpop.f32.mrb[16].mxu0 }
 0xad0   : > { %v1049_v54 = vpop.f32.mrb[17].mxu0  ;;  %v1065_v61 = vpack.c.bf16 %v1586_v53, %v1586_v53 }
 0xad1   : > { %v1703_v55 = vpop.eup %1702  ;;  %v1587_v56 = vpop.f32.mrb[18].mxu0 }
 0xad2   : > { %v1052_v58 = vpop.f32.mrb[19].mxu0  ;;  %v1231_v59 = vmul.f32 %v1703_v55, %v1699_v43  ;;  %v1705_v57 = vpop.eup %1704 }
 0xad3   : > { %v1064_v62 = vpack.c.bf16 %v1052_v58, %v1049_v54  ;;  %v1233_v4 = vmul.f32 %v1705_v57, %v1697_v41 }
 0xad4   : > { %v1234_v63 = vpack.c.bf16 %v1232_v60, %v1231_v59 }
 0xad5   : > { %1590 = vmatprep.mubr.msk.bf16.mxu0 %vm431_vm2, %v1064_v62  ;;  %v1235_v9 = vpack.c.bf16 %v1233_v4, %v1233_v4 }
 0xad6   : > { %1591 = vmatmul.mubr.msk.bf16.vlgmr.msra.gmra.mrb[20].mxu0 %vm431_vm2, %v1065_v61 }
 0xad7   : > { %1603 = vmatpush3.bf16.msra.mxu0 %v1237_v49  ;;  %1606 = vmatprep.mubr.msk.bf16.mxu0 %vm498_vm4, %v1234_v63 }
 0xad8   : > { %1630 = vmatprep.subr.msk.bf16.mxu0 %vm546_vm8, %v1239_v3 }
 0xadb   : > { %1605 = vmatpush3.bf16.msra.mxu0 %v1248_v5 }
 0xadc   : > { %1631 = vmatprep.subr.msk.bf16.mxu0 %vm783_vm9, %v1301_v12 }
 0xade   : > { %1607 = vmatmul.mubr.msk.bf16.vlgmr.msra.gmra.mrb[24].mxu0 %vm498_vm4, %v1235_v9 }
 0xadf   : > { %1611 = vmatpush3.bf16.msra.mxu0 %v1309_v13 }
 0xba9   : > { %v1592_v14 = vpop.f32.mrb[20].mxu0 }
 0xbaa   : > { %v1126_v15 = vadd.f32 %v1592_v14, %v1945_v25  ;;  %v1110_v16 = vpop.f32.mrb[21].mxu0 }
 0xbab   : > { %v1124_v17 = vadd.f32 %v1110_v16, %v1948_v27  ;;  %v1593_v6 = vpop.f32.mrb[22].mxu0  ;;  %v1469_v27 = vld [vmem:[%s2035_s6] ss:$0 sm:$0xff] }
 0xbac   : > { %v1113_v18 = vpop.f32.mrb[23].mxu0 }
 0xbad   : > { %v1125_v8 = vadd.f32 %v1113_v18, %v1951_v30 }
 0xbb1   : > { %v1608_v19 = vpop.f32.mrb[24].mxu0 }
 0xbb2   : > { %v1284_v20 = vpop.f32.mrb[25].mxu0  ;;  %v1300_v22 = vpack.c.bf16 %v1608_v19, %v1608_v19 }
 0xbb3   : > { %v1609_v21 = vpop.f32.mrb[26].mxu0 }
 0xbb4   : > { %v1287_v7 = vpop.f32.mrb[27].mxu0 }
 0xbb5   : > { %v1299_v11 = vpack.c.bf16 %v1287_v7, %v1284_v20 }
 0xbb7   : > { %1612 = vmatprep.mubr.msk.bf16.mxu0 %vm431_vm2, %v1299_v11 }
 0xbb8   : > { %1613 = vmatmul.mubr.msk.bf16.vlgmr.msra.gmra.mrb[28].mxu0 %vm431_vm2, %v1300_v22 }
 0xc8b   : > { %v1614_v23 = vpop.f32.mrb[28].mxu0 }
 0xc8c   : > { %v1361_v25 = vadd.f32 %v1614_v23, %v1126_v15  ;;  %v1345_v24 = vpop.f32.mrb[29].mxu0 }
 0xc8d   : > { %v1359_v26 = vadd.f32 %v1345_v24, %v1124_v17  ;;  %v1615_v30 = vpop.f32.mrb[30].mxu0 }
 0xc8e   : > { %v1364_v28 = vadd.f32 %v1361_v25, %v1783_v1  ;;  %v1348_v29 = vpop.f32.mrb[31].mxu0 }
 0xc8f   : > { %v1362_v31 = vadd.f32 %v1359_v26, %v1781_v0  ;;  %v1360_v32 = vadd.f32 %v1348_v29, %v1125_v8 }
 0xc90   : > { %v1374_v33 = vadd.f32 %v1469_v27, %v1364_v28 }
 0xc91   : > { %v1372_v34 = vadd.f32 %v1469_v27, %v1362_v31  ;;  %v1363_v35 = vadd.f32 %v1360_v32, %v1785_v2 }
 0xc92   : > { %1377 = vst.msk [vmem:[%s278_s27 + $0x10] sm:$0x3] %vm292_vm1, %v1374_v33 }
 0xc93   : > { %1375 = vst.msk [vmem:[%s278_s27] sm:$0xff] %vm285_vm0, %v1372_v34  ;;  %v1373_v36 = vadd.f32 %v1469_v27, %v1363_v35 }
 0xc95   : > { %1376 = vst.msk [vmem:[%s278_s27 + $0x8] sm:$0xff] %vm285_vm0, %v1373_v36 }
 0xc96 PF: > { %s17_s24 = sadd.s32 1, %s1712_s24  }
 0xc97   : > { %p14_p4 = scmp.ge.s32.totalorder %s17_s24, 4  }
 0xc99   :  { %16 = sbr.rel (!%p14_p4) target bundleno = 1 (0x1), region = 78 }

// kernel: decoder_forward.8
= control target key start
LH: loop header
LB: loop body
LE: loop exit
PB: predicated region body
PF: predicated region fallthrough
CT: control target
= control target key end

     0   :  { %s1985_s21 = smov 0   ;;  %s2222_s0 = inlined_call_operand.vmem [shape: f32[2,18,32], index: 0, kind: input, shape index: {}]   ;;  %s2223_s1 = inlined_call_operand.vmem [shape: f32[2,16,32], index: 1, kind: input, shape index: {}]   ;;  %s2224_s2 = inlined_call_operand.vmem [shape: f32[1,32], index: 2, kind: input, shape index: {}]   ;;  %s2225_s3 = inlined_call_operand.vmem [shape: f32[1,32], index: 3, kind: input, shape index: {}]   ;;  %s2226_s4 = inlined_call_operand.vmem [shape: f32[1,32], index: 4, kind: input, shape index: {}]   ;;  %s2227_s5 = inlined_call_operand.vmem [shape: f32[1,32], index: 5, kind: input, shape index: {}]   ;;  %s2228_s6 = inlined_call_operand.vmem [shape: f32[32,64], index: 6, kind: input, shape index: {}]   ;;  %s2229_s7 = inlined_call_operand.vmem [shape: f32[1,64], index: 7, kind: input, shape index: {}]   ;;  %s2230_s8 = inlined_call_operand.vmem [shape: f32[32,32], index: 8, kind: input, shape index: {}]   ;;  %s2231_s9 = inlined_call_operand.vmem [shape: f32[1,32], index: 9, kind: input, shape index: {}]   ;;  %s2232_s10 = inlined_call_operand.vmem [shape: f32[32,32], index: 10, kind: input, shape index: {}]   ;;  %s2233_s11 = inlined_call_operand.vmem [shape: f32[1,32], index: 11, kind: input, shape index: {}]   ;;  %s2234_s12 = inlined_call_operand.vmem [shape: f32[2,18,32], index: 12, kind: output, shape index: {}]  }
   0x1 LB: > { %s1642_s22 = sadd.s32 4294967295, %s1909_s21   ;;  %p1646_p0 = scmp.ge.s32.totalorder %s1909_s21, 1  ;;  %s1909_s21 = sphi %s1985_s21, %s22_s21  }
   0x2   : > { %p372_p1 = scmp.lt.s32.totalorder %s1909_s21, 3 }
   0x4   : > { %p373_p2 = pnand %p1646_p0, %p372_p1 }
   0x5   : > { %p419_p3 = scmp.lt.s32.totalorder (!%p373_p2), %s1642_s22, 1  ;;  %vm442_vm0 = vcmask (!%p373_p2), 261120   ;;  %vm449_vm1 = vcmask (!%p373_p2), 254976   ;;  %v546_v35 = vld [vmem:[%s2228_s6] sm:$0xff] (!%p373_p2)  ;;  %v547_v36 = vld [vmem:[%s2228_s6 + $0x8] sm:$0xff] (!%p373_p2)  ;;  %v548_v38 = vld [vmem:[%s2228_s6 + $0x10] sm:$0xff] (!%p373_p2) }
   0x6   : > { %376 = sbr.rel (%p373_p2) target bundleno = 2965 (0xb95), region = 68  ;;  %v552_v37 = vpack.c.bf16 (!%p373_p2), %v547_v36, %v546_v35  ;;  %v549_v39 = vld [vmem:[%s2228_s6 + $0x18] sm:$0xff] (!%p373_p2)  ;;  %v604_v40 = vld [vmem:[%s2230_s8] sm:$0xff] (!%p373_p2)  ;;  %v1911_v41 = vmov (!%p373_p2), 0.0   ;;  %v605_v42 = vld [vmem:[%s2230_s8 + $0x8] sm:$0xff] (!%p373_p2)  ;;  %vm1912_vm2 = vmmov (!%p373_p2), 0  }
   0x7   : > { %1731 = vmatprep.subr.bf16.mxu0 (!%p373_p2), %v1911_v41  ;;  %1735 = vmatprep.mubr.msk.bf16.mxu0 (!%p373_p2), %vm1912_vm2, %v1911_v41  ;;  %v553_v43 = vpack.c.bf16 (!%p373_p2), %v549_v39, %v548_v38  ;;  %v611_v44 = vpack.c.bf16 (!%p373_p2), %v605_v42, %v604_v40  ;;  %v606_v45 = vld [vmem:[%s2230_s8 + $0x10] sm:$0xff] (!%p373_p2)  ;;  %v607_v46 = vld [vmem:[%s2230_s8 + $0x18] sm:$0xff] (!%p373_p2)  ;;  %vm676_vm3 = vcmask (!%p373_p2), 64512   ;;  %v1657_v38 = vld [vmem:[%s2231_s9] ss:$0 sm:$0xff] (!%p373_p2)  ;;  %s1913_s29 = smov (!%p373_p2), 120  }
   0x8   : > { %1732 = vmatpush3.bf16.msra.mxu0 (!%p373_p2), %v552_v37  ;;  %v612_v47 = vpack.c.bf16 (!%p373_p2), %v607_v46, %v606_v45  ;;  %vm737_vm4 = vcmask (!%p373_p2), 130048   ;;  %vm744_vm5 = vcmask (!%p373_p2), 123904   ;;  %vm1006_vm6 = vcmask (!%p373_p2), 1043456   ;;  %s1915_s15 = smov (!%p373_p2), 112   ;;  %s1916_s16 = smov (!%p373_p2), 88  }
   0x9   : > { %1733 = vmatprep.subr.bf16.mxu0 (!%p373_p2), %v1911_v41  ;;  %1739 = vmatprep.subr.bf16.mxu1 (!%p373_p2), %v611_v44  ;;  %s1917_s19 = smov (!%p373_p2), 104   ;;  %s1918_s20 = smov (!%p373_p2), 80  }
   0xa   : > { %1740 = vmatpush3.bf16.msra.mxu1 (!%p373_p2), %v611_v44  ;;  %s1919_s26 = smov (!%p373_p2), 72  }
   0xb   : > { %1741 = vmatprep.subr.bf16.mxu1 (!%p373_p2), %v612_v47 }
   0xc   : > { %1734 = vmatpush3.bf16.msra.mxu0 (!%p373_p2), %v553_v43 }
   0xd   : > { %s2236_s22 = smov (!%p419_p3, %s1642_s22), 1 }
   0xe   : > { %s1687_s23 = sshll.u32 %s2236_s22, 4  ;;  %s1827_s24 = smul.u32 24, %s2236_s22  ;;  %1742 = vmatpush3.bf16.msra.mxu1 %v612_v47 }
   0xf   : > { %s428_s27 = scalar_lea.vmem %s2223_s1, %s1687_s23 }
  0x10   : > { %v438_v0 = vld [vmem:[%s428_s27] sm:$0xff]  ;;  %v439_v1 = vld [vmem:[%s428_s27 + $0x8] sm:$0xff]  ;;  %s423_s30 = scalar_lea.vmem %s2222_s0, %s1827_s24 }
  0x11   : > { %v504_v2 = vsel %vm442_vm0, %v438_v0, 0.0  ;;  %v2006_v3 = vld [vmem:[%s423_s30] sm:$0xff]  ;;  %v2008_v4 = vld [vmem:[%s423_s30 + $0x8] sm:$0xff]  ;;  %v507_v6 = vsel %vm442_vm0, %v439_v1, 0.0  ;;  %v2013_v7 = vld [vmem:[%s423_s30 + $0x10] sm:$0x3] }
  0x12   : > { %505 = vadd.xlane.f32.xlu0 %v504_v2  ;;  %v443_v5 = vsel %vm442_vm0, %v2006_v3, 0.0  ;;  %v446_v8 = vsel %vm442_vm0, %v2008_v4, 0.0  ;;  %v450_v9 = vsel %vm449_vm1, %v2013_v7, 0.0  ;;  %s1914_s30 = smov 96  }
  0x13   : > { %444 = vadd.xlane.f32.xlu1 %v443_v5 }
  0x16   : > { %508 = vadd.xlane.f32.xlu0 %v507_v6 }
  0x17   : > { %447 = vadd.xlane.f32.xlu1 %v446_v8 }
  0x1a   : > { %451 = vadd.xlane.f32.xlu0 %v450_v9  ;;  %v1654_v9 = vld [vmem:[%s2227_s5] ss:$0 sm:$0xff] }
  0x9f   : > { %v506_v10 = vpop.xlane.xlu0 %505 }
  0xa0   : > { %v510_v11 = vmul.f32 0.03125, %v506_v10  ;;  %v445_v12 = vpop.xlane.xlu1 %444  ;;  %v1651_v10 = vld [vmem:[%s2224_s2] ss:$0 sm:$0xff] }
  0xa1   : > { %v454_v13 = vmul.f32 0.03125, %v445_v12 }
  0xa2   : > { %v2019_v14 = vsub.f32 %v438_v0, %v510_v11 }
  0xa3   : > { %v509_v15 = vpop.xlane.xlu0 %508  ;;  %v2022_v16 = vsub.f32 %v2006_v3, %v454_v13 }
  0xa4   : > { %v511_v17 = vmul.f32 0.03125, %v509_v15  ;;  %v514_v18 = vmul.f32 %v2019_v14, %v2019_v14  ;;  %v448_v19 = vpop.xlane.xlu1 %447 }
  0xa5   : > { %v455_v20 = vmul.f32 0.03125, %v448_v19  ;;  %v460_v21 = vmul.f32 %v2022_v16, %v2022_v16 }
  0xa6   : > { %v2028_v22 = vsub.f32 %v439_v1, %v511_v17  ;;  %v516_v23 = vsel %vm442_vm0, %v514_v18, 0.0  ;;  %v1653_v1 = vld [vmem:[%s2226_s4] ss:$0 sm:$0xff] }
  0xa7   : > { %v452_v24 = vpop.xlane.xlu0 %451  ;;  %517 = vadd.xlane.f32.xlu1 %v516_v23  ;;  %v2032_v25 = vsub.f32 %v2008_v4, %v455_v20  ;;  %v463_v28 = vsel %vm442_vm0, %v460_v21, 0.0  ;;  %v1652_v20 = vld [vmem:[%s2225_s3] ss:$0 sm:$0xff] }
  0xa8   : > { %v456_v26 = vmul.f32 0.03125, %v452_v24  ;;  %v515_v27 = vmul.f32 %v2028_v22, %v2028_v22 }
  0xa9   : > { %v461_v29 = vmul.f32 %v2032_v25, %v2032_v25 }
  0xaa   : > { %v2040_v30 = vsub.f32 %v2013_v7, %v456_v26  ;;  %v519_v31 = vsel %vm442_vm0, %v515_v27, 0.0 }
  0xab   : > { %520 = vadd.xlane.f32.xlu0 %v519_v31  ;;  %464 = vadd.xlane.f32.xlu1 %v463_v28  ;;  %v466_v33 = vsel %vm442_vm0, %v461_v29, 0.0 }
  0xac   : > { %v462_v32 = vmul.f32 %v2040_v30, %v2040_v30 }
  0xae   : > { %v469_v34 = vsel %vm449_vm1, %v462_v32, 0.0 }
  0xaf   : > { %470 = vadd.xlane.f32.xlu1 %v469_v34  ;;  %467 = vadd.xlane.f32.xlu0 %v466_v33 }
 0x134   : > { %v518_v48 = vpop.xlane.xlu1 %517 }
 0x135   : > { %v522_v49 = vmul.f32 0.03125, %v518_v48 }
 0x137   : > { %v524_v50 = vadd.f32 1e-05, %v522_v49 }
 0x138   : > { %v521_v51 = vpop.xlane.xlu0 %520  ;;  %v465_v52 = vpop.xlane.xlu1 %464 }
 0x139   : > { %1845 = vrsqrt.f32 %v524_v50  ;;  %v523_v53 = vmul.f32 0.03125, %v521_v51  ;;  %v472_v54 = vmul.f32 0.03125, %v465_v52 }
 0x13b   : > { %v525_v55 = vadd.f32 1e-05, %v523_v53  ;;  %v475_v56 = vadd.f32 1e-05, %v472_v54 }
 0x13c   : > { %v468_v57 = vpop.xlane.xlu0 %467  ;;  %v471_v58 = vpop.xlane.xlu1 %470 }
 0x13d   : > { %1847 = vrsqrt.f32 %v525_v55  ;;  %v473_v59 = vmul.f32 0.03125, %v468_v57  ;;  %v474_v60 = vmul.f32 0.03125, %v471_v58 }
 0x13e   : > { %1849 = vrsqrt.f32 %v475_v56 }
 0x13f   : > { %v476_v61 = vadd.f32 1e-05, %v473_v59  ;;  %v477_v62 = vadd.f32 1e-05, %v474_v60 }
 0x141   : > { %1851 = vrsqrt.f32 %v476_v61 }
 0x142   : > { %1853 = vrsqrt.f32 %v477_v62 }
 0x143   : > { %v1846_v63 = vpop.eup %1845 }
 0x144   : > { %v528_v0 = vmul.f32 %v1846_v63, %v2019_v14 }
 0x146   : > { %v536_v8 = vmul.f32 %v1653_v1, %v528_v0 }
 0x147   : > { %v1848_v2 = vpop.eup %1847 }
 0x148   : > { %v1850_v5 = vpop.eup %1849  ;;  %v529_v6 = vmul.f32 %v1848_v2, %v2028_v22  ;;  %v544_v15 = vadd.f32 %v1654_v9, %v536_v8 }
 0x149   : > { %v481_v11 = vmul.f32 %v1850_v5, %v2022_v16 }
 0x14a   : > { %v537_v12 = vmul.f32 %v1653_v1, %v529_v6 }
 0x14b   : > { %v1852_v13 = vpop.eup %1851  ;;  %v490_v19 = vmul.f32 %v1651_v10, %v481_v11 }
 0x14c   : > { %v1854_v14 = vpop.eup %1853  ;;  %v545_v17 = vadd.f32 %v1654_v9, %v537_v12  ;;  %v482_v18 = vmul.f32 %v1852_v13, %v2032_v25  ;;  %v1655_v25 = vld [vmem:[%s2229_s7] ss:$0 sm:$0xff] }
 0x14d   : > { %v483_v21 = vmul.f32 %v1854_v14, %v2040_v30  ;;  %v499_v16 = vadd.f32 %v1652_v20, %v490_v19 }
 0x14e   : > { %v551_v22 = vpack.c.bf16 %v545_v17, %v544_v15  ;;  %v491_v23 = vmul.f32 %v1651_v10, %v482_v18 }
 0x14f   : > { %v492_v24 = vmul.f32 %v1651_v10, %v483_v21 }
 0x150   : > { %1736 = vmatmul.mubr.msk.bf16.vlgmr.msra.gmra.mrb[0].mxu0 %vm442_vm0, %v551_v22  ;;  %v500_v26 = vadd.f32 %v1652_v20, %v491_v23 }
 0x151   : > { %v501_v27 = vadd.f32 %v1652_v20, %v492_v24 }
 0x152   : > { %v609_v28 = vpack.c.bf16 %v500_v26, %v499_v16 }
 0x153   : > { %v610_v29 = vpack.c.bf16 %v501_v27, %v501_v27 }
 0x154   : > { %1743 = vmatprep.mubr.msk.bf16.mxu1 %vm442_vm0, %v609_v28 }
 0x155   : > { %1744 = vmatmul.mubr.msk.bf16.vlgmr.msra.gmra.mrb[0].mxu1 %vm442_vm0, %v610_v29 }
 0x223   : > { %v597_v31 = vpop.f32.mrb[0].mxu0 }
 0x224   : > { %v1737_v30 = vpop.f32.mrb[1].mxu0  ;;  %v598_v33 = vadd.f32 %v1655_v25, %v597_v31 }
 0x225   : > { %v600_v32 = vpop.f32.mrb[2].mxu0 }
 0x226   : > { %v601_v34 = vadd.f32 %v1655_v25, %v600_v32  ;;  %v1738_v35 = vpop.f32.mrb[3].mxu0 }
 0x228   : > { %v2094_v36 = vpack.c.bf16 %v601_v34, %v598_v33  ;;  %v1745_v37 = vpop.f32.mrb[0].mxu1 }
 0x229   : > { %v659_v39 = vpop.f32.mrb[1].mxu1  ;;  %v668_v43 = vadd.f32 %v1745_v37, %v1657_v38 }
 0x22a   : > { %842 = vrot.lane.b32.xlu0 %v2094_v36, %s1913_s29  ;;  %v1746_v40 = vpop.f32.mrb[2].mxu1  ;;  %1819 = vmatprep.subr.msk.bf16.mxu0 %vm676_vm3, %v2094_v36  ;;  %v684_v41 = vsel %vm676_vm3, %v2094_v36, 0  ;;  %v660_v44 = vadd.f32 %v1657_v38, %v659_v39 }
 0x22b   : > { %v662_v42 = vpop.f32.mrb[3].mxu1  ;;  %1748 = vmatpush3.bf16.xpose.msra.mxu0 %v684_v41  ;;  %v2106_v47 = vpack.c.bf16 %v668_v43, %v668_v43 }
 0x22c   : > { %v663_v45 = vadd.f32 %v1657_v38, %v662_v42  ;;  %v996_v42 = vld [vmem:[%s2232_s10 + $0x8] sm:$0xff] }
 0x22d   : > { %v999_v43 = vpack.c.bf16 %v996_v42, %v996_v42 }
 0x22e   : > { %v2104_v46 = vpack.c.bf16 %v663_v45, %v660_v44 }
 0x22f   : > { %v1008_v44 = vsel %vm1006_vm6, %v999_v43, 0 }
 0x230   : > { %838 = vrot.lane.b32.xlu1 %v2104_v46, %s1913_s29  ;;  %1749 = vmatprep.mubr.msk.bf16.mxu0 %vm676_vm3, %v2104_v46 }
 0x232   : > { %1750 = vmatmul.mubr.msk.bf16.vlgmr.msra.gmra.mrb[4].mxu0 %vm676_vm3, %v2106_v47 }
 0x234   : > { %840 = vrot.lane.b32.xlu1 %v2106_v47, %s1913_s29 }
 0x29c   : > { %v843_v48 = vpop.permute.xlu0 %842 }
 0x29d   : > { %v851_v49 = vsel %vm676_vm3, %v843_v48, 0  ;;  %1820 = vmatprep.subr.msk.bf16.mxu0 %vm676_vm3, %v843_v48 }
 0x29e   : > { %1760 = vmatpush3.bf16.xpose.msra.mxu0 %v851_v49 }
 0x29f   : > { %1821 = vmatprep.subr.msk.bf16.mxu0 %vm1006_vm6, %v999_v43 }
 0x2a2   : > { %v839_v50 = vpop.permute.xlu1 %838 }
 0x2a3   : > { %1761 = vmatprep.mubr.msk.bf16.mxu0 %vm676_vm3, %v839_v50 }
 0x2a6   : > { %v841_v51 = vpop.permute.xlu1 %840 }
 0x2a7   : > { %1762 = vmatmul.mubr.msk.bf16.vlgmr.msra.gmra.mrb[8].mxu0 %vm676_vm3, %v841_v51 }
 0x2a8   : > { %1772 = vmatpush3.bf16.msra.mxu0 %v1008_v44 }
 0x305   : > { %v1751_v52 = vpop.f32.mrb[4].mxu0 }
 0x306   : > { %v720_v53 = vpop.f32.mrb[5].mxu0  ;;  %v736_v59 = vmul.f32 0.35355338, %v1751_v52 }
 0x307   : > { %v734_v54 = vmul.f32 0.35355338, %v720_v53  ;;  %v1752_v55 = vpop.f32.mrb[6].mxu0 }
 0x308   : > { %v723_v56 = vpop.f32.mrb[7].mxu0  ;;  %v745_v61 = vsel %vm744_vm5, %v736_v59, -inf }
 0x309   : > { %v735_v57 = vmul.f32 0.35355338, %v723_v56  ;;  %v738_v58 = vsel %vm737_vm4, %v734_v54, -inf }
 0x30a   : > { %739 = vmax.xlane.f32.xlu1 %v738_v58 }
 0x30b   : > { %v741_v60 = vsel %vm737_vm4, %v735_v57, -inf }
 0x30c   : > { %742 = vmax.xlane.f32.xlu0 %v741_v60 }
 0x310   : > { %746 = vmax.xlane.f32.xlu0 %v745_v61 }
 0x37a   : > { %v1763_v62 = vpop.f32.mrb[8].mxu0 }
 0x37b   : > { %v887_v63 = vpop.f32.mrb[9].mxu0  ;;  %v903_v5 = vmul.f32 0.35355338, %v1763_v62 }
 0x37c   : > { %v901_v0 = vmul.f32 0.35355338, %v887_v63  ;;  %v1764_v1 = vpop.f32.mrb[10].mxu0 }
 0x37d   : > { %v890_v2 = vpop.f32.mrb[11].mxu0  ;;  %v910_v10 = vsel %vm744_vm5, %v903_v5, -inf }
 0x37e   : > { %v902_v6 = vmul.f32 0.35355338, %v890_v2  ;;  %v904_v8 = vsel %vm737_vm4, %v901_v0, -inf }
 0x37f   : > { %905 = vmax.xlane.f32.xlu0 %v904_v8 }
 0x380   : > { %v907_v9 = vsel %vm737_vm4, %v902_v6, -inf }
 0x381   : > { %908 = vmax.xlane.f32.xlu1 %v907_v9 }
 0x383   : > { %911 = vmax.xlane.f32.xlu0 %v910_v10 }
 0x397   : > { %v740_v11 = vpop.xlane.xlu1 %739 }
 0x398   : > { %v748_v14 = vsub.f32 %v734_v54, %v740_v11  ;;  %v832_v11 = vld [vmem:[%s2232_s10] sm:$0xff] }
 0x399   : > { %v743_v12 = vpop.xlane.xlu0 %742 }
 0x39a   : > { %v749_v13 = vsub.f32 %v735_v57, %v743_v12  ;;  %v751_v19 = vmul.f32 1.442695, %v748_v14  ;;  %v835_v12 = vpack.c.bf16 %v832_v11, %v832_v11 }
 0x39c   : > { %v753_v15 = vmul.f32 1.442695, %v749_v13  ;;  %v1065_v13 = vsel %vm1006_vm6, %v835_v12, 0 }
 0x39d   : > { %v747_v17 = vpop.xlane.xlu0 %746 }
 0x39e   : > { %1855 = vpow2.f32 %v753_v15  ;;  %v750_v18 = vsub.f32 %v736_v59, %v747_v17 }
 0x3a0   : > { %v755_v20 = vmul.f32 1.442695, %v750_v18 }
 0x3a2   : > { %1857 = vpow2.f32 %v755_v20 }
 0x3a3   : > { %1859 = vpow2.f32 %v751_v19 }
 0x3a8   : > { %v1856_v21 = vpop.eup %1855 }
 0x3a9   : > { %v760_v22 = vsel %vm737_vm4, %v1856_v21, 0.0 }
 0x3aa   : > { %761 = vadd.xlane.f32.xlu0 %v760_v22 }
 0x3ac   : > { %v1858_v23 = vpop.eup %1857 }
 0x3ad   : > { %v763_v24 = vsel %vm744_vm5, %v1858_v23, 0.0  ;;  %v1860_v16 = vpop.eup %1859 }
 0x3ae   : > { %764 = vadd.xlane.f32.xlu1 %v763_v24  ;;  %v757_v26 = vsel %vm737_vm4, %v1860_v16, 0.0 }
 0x3b2   : > { %758 = vadd.xlane.f32.xlu1 %v757_v26 }
 0x40c   : > { %v906_v27 = vpop.xlane.xlu0 %905 }
 0x40d   : > { %v913_v29 = vsub.f32 %v901_v0, %v906_v27 }
 0x40e   : > { %v909_v28 = vpop.xlane.xlu1 %908 }
 0x40f   : > { %v914_v25 = vsub.f32 %v902_v6, %v909_v28  ;;  %v916_v33 = vmul.f32 1.442695, %v913_v29 }
 0x410   : > { %v912_v31 = vpop.xlane.xlu0 %911 }
 0x411   : > { %v918_v30 = vmul.f32 1.442695, %v914_v25  ;;  %v915_v32 = vsub.f32 %v903_v5, %v912_v31 }
 0x413   : > { %1861 = vpow2.f32 %v918_v30  ;;  %v920_v34 = vmul.f32 1.442695, %v915_v32 }
 0x415   : > { %1863 = vpow2.f32 %v920_v34 }
 0x416   : > { %1865 = vpow2.f32 %v916_v33 }
 0x41d   : > { %v1862_v35 = vpop.eup %1861 }
 0x41e   : > { %v925_v37 = vsel %vm737_vm4, %v1862_v35, 0.0 }
 0x41f   : > { %v1864_v38 = vpop.eup %1863  ;;  %926 = vadd.xlane.f32.xlu1 %v925_v37 }
 0x420   : > { %v928_v39 = vsel %vm744_vm5, %v1864_v38, 0.0  ;;  %v1866_v40 = vpop.eup %1865 }
 0x421   : > { %929 = vadd.xlane.f32.xlu0 %v928_v39  ;;  %v922_v41 = vsel %vm737_vm4, %v1866_v40, 0.0 }
 0x425   : > { %923 = vadd.xlane.f32.xlu0 %v922_v41 }
 0x430   : > { %775 = vrot.lane.b32.xlu1 %v2094_v36, %s1914_s30 }
 0x434   : > { %1119 = vrot.lane.b32.xlu1 %v2094_v36, %s1915_s15 }
 0x437   : > { %v762_v45 = vpop.xlane.xlu0 %761 }
 0x438   : > { %1115 = vrot.lane.b32.xlu1 %v2104_v46, %s1915_s15  ;;  %1867 = vrcp.f32 %v762_v45 }
 0x43b   : > { %v765_v48 = vpop.xlane.xlu1 %764  ;;  %939 = vrot.lane.b32.xlu0 %v2094_v36, %s1916_s16 }
 0x43c   : > { %1117 = vrot.lane.b32.xlu1 %v2106_v47, %s1915_s15  ;;  %s433_s15 = scalar_lea.vmem %s2234_s12, %s1827_s24 }
 0x43f   : > { %v759_v49 = vpop.xlane.xlu1 %758 }
 0x440   : > { %1869 = vrcp.f32 %v759_v49 }
 0x441   : > { %1871 = vrcp.f32 %v765_v48 }
 0x442   : > { %v1868_v50 = vpop.eup %1867 }
 0x443   : > { %v770_v53 = vmul.f32 %v1868_v50, %v1856_v21 }
 0x44a   : > { %v1870_v51 = vpop.eup %1869 }
 0x44b   : > { %v769_v52 = vmul.f32 %v1870_v51, %v1860_v16  ;;  %v1872_v55 = vpop.eup %1871 }
 0x44c   : > { %v771_v58 = vmul.f32 %v1872_v55, %v1858_v23 }
 0x44d   : > { %v772_v54 = vpack.c.bf16 %v770_v53, %v769_v52 }
 0x44e   : > { %v773_v61 = vpack.c.bf16 %v771_v58, %v771_v58 }
 0x44f   : > { %1755 = vmatprep.mubr.msk.bf16.mxu1 %vm737_vm4, %v772_v54 }
 0x4ac   : > { %v927_v56 = vpop.xlane.xlu1 %926 }
 0x4ae   : > { %v930_v57 = vpop.xlane.xlu0 %929 }
 0x4af   : > { %1873 = vrcp.f32 %v930_v57 }
 0x4b0   : > { %v776_v59 = vpop.permute.xlu1 %775  ;;  %1875 = vrcp.f32 %v927_v56 }
 0x4b1   : > { %1753 = vmatprep.subr.bf16.mxu1 %v776_v59 }
 0x4b2   : > { %1754 = vmatpush3.bf16.msra.mxu1 %v776_v59  ;;  %v924_v60 = vpop.xlane.xlu0 %923 }
 0x4b3   : > { %1877 = vrcp.f32 %v924_v60 }
 0x4b4   : > { %v1120_v62 = vpop.permute.xlu1 %1119 }
 0x4b5   : > { %1756 = vmatmul.mubr.msk.bf16.vlgmr.msra.gmra.mrb[4].mxu1 %vm737_vm4, %v773_v61  ;;  %1823 = vmatprep.subr.msk.bf16.mxu0 %vm676_vm3, %v1120_v62  ;;  %v1128_v27 = vsel %vm676_vm3, %v1120_v62, 0 }
 0x4b6   : > { %v940_v63 = vpop.permute.xlu0 %939 }
 0x4b7   : > { %1765 = vmatprep.subr.bf16.mxu1 %v940_v63 }
 0x4b8   : > { %1766 = vmatpush3.bf16.msra.mxu1 %v940_v63  ;;  %v1116_v28 = vpop.permute.xlu1 %1115 }
 0x4b9   : > { %v1874_v0 = vpop.eup %1873  ;;  %1822 = vmatprep.subr.msk.bf16.mxu1 %vm1006_vm6, %v835_v12 }
 0x4ba   : > { %v1876_v1 = vpop.eup %1875  ;;  %v936_v5 = vmul.f32 %v1874_v0, %v1864_v38 }
 0x4bb   : > { %v935_v8 = vmul.f32 %v1876_v1, %v1862_v35 }
 0x4bc   : > { %v938_v10 = vpack.c.bf16 %v936_v5, %v936_v5  ;;  %v1118_v29 = vpop.permute.xlu1 %1117 }
 0x4bd   : > { %v1878_v2 = vpop.eup %1877 }
 0x4be   : > { %v934_v6 = vmul.f32 %v1878_v2, %v1866_v40 }
 0x4c0   : > { %v937_v9 = vpack.c.bf16 %v935_v8, %v934_v6 }
 0x4c2   : > { %1767 = vmatprep.mubr.msk.bf16.mxu1 %vm737_vm4, %v937_v9 }
 0x4c3   : > { %1768 = vmatmul.mubr.msk.bf16.vlgmr.msra.gmra.mrb[8].mxu1 %vm737_vm4, %v938_v10 }
 0x4c4   : > { %1778 = vmatpush3.bf16.msra.mxu1 %v1065_v13 }
 0x588   : > { %v1757_v14 = vpop.f32.mrb[4].mxu1 }
 0x589   : > { %v818_v15 = vpop.f32.mrb[5].mxu1  ;;  %v834_v20 = vpack.c.bf16 %v1757_v14, %v1757_v14 }
 0x58a   : > { %v1758_v17 = vpop.f32.mrb[6].mxu1 }
 0x58b   : > { %v821_v18 = vpop.f32.mrb[7].mxu1 }
 0x58c   : > { %v833_v19 = vpack.c.bf16 %v821_v18, %v818_v15 }
 0x58e   : > { %1779 = vmatprep.mubr.msk.bf16.mxu1 %vm676_vm3, %v833_v19 }
 0x58f   : > { %1780 = vmatmul.mubr.msk.bf16.vlgmr.msra.gmra.mrb[12].mxu1 %vm676_vm3, %v834_v20 }
 0x596   : > { %v1769_v21 = vpop.f32.mrb[8].mxu1 }
 0x597   : > { %v982_v22 = vpop.f32.mrb[9].mxu1  ;;  %v998_v26 = vpack.c.bf16 %v1769_v21, %v1769_v21 }
 0x598   : > { %v1770_v23 = vpop.f32.mrb[10].mxu1 }
 0x599   : > { %v985_v24 = vpop.f32.mrb[11].mxu1 }
 0x59a   : > { %v997_v16 = vpack.c.bf16 %v985_v24, %v982_v22  ;;  %v1273_v22 = vld [vmem:[%s2232_s10 + $0x10] sm:$0xff] }
 0x59b   : > { %v1276_v23 = vpack.c.bf16 %v1273_v22, %v1273_v22 }
 0x59c   : > { %1773 = vmatprep.mubr.msk.bf16.mxu0 %vm676_vm3, %v997_v16 }
 0x59d   : > { %1774 = vmatmul.mubr.msk.bf16.vlgmr.msra.gmra.mrb[12].mxu0 %vm676_vm3, %v998_v26  ;;  %v1284_v24 = vsel %vm1006_vm6, %v1276_v23, 0 }
 0x59e   : > { %1784 = vmatpush3.bf16.xpose.msra.mxu0 %v1128_v27  ;;  %1785 = vmatprep.mubr.msk.bf16.mxu0 %vm676_vm3, %v1116_v28 }
 0x59f   : > { %1824 = vmatprep.subr.msk.bf16.mxu0 %vm1006_vm6, %v1276_v23 }
 0x5a5   : > { %1786 = vmatmul.mubr.msk.bf16.vlgmr.msra.gmra.mrb[16].mxu0 %vm676_vm3, %v1118_v29 }
 0x5a6   : > { %1796 = vmatpush3.bf16.msra.mxu0 %v1284_v24 }
 0x662   : > { %v1781_v25 = vpop.f32.mrb[12].mxu1 }
 0x663   : > { %v1101_v31 = vpop.f32.mrb[13].mxu1 }
 0x664   : > { %v1782_v30 = vpop.f32.mrb[14].mxu1 }
 0x665   : > { %v1104_v32 = vpop.f32.mrb[15].mxu1 }
 0x670   : > { %v1775_v33 = vpop.f32.mrb[12].mxu0 }
 0x671   : > { %v2157_v34 = vadd.f32 %v1781_v25, %v1775_v33  ;;  %v1044_v35 = vpop.f32.mrb[13].mxu0 }
 0x672   : > { %v2159_v37 = vadd.f32 %v1101_v31, %v1044_v35  ;;  %v1776_v38 = vpop.f32.mrb[14].mxu0 }
 0x673   : > { %v1047_v39 = vpop.f32.mrb[15].mxu0 }
 0x674   : > { %v2161_v40 = vadd.f32 %v1104_v32, %v1047_v39 }
 0x678   : > { %v1787_v41 = vpop.f32.mrb[16].mxu0 }
 0x679   : > { %v1164_v42 = vpop.f32.mrb[17].mxu0  ;;  %v1180_v48 = vmul.f32 0.35355338, %v1787_v41 }
 0x67a   : > { %v1178_v43 = vmul.f32 0.35355338, %v1164_v42  ;;  %v1788_v44 = vpop.f32.mrb[18].mxu0 }
 0x67b   : > { %v1167_v45 = vpop.f32.mrb[19].mxu0  ;;  %v1187_v52 = vsel %vm744_vm5, %v1180_v48, -inf }
 0x67c   : > { %v1179_v49 = vmul.f32 0.35355338, %v1167_v45  ;;  %v1181_v50 = vsel %vm737_vm4, %v1178_v43, -inf }
 0x67d   : > { %1182 = vmax.xlane.f32.xlu0 %v1181_v50 }
 0x67e   : > { %v1184_v51 = vsel %vm737_vm4, %v1179_v49, -inf }
 0x67f   : > { %1185 = vmax.xlane.f32.xlu1 %v1184_v51 }
 0x681   : > { %1188 = vmax.xlane.f32.xlu0 %v1187_v52 }
 0x70a   : > { %v1183_v53 = vpop.xlane.xlu0 %1182 }
 0x70b   : > { %v1190_v54 = vsub.f32 %v1178_v43, %v1183_v53 }
 0x70c   : > { %v1186_v55 = vpop.xlane.xlu1 %1185 }
 0x70d   : > { %v1193_v56 = vmul.f32 1.442695, %v1190_v54  ;;  %v1191_v57 = vsub.f32 %v1179_v49, %v1186_v55 }
 0x70e   : > { %v1189_v58 = vpop.xlane.xlu0 %1188 }
 0x70f   : > { %1879 = vpow2.f32 %v1193_v56  ;;  %v1195_v59 = vmul.f32 1.442695, %v1191_v57  ;;  %v1192_v60 = vsub.f32 %v1180_v48, %v1189_v58 }
 0x711   : > { %1881 = vpow2.f32 %v1195_v59  ;;  %v1197_v61 = vmul.f32 1.442695, %v1192_v60 }
 0x713   : > { %1883 = vpow2.f32 %v1197_v61  ;;  %v1495_v61 = vld [vmem:[%s2232_s10 + $0x18] sm:$0xff] }
 0x719   : > { %v1880_v62 = vpop.eup %1879 }
 0x71a   : > { %v1199_v63 = vsel %vm737_vm4, %v1880_v62, 0.0 }
 0x71b   : > { %v1882_v0 = vpop.eup %1881  ;;  %1200 = vadd.xlane.f32.xlu0 %v1199_v63 }
 0x71c   : > { %v1202_v5 = vsel %vm737_vm4, %v1882_v0, 0.0 }
 0x71d   : > { %v1884_v1 = vpop.eup %1883 }
 0x71e   : > { %v1205_v2 = vsel %vm744_vm5, %v1884_v1, 0.0 }
 0x71f   : > { %1206 = vadd.xlane.f32.xlu1 %v1205_v2  ;;  %1203 = vadd.xlane.f32.xlu0 %v1202_v5 }
 0x730   : > { %1341 = vrot.lane.b32.xlu1 %v2094_v36, %s1917_s19 }
 0x734   : > { %1337 = vrot.lane.b32.xlu1 %v2104_v46, %s1917_s19 }
 0x735   : > { %1216 = vrot.lane.b32.xlu0 %v2094_v36, %s1918_s20 }
 0x738   : > { %1339 = vrot.lane.b32.xlu1 %v2106_v47, %s1917_s19 }
 0x7a8   : > { %v1201_v6 = vpop.xlane.xlu0 %1200 }
 0x7a9   : > { %1885 = vrcp.f32 %v1201_v6 }
 0x7ac   : > { %v1204_v8 = vpop.xlane.xlu0 %1203  ;;  %v1207_v9 = vpop.xlane.xlu1 %1206 }
 0x7ad   : > { %1887 = vrcp.f32 %v1204_v8 }
 0x7ae   : > { %1889 = vrcp.f32 %v1207_v9 }
 0x7b0   : > { %v1217_v10 = vpop.permute.xlu0 %1216  ;;  %v1342_v11 = vpop.permute.xlu1 %1341 }
 0x7b1   : > { %1789 = vmatprep.subr.bf16.mxu1 %v1217_v10  ;;  %v1350_v19 = vsel %vm676_vm3, %v1342_v11, 0 }
 0x7b2   : > { %1790 = vmatpush3.bf16.msra.mxu1 %v1217_v10 }
 0x7b3   : > { %1825 = vmatprep.subr.msk.bf16.mxu1 %vm676_vm3, %v1342_v11  ;;  %v1886_v12 = vpop.eup %1885 }
 0x7b4   : > { %v1211_v14 = vmul.f32 %v1886_v12, %v1880_v62  ;;  %v1338_v20 = vpop.permute.xlu1 %1337  ;;  %v1498_v62 = vpack.c.bf16 %v1495_v61, %v1495_v61 }
 0x7b6   : > { %v1506_v63 = vsel %vm1006_vm6, %v1498_v62, 0 }
 0x7b7   : > { %v1888_v13 = vpop.eup %1887 }
 0x7b8   : > { %v1890_v46 = vpop.eup %1889  ;;  %v1212_v15 = vmul.f32 %v1888_v13, %v1882_v0  ;;  %v1340_v21 = vpop.permute.xlu1 %1339 }
 0x7b9   : > { %v1213_v17 = vmul.f32 %v1890_v46, %v1884_v1 }
 0x7ba   : > { %v1214_v18 = vpack.c.bf16 %v1212_v15, %v1211_v14 }
 0x7bb   : > { %v1215_v47 = vpack.c.bf16 %v1213_v17, %v1213_v17 }
 0x7bc   : > { %1791 = vmatprep.mubr.msk.bf16.mxu1 %vm737_vm4, %v1214_v18 }
 0x7bd   : > { %1792 = vmatmul.mubr.msk.bf16.vlgmr.msra.gmra.mrb[16].mxu1 %vm737_vm4, %v1215_v47 }
 0x7be   : > { %1802 = vmatpush3.bf16.xpose.msra.mxu1 %v1350_v19  ;;  %1803 = vmatprep.mubr.msk.bf16.mxu1 %vm676_vm3, %v1338_v20 }
 0x7bf   : > { %1826 = vmatprep.subr.msk.bf16.mxu1 %vm1006_vm6, %v1498_v62 }
 0x7c5   : > { %1804 = vmatmul.mubr.msk.bf16.vlgmr.msra.gmra.mrb[20].mxu1 %vm676_vm3, %v1340_v21 }
 0x7c6   : > { %1814 = vmatpush3.bf16.msra.mxu1 %v1506_v63 }
 0x890   : > { %v1793_v16 = vpop.f32.mrb[16].mxu1 }
 0x891   : > { %v1259_v26 = vpop.f32.mrb[17].mxu1  ;;  %v1275_v25 = vpack.c.bf16 %v1793_v16, %v1793_v16 }
 0x892   : > { %v1794_v27 = vpop.f32.mrb[18].mxu1 }
 0x893   : > { %v1262_v28 = vpop.f32.mrb[19].mxu1 }
 0x894   : > { %v1274_v29 = vpack.c.bf16 %v1262_v28, %v1259_v26  ;;  %v1684_v26 = vld [vmem:[%s2233_s11] ss:$0 sm:$0xff] }
 0x896   : > { %1797 = vmatprep.mubr.msk.bf16.mxu0 %vm676_vm3, %v1274_v29 }
 0x897   : > { %1798 = vmatmul.mubr.msk.bf16.vlgmr.msra.gmra.mrb[20].mxu0 %vm676_vm3, %v1275_v25 }
 0x898   : > { %v1805_v31 = vpop.f32.mrb[20].mxu1 }
 0x899   : > { %v1386_v30 = vpop.f32.mrb[21].mxu1  ;;  %v1402_v38 = vmul.f32 0.35355338, %v1805_v31 }
 0x89a   : > { %v1400_v32 = vmul.f32 0.35355338, %v1386_v30  ;;  %v1806_v33 = vpop.f32.mrb[22].mxu1 }
 0x89b   : > { %v1389_v35 = vpop.f32.mrb[23].mxu1  ;;  %v1409_v43 = vsel %vm744_vm5, %v1402_v38, -inf }
 0x89c   : > { %v1401_v39 = vmul.f32 0.35355338, %v1389_v35  ;;  %v1403_v41 = vsel %vm737_vm4, %v1400_v32, -inf }
 0x89d   : > { %1404 = vmax.xlane.f32.xlu0 %v1403_v41 }
 0x89e   : > { %v1406_v42 = vsel %vm737_vm4, %v1401_v39, -inf }
 0x89f   : > { %1407 = vmax.xlane.f32.xlu1 %v1406_v42 }
 0x8a1   : > { %1410 = vmax.xlane.f32.xlu0 %v1409_v43 }
 0x92a   : > { %v1405_v44 = vpop.xlane.xlu0 %1404 }
 0x92b   : > { %v1412_v45 = vsub.f32 %v1400_v32, %v1405_v44 }
 0x92c   : > { %v1408_v48 = vpop.xlane.xlu1 %1407 }
 0x92d   : > { %v1415_v49 = vmul.f32 1.442695, %v1412_v45  ;;  %v1413_v50 = vsub.f32 %v1401_v39, %v1408_v48 }
 0x92e   : > { %v1411_v51 = vpop.xlane.xlu0 %1410 }
 0x92f   : > { %1891 = vpow2.f32 %v1415_v49  ;;  %v1417_v52 = vmul.f32 1.442695, %v1413_v50  ;;  %v1414_v53 = vsub.f32 %v1402_v38, %v1411_v51 }
 0x931   : > { %1893 = vpow2.f32 %v1417_v52  ;;  %v1419_v54 = vmul.f32 1.442695, %v1414_v53 }
 0x933   : > { %1895 = vpow2.f32 %v1419_v54 }
 0x939   : > { %v1892_v55 = vpop.eup %1891 }
 0x93a   : > { %v1421_v56 = vsel %vm737_vm4, %v1892_v55, 0.0 }
 0x93b   : > { %v1894_v57 = vpop.eup %1893  ;;  %1422 = vadd.xlane.f32.xlu0 %v1421_v56 }
 0x93c   : > { %v1424_v60 = vsel %vm737_vm4, %v1894_v57, 0.0 }
 0x93d   : > { %v1896_v58 = vpop.eup %1895 }
 0x93e   : > { %v1427_v59 = vsel %vm744_vm5, %v1896_v58, 0.0 }
 0x93f   : > { %1428 = vadd.xlane.f32.xlu1 %v1427_v59  ;;  %1425 = vadd.xlane.f32.xlu0 %v1424_v60 }
 0x955   : > { %1438 = vrot.lane.b32.xlu0 %v2094_v36, %s1919_s26 }
 0x96a   : > { %v1799_v0 = vpop.f32.mrb[20].mxu0 }
 0x96b   : > { %v1336_v1 = vadd.f32 %v1799_v0, %v2157_v34  ;;  %v1320_v2 = vpop.f32.mrb[21].mxu0 }
 0x96c   : > { %v1334_v5 = vadd.f32 %v1320_v2, %v2159_v37  ;;  %v1800_v6 = vpop.f32.mrb[22].mxu0 }
 0x96d   : > { %v1323_v8 = vpop.f32.mrb[23].mxu0 }
 0x96e   : > { %v1335_v36 = vadd.f32 %v1323_v8, %v2161_v40 }
 0x9c8   : > { %v1423_v9 = vpop.xlane.xlu0 %1422 }
 0x9c9   : > { %1897 = vrcp.f32 %v1423_v9 }
 0x9cc   : > { %v1426_v10 = vpop.xlane.xlu0 %1425  ;;  %v1429_v11 = vpop.xlane.xlu1 %1428 }
 0x9cd   : > { %1899 = vrcp.f32 %v1426_v10 }
 0x9ce   : > { %1901 = vrcp.f32 %v1429_v11 }
 0x9d0   : > { %v1439_v12 = vpop.permute.xlu0 %1438 }
 0x9d1   : > { %1807 = vmatprep.subr.bf16.mxu0 %v1439_v12 }
 0x9d2   : > { %1808 = vmatpush3.bf16.msra.mxu0 %v1439_v12 }
 0x9d3   : > { %v1898_v13 = vpop.eup %1897 }
 0x9d4   : > { %v1433_v34 = vmul.f32 %v1898_v13, %v1892_v55 }
 0x9d7   : > { %v1900_v46 = vpop.eup %1899 }
 0x9d8   : > { %v1902_v14 = vpop.eup %1901  ;;  %v1434_v15 = vmul.f32 %v1900_v46, %v1894_v57 }
 0x9d9   : > { %v1435_v17 = vmul.f32 %v1902_v14, %v1896_v58 }
 0x9da   : > { %v1436_v37 = vpack.c.bf16 %v1434_v15, %v1433_v34 }
 0x9db   : > { %v1437_v18 = vpack.c.bf16 %v1435_v17, %v1435_v17 }
 0x9dc   : > { %1809 = vmatprep.mubr.msk.bf16.mxu0 %vm737_vm4, %v1436_v37 }
 0x9dd   : > { %1810 = vmatmul.mubr.msk.bf16.vlgmr.msra.gmra.mrb[24].mxu0 %vm737_vm4, %v1437_v18 }
 0xab0   : > { %v1811_v40 = vpop.f32.mrb[24].mxu0 }
 0xab1   : > { %v1481_v47 = vpop.f32.mrb[25].mxu0  ;;  %v1497_v22 = vpack.c.bf16 %v1811_v40, %v1811_v40 }
 0xab2   : > { %v1812_v19 = vpop.f32.mrb[26].mxu0 }
 0xab3   : > { %v1484_v20 = vpop.f32.mrb[27].mxu0 }
 0xab4   : > { %v1496_v21 = vpack.c.bf16 %v1484_v20, %v1481_v47 }
 0xab6   : > { %1815 = vmatprep.mubr.msk.bf16.mxu1 %vm676_vm3, %v1496_v21 }
 0xab7   : > { %1816 = vmatmul.mubr.msk.bf16.vlgmr.msra.gmra.mrb[24].mxu1 %vm676_vm3, %v1497_v22 }
 0xb8a   : > { %v1817_v23 = vpop.f32.mrb[24].mxu1 }
 0xb8b   : > { %v1558_v24 = vadd.f32 %v1817_v23, %v1336_v1  ;;  %v1542_v16 = vpop.f32.mrb[25].mxu1 }
 0xb8c   : > { %v1556_v27 = vadd.f32 %v1542_v16, %v1334_v5  ;;  %v1818_v28 = vpop.f32.mrb[26].mxu1 }
 0xb8d   : > { %v1561_v29 = vadd.f32 %v1558_v24, %v2013_v7  ;;  %v1545_v25 = vpop.f32.mrb[27].mxu1 }
 0xb8e   : > { %v1559_v31 = vadd.f32 %v1556_v27, %v2006_v3  ;;  %v1557_v30 = vadd.f32 %v1545_v25, %v1335_v36 }
 0xb8f   : > { %v1571_v32 = vadd.f32 %v1684_v26, %v1561_v29 }
 0xb90   : > { %v1569_v33 = vadd.f32 %v1684_v26, %v1559_v31  ;;  %v1560_v35 = vadd.f32 %v1557_v30, %v2008_v4 }
 0xb91   : > { %1574 = vst.msk [vmem:[%s433_s15 + $0x10] sm:$0x3] %vm449_vm1, %v1571_v32 }
 0xb92   : > { %1572 = vst.msk [vmem:[%s433_s15] sm:$0xff] %vm442_vm0, %v1569_v33  ;;  %v1570_v38 = vadd.f32 %v1684_v26, %v1560_v35 }
 0xb94   : > { %1573 = vst.msk [vmem:[%s433_s15 + $0x8] sm:$0xff] %vm442_vm0, %v1570_v38 }
 0xb95 PF: > { %s22_s21 = sadd.s32 1, %s1909_s21  }
 0xb96   : > { %p19_p4 = scmp.ge.s32.totalorder %s22_s21, 4  }
 0xb98   :  { %21 = sbr.rel (!%p19_p4) target bundleno = 1 (0x1), region = 101 }

</bundles_post_ra>
